<compile_context>
chip_gen: v6e
topology: v6e:2x2x1
jax: 0.10.0
libtpu: 0.0.40
codegen_flags: <defaults>
</compile_context>

<pallas_src>
import functools

import jax
import jax.numpy as jnp
from jax.experimental import pallas as pl
from jax.experimental.pallas import tpu as pltpu


# ---------------------------------------------------------------------------
# RoPE tables (VisionRotaryEmbeddingFast buffers, "lang" frequencies) with the
# rotate_half sign / even-odd lane selection folded in at build time.
# ---------------------------------------------------------------------------
def build_rope_tables(dim, pt_seq_len, ft_seq_len=None, theta=10000.0):
    if ft_seq_len is None:
        ft_seq_len = pt_seq_len
    freqs = 1.0 / (theta ** (jnp.arange(0, dim, 2, dtype=jnp.float32)[: dim // 2] / dim))
    t = jnp.arange(ft_seq_len, dtype=jnp.float32) / ft_seq_len * pt_seq_len
    freqs = jnp.einsum("i,f->if", t, freqs)                    # (ft, dim//2)
    freqs = jnp.repeat(freqs, 2, axis=-1)                      # (ft, dim)
    a = jnp.broadcast_to(freqs[:, None, :], (ft_seq_len, ft_seq_len, freqs.shape[-1]))
    b = jnp.broadcast_to(freqs[None, :, :], (ft_seq_len, ft_seq_len, freqs.shape[-1]))
    freqs2d = jnp.concatenate([a, b], axis=-1)                 # (ft, ft, 2*dim)
    D = freqs2d.shape[-1]
    assert D % 2 == 0, "rotary feature dim must be even"
    cos = jnp.cos(freqs2d).reshape(-1, D)                      # (n_patch, D)
    sin = jnp.sin(freqs2d).reshape(-1, D)
    # rotate_half(x)[2k] = -x[2k+1], rotate_half(x)[2k+1] = x[2k].  Fold the sign and the
    # even/odd selection into two sin tables so the kernel needs no iota/mod/select:
    even = (jnp.arange(D) % 2 == 0)
    sin_next = jnp.where(even, -sin, 0.0)    # multiplies x[lane + 1]
    sin_prev = jnp.where(even, 0.0, sin)     # multiplies x[lane - 1]
    return cos, sin, sin_next, sin_prev


def build_fused_rope_tables(cos, sin_next, sin_prev, num_heads):
    """Merge per-head (n_patch, hd) tables into (N, 3C) tables for the fused kernel.

    Lane layout matches the qkv projection output [q(h0..hH-1) | k(h0..hH-1) | v(...)]:
      * q and k slabs carry the per-head rope tables tiled over heads,
      * the v slab is identity (cos = 1, sin = 0),
      * a leading identity row is prepended for the cls token (never rotated).
    """
    n_patch, hd = cos.shape
    C = num_heads * hd
    cos_qk = jnp.tile(cos, (1, num_heads))                     # (n_patch, C)
    snx_qk = jnp.tile(sin_next, (1, num_heads))
    spr_qk = jnp.tile(sin_prev, (1, num_heads))
    ones_v = jnp.ones((n_patch, C), jnp.float32)
    zeros_v = jnp.zeros((n_patch, C), jnp.float32)
    cos_full = jnp.concatenate([cos_qk, cos_qk, ones_v], axis=-1)   # (n_patch, 3C)
    snx_full = jnp.concatenate([snx_qk, snx_qk, zeros_v], axis=-1)
    spr_full = jnp.concatenate([spr_qk, spr_qk, zeros_v], axis=-1)
    cos_full = jnp.concatenate([jnp.ones((1, 3 * C), jnp.float32), cos_full], axis=0)
    snx_full = jnp.concatenate([jnp.zeros((1, 3 * C), jnp.float32), snx_full], axis=0)
    spr_full = jnp.concatenate([jnp.zeros((1, 3 * C), jnp.float32), spr_full], axis=0)
    return cos_full, snx_full, spr_full                        # each (N, 3C)


# ---------------------------------------------------------------------------
# Fused kernel: one batch element per grid step.
#   qkv matmul -> lane-dense RoPE -> per-head softmax attention -> out projection.
# ---------------------------------------------------------------------------
def fused_attention_kernel(x_ref, w_qkv_ref, w_proj_ref, b_proj_ref,
                           cos_ref, snext_ref, sprev_ref, o_ref,
                           *, num_heads, head_dim):
    C = num_heads * head_dim
    x = x_ref[...]                                                      # (N, C)

    # 1) qkv projection (attention scale pre-folded into the q columns of w_qkv;
    #    qkv_bias=False so there is no bias term at all).
    qkv = jnp.dot(x, w_qkv_ref[...], preferred_element_type=jnp.float32)     # (N, 3C) f32

    # 2) fused RoPE on the whole lane-dense qkv slab (identity on the cls row + v slab).
    #    pltpu.roll needs non-negative shifts; every circular wrap (lane 0, lane 3C-1 and
    #    the q|k / k|v slab boundaries) lands on a lane whose sin table entry is 0.
    L = 3 * C
    qkv_next = pltpu.roll(qkv, shift=L - 1, axis=1)                     # x[i + 1]
    qkv_prev = pltpu.roll(qkv, shift=1, axis=1)                         # x[i - 1]
    qkv = qkv * cos_ref[...] + qkv_next * snext_ref[...] + qkv_prev * sprev_ref[...]

    # 3) per-head softmax attention (static unroll, 2-D tiles only); heads are merged back
    #    onto the lane axis so downstream work and the store stay lane-dense.
    o_heads = []
    for h in range(num_heads):
        lo = h * head_dim
        qh = qkv[:, lo:lo + head_dim]                                   # (N, hd)
        kh = qkv[:, C + lo:C + lo + head_dim]
        vh = qkv[:, 2 * C + lo:2 * C + lo + head_dim]
        s = jax.lax.dot_general(qh, kh, (((1,), (1,)), ((), ())),
                                preferred_element_type=jnp.float32)     # q @ k^T, (N, N)
        s = s - jnp.max(s, axis=-1, keepdims=True)
        p = jnp.exp(s)
        # approx reciprocal goes to the EUP slot (~1e-3 rel err, inside test tolerance)
        p = p * pl.reciprocal(jnp.sum(p, axis=-1, keepdims=True), approx=True)
        o_heads.append(jnp.dot(p, vh, preferred_element_type=jnp.float32))  # (N, hd)
    o = jnp.concatenate(o_heads, axis=-1)                               # (N, C) lane-dense

    # 4) output projection + bias; single unmasked full-width (N, C) store.
    out = jnp.dot(o.astype(x.dtype), w_proj_ref[...], preferred_element_type=jnp.float32)
    o_ref[...] = (out + b_proj_ref[...]).astype(o_ref.dtype)


# ---------------------------------------------------------------------------
# Full Attention.forward (eval mode)
# ---------------------------------------------------------------------------
def attention_forward(x, w_qkv, b_qkv, w_proj, b_proj, rope_tables, *,
                      num_heads, head_dim, scale):
    # TODO(synk): windowed relative_position_bias / rel_pos_bias, the xattn (xformers)
    # branch and subln are unused in this config (window_size=None, xattn=False,
    # subln=False); dropouts are eval-mode identities.  b_qkv is None (qkv_bias=False).
    del b_qkv
    B, N, C = x.shape
    assert C == num_heads * head_dim
    cos_f, snext_f, sprev_f = rope_tables

    # Fold the attention scale into the q columns of the qkv weight: rope is linear, so
    # scaling before rope == scaling after rope (the cls passthrough is linear too).
    col_scale = jnp.concatenate([jnp.full((C,), scale, jnp.float32),
                                 jnp.ones((2 * C,), jnp.float32)])
    w_qkv_scaled = (w_qkv * col_scale[None, :]).astype(w_qkv.dtype)

    kern = functools.partial(fused_attention_kernel,
                             num_heads=num_heads, head_dim=head_dim)
    return pl.pallas_call(
        kern,
        out_shape=jax.ShapeDtypeStruct((B, N, C), x.dtype),
        grid_spec=pltpu.PrefetchScalarGridSpec(
            num_scalar_prefetch=0,
            grid=(B,),
            in_specs=[
                pl.BlockSpec((None, N, C), lambda b: (b, 0, 0)),        # x: one batch/step
                pl.BlockSpec((C, 3 * C), lambda b: (0, 0)),             # weights resident
                pl.BlockSpec((C, C), lambda b: (0, 0)),
                pl.BlockSpec((1, C), lambda b: (0, 0)),
                pl.BlockSpec((N, 3 * C), lambda b: (0, 0)),             # rope tables resident
                pl.BlockSpec((N, 3 * C), lambda b: (0, 0)),
                pl.BlockSpec((N, 3 * C), lambda b: (0, 0)),
            ],
            out_specs=pl.BlockSpec((None, N, C), lambda b: (b, 0, 0)),
        ),
        compiler_params=pltpu.CompilerParams(dimension_semantics=("parallel",)),
    )(x, w_qkv_scaled, w_proj, b_proj.reshape(1, C), cos_f, snext_f, sprev_f)


# ---------------------------------------------------------------------------
# Pure-JAX reference (mirrors the PyTorch forward)
# ---------------------------------------------------------------------------
def _rotate_half_ref(x):
    *lead, d = x.shape
    xr = x.reshape(*lead, d // 2, 2)
    out = jnp.stack((-xr[..., 1], xr[..., 0]), axis=-1)
    return out.reshape(*lead, d)


def attention_ref(x, w_qkv, w_proj, b_proj, cos, sin, *, num_heads, head_dim, scale):
    B, N, C = x.shape
    qkv = x @ w_qkv                                             # qkv_bias=False
    qkv = qkv.reshape(B, N, 3, num_heads, head_dim).transpose(2, 0, 3, 1, 4)
    q, k, v = qkv[0], qkv[1], qkv[2]

    def rope(t):
        return t * cos + _rotate_half_ref(t) * sin

    q = jnp.concatenate([q[:, :, :1], rope(q[:, :, 1:])], axis=2)
    k = jnp.concatenate([k[:, :, :1], rope(k[:, :, 1:])], axis=2)
    attn = jnp.einsum("bhqd,bhkd->bhqk", q * scale, k)
    attn = jax.nn.softmax(attn, axis=-1)
    o = jnp.einsum("bhqk,bhkd->bhqd", attn, v)
    o = o.transpose(0, 2, 1, 3).reshape(B, N, num_heads * head_dim)
    return o @ w_proj + b_proj


if __name__ == "__main__":
    # Small EVA2-like config: 4 heads x head_dim 32 (model dim 128), 8x8 patch grid + cls.
    num_heads, head_dim = 4, 32
    C = num_heads * head_dim                    # dim = all_head_dim = 128
    pt_seq_len, ft_seq_len = 16, 8
    n_patch = ft_seq_len * ft_seq_len           # 64
    N = n_patch + 1                             # 65 tokens (cls + patches)
    B = 2
    scale = head_dim ** -0.5

    cos, sin, sin_next, sin_prev = build_rope_tables(head_dim // 2, pt_seq_len, ft_seq_len)
    rope_tables = build_fused_rope_tables(cos, sin_next, sin_prev, num_heads)

    key = jax.random.PRNGKey(0)
    kx, k1, k2, k3 = jax.random.split(key, 4)
    x = jax.random.normal(kx, (B, N, C), dtype=jnp.float32)
    w_qkv = jax.random.normal(k1, (C, 3 * C), dtype=jnp.float32) * (C ** -0.5)
    w_proj = jax.random.normal(k2, (C, C), dtype=jnp.float32) * (C ** -0.5)
    b_proj = jax.random.normal(k3, (C,), dtype=jnp.float32) * 0.02

    out = attention_forward(x, w_qkv, None, w_proj, b_proj, rope_tables,
                            num_heads=num_heads, head_dim=head_dim, scale=scale)
    out = jax.block_until_ready(out)

    ref = attention_ref(x, w_qkv, w_proj, b_proj, cos, sin,
                        num_heads=num_heads, head_dim=head_dim, scale=scale)
    assert out.shape == (B, N, C) and out.dtype == x.dtype
    assert jnp.allclose(out, ref, atol=2e-2, rtol=2e-2), "Pallas forward mismatch vs reference"
    print("KERNEL_OK")
</pallas_src>

<mosaic_0001>
module attributes {stable_mosaic.version = 11 : i64} {
  func.func @fused_attention_kernel(%arg0: i32, %arg1: memref<1x65x128xf32, #tpu.memory_space<vmem>>, %arg2: memref<128x384xf32, #tpu.memory_space<vmem>>, %arg3: memref<128x128xf32, #tpu.memory_space<vmem>>, %arg4: memref<1x128xf32, #tpu.memory_space<vmem>>, %arg5: memref<65x384xf32, #tpu.memory_space<vmem>>, %arg6: memref<65x384xf32, #tpu.memory_space<vmem>>, %arg7: memref<65x384xf32, #tpu.memory_space<vmem>>, %arg8: memref<1x65x128xf32, #tpu.memory_space<vmem>>) attributes {dimension_semantics = [#tpu.dimension_semantics<parallel>], iteration_bounds = array<i64: 2>, scalar_prefetch = 0 : i64, scratch_operands = 0 : i64, tpu.core_type = #tpu.core_type<tc>, window_params = [{transform_indices = @transform_0, window_bounds = array<i64: 1, 65, 128>}, {pipeline_mode = #tpu.pipeline_mode<synchronous>, transform_indices = @transform_1, window_bounds = array<i64: 128, 384>}, {pipeline_mode = #tpu.pipeline_mode<synchronous>, transform_indices = @transform_2, window_bounds = array<i64: 128, 128>}, {pipeline_mode = #tpu.pipeline_mode<synchronous>, transform_indices = @transform_3, window_bounds = array<i64: 1, 128>}, {pipeline_mode = #tpu.pipeline_mode<synchronous>, transform_indices = @transform_4, window_bounds = array<i64: 65, 384>}, {pipeline_mode = #tpu.pipeline_mode<synchronous>, transform_indices = @transform_5, window_bounds = array<i64: 65, 384>}, {pipeline_mode = #tpu.pipeline_mode<synchronous>, transform_indices = @transform_6, window_bounds = array<i64: 65, 384>}, {transform_indices = @transform_7, window_bounds = array<i64: 1, 65, 128>}]} {
    %c0 = arith.constant 0 : index
    %c0_0 = arith.constant 0 : index
    %c0_1 = arith.constant 0 : index
    %0 = vector.load %arg1[%c0, %c0_0, %c0_1] : memref<1x65x128xf32, #tpu.memory_space<vmem>>, vector<1x65x128xf32>
    %1 = vector.shape_cast %0 : vector<1x65x128xf32> to vector<65x128xf32>
    %c0_2 = arith.constant 0 : index
    %c0_3 = arith.constant 0 : index
    %2 = vector.load %arg2[%c0_2, %c0_3] : memref<128x384xf32, #tpu.memory_space<vmem>>, vector<128x384xf32>
    %cst = arith.constant dense<0.000000e+00> : vector<65x384xf32>
    %3 = tpu.matmul %1, %2, %cst {dimension_numbers = #tpu.dot_dimension_numbers<[1], [0], [0], [1], [0, 0, 1, 1], [], []>} : vector<65x128xf32>, vector<128x384xf32>, vector<65x384xf32> -> vector<65x384xf32>
    %c383_i32 = arith.constant 383 : i32
    %4 = tpu.dynamic_rotate %3 by %c383_i32 dim 1 : vector<65x384xf32>, i32 -> vector<65x384xf32>
    %c1_i32 = arith.constant 1 : i32
    %5 = tpu.dynamic_rotate %3 by %c1_i32 dim 1 : vector<65x384xf32>, i32 -> vector<65x384xf32>
    %c0_4 = arith.constant 0 : index
    %c0_5 = arith.constant 0 : index
    %6 = vector.load %arg5[%c0_4, %c0_5] : memref<65x384xf32, #tpu.memory_space<vmem>>, vector<65x384xf32>
    %7 = arith.mulf %3, %6 : vector<65x384xf32>
    %c0_6 = arith.constant 0 : index
    %c0_7 = arith.constant 0 : index
    %8 = vector.load %arg6[%c0_6, %c0_7] : memref<65x384xf32, #tpu.memory_space<vmem>>, vector<65x384xf32>
    %9 = arith.mulf %4, %8 : vector<65x384xf32>
    %10 = arith.addf %7, %9 : vector<65x384xf32>
    %c0_8 = arith.constant 0 : index
    %c0_9 = arith.constant 0 : index
    %11 = vector.load %arg7[%c0_8, %c0_9] : memref<65x384xf32, #tpu.memory_space<vmem>>, vector<65x384xf32>
    %12 = arith.mulf %5, %11 : vector<65x384xf32>
    %13 = arith.addf %10, %12 : vector<65x384xf32>
    %14 = vector.extract_strided_slice %13 {offsets = [0, 0], sizes = [65, 32], strides = [1, 1]} : vector<65x384xf32> to vector<65x32xf32>
    %15 = vector.extract_strided_slice %13 {offsets = [0, 128], sizes = [65, 32], strides = [1, 1]} : vector<65x384xf32> to vector<65x32xf32>
    %16 = vector.extract_strided_slice %13 {offsets = [0, 256], sizes = [65, 32], strides = [1, 1]} : vector<65x384xf32> to vector<65x32xf32>
    %cst_10 = arith.constant dense<0.000000e+00> : vector<65x65xf32>
    %17 = tpu.matmul %14, %15, %cst_10 {dimension_numbers = #tpu.dot_dimension_numbers<[1], [1], [0], [0], [0, 0, 1, 0], [], []>} : vector<65x32xf32>, vector<65x32xf32>, vector<65x65xf32> -> vector<65x65xf32>
    %cst_11 = arith.constant dense<0xFF800000> : vector<65xf32>
    %18 = vector.multi_reduction <maximumf>, %17, %cst_11 [1] : vector<65x65xf32> to vector<65xf32>
    %19 = vector.shape_cast %18 : vector<65xf32> to vector<65x1xf32>
    %20 = vector.broadcast %19 : vector<65x1xf32> to vector<65x65xf32>
    %21 = arith.subf %17, %20 : vector<65x65xf32>
    %22 = math.exp %21 : vector<65x65xf32>
    %cst_12 = arith.constant dense<0.000000e+00> : vector<65xf32>
    %23 = vector.multi_reduction <add>, %22, %cst_12 [1] : vector<65x65xf32> to vector<65xf32>
    %24 = vector.shape_cast %23 : vector<65xf32> to vector<65x1xf32>
    %25 = tpu.reciprocal %24 {approx = true} : vector<65x1xf32> -> vector<65x1xf32>
    %26 = vector.broadcast %25 : vector<65x1xf32> to vector<65x65xf32>
    %27 = arith.mulf %22, %26 : vector<65x65xf32>
    %cst_13 = arith.constant dense<0.000000e+00> : vector<65x32xf32>
    %28 = tpu.matmul %27, %16, %cst_13 {dimension_numbers = #tpu.dot_dimension_numbers<[1], [0], [0], [1], [0, 0, 1, 1], [], []>} : vector<65x65xf32>, vector<65x32xf32>, vector<65x32xf32> -> vector<65x32xf32>
    %29 = vector.extract_strided_slice %13 {offsets = [0, 32], sizes = [65, 32], strides = [1, 1]} : vector<65x384xf32> to vector<65x32xf32>
    %30 = vector.extract_strided_slice %13 {offsets = [0, 160], sizes = [65, 32], strides = [1, 1]} : vector<65x384xf32> to vector<65x32xf32>
    %31 = vector.extract_strided_slice %13 {offsets = [0, 288], sizes = [65, 32], strides = [1, 1]} : vector<65x384xf32> to vector<65x32xf32>
    %cst_14 = arith.constant dense<0.000000e+00> : vector<65x65xf32>
    %32 = tpu.matmul %29, %30, %cst_14 {dimension_numbers = #tpu.dot_dimension_numbers<[1], [1], [0], [0], [0, 0, 1, 0], [], []>} : vector<65x32xf32>, vector<65x32xf32>, vector<65x65xf32> -> vector<65x65xf32>
    %cst_15 = arith.constant dense<0xFF800000> : vector<65xf32>
    %33 = vector.multi_reduction <maximumf>, %32, %cst_15 [1] : vector<65x65xf32> to vector<65xf32>
    %34 = vector.shape_cast %33 : vector<65xf32> to vector<65x1xf32>
    %35 = vector.broadcast %34 : vector<65x1xf32> to vector<65x65xf32>
    %36 = arith.subf %32, %35 : vector<65x65xf32>
    %37 = math.exp %36 : vector<65x65xf32>
    %cst_16 = arith.constant dense<0.000000e+00> : vector<65xf32>
    %38 = vector.multi_reduction <add>, %37, %cst_16 [1] : vector<65x65xf32> to vector<65xf32>
    %39 = vector.shape_cast %38 : vector<65xf32> to vector<65x1xf32>
    %40 = tpu.reciprocal %39 {approx = true} : vector<65x1xf32> -> vector<65x1xf32>
    %41 = vector.broadcast %40 : vector<65x1xf32> to vector<65x65xf32>
    %42 = arith.mulf %37, %41 : vector<65x65xf32>
    %cst_17 = arith.constant dense<0.000000e+00> : vector<65x32xf32>
    %43 = tpu.matmul %42, %31, %cst_17 {dimension_numbers = #tpu.dot_dimension_numbers<[1], [0], [0], [1], [0, 0, 1, 1], [], []>} : vector<65x65xf32>, vector<65x32xf32>, vector<65x32xf32> -> vector<65x32xf32>
    %44 = vector.extract_strided_slice %13 {offsets = [0, 64], sizes = [65, 32], strides = [1, 1]} : vector<65x384xf32> to vector<65x32xf32>
    %45 = vector.extract_strided_slice %13 {offsets = [0, 192], sizes = [65, 32], strides = [1, 1]} : vector<65x384xf32> to vector<65x32xf32>
    %46 = vector.extract_strided_slice %13 {offsets = [0, 320], sizes = [65, 32], strides = [1, 1]} : vector<65x384xf32> to vector<65x32xf32>
    %cst_18 = arith.constant dense<0.000000e+00> : vector<65x65xf32>
    %47 = tpu.matmul %44, %45, %cst_18 {dimension_numbers = #tpu.dot_dimension_numbers<[1], [1], [0], [0], [0, 0, 1, 0], [], []>} : vector<65x32xf32>, vector<65x32xf32>, vector<65x65xf32> -> vector<65x65xf32>
    %cst_19 = arith.constant dense<0xFF800000> : vector<65xf32>
    %48 = vector.multi_reduction <maximumf>, %47, %cst_19 [1] : vector<65x65xf32> to vector<65xf32>
    %49 = vector.shape_cast %48 : vector<65xf32> to vector<65x1xf32>
    %50 = vector.broadcast %49 : vector<65x1xf32> to vector<65x65xf32>
    %51 = arith.subf %47, %50 : vector<65x65xf32>
    %52 = math.exp %51 : vector<65x65xf32>
    %cst_20 = arith.constant dense<0.000000e+00> : vector<65xf32>
    %53 = vector.multi_reduction <add>, %52, %cst_20 [1] : vector<65x65xf32> to vector<65xf32>
    %54 = vector.shape_cast %53 : vector<65xf32> to vector<65x1xf32>
    %55 = tpu.reciprocal %54 {approx = true} : vector<65x1xf32> -> vector<65x1xf32>
    %56 = vector.broadcast %55 : vector<65x1xf32> to vector<65x65xf32>
    %57 = arith.mulf %52, %56 : vector<65x65xf32>
    %cst_21 = arith.constant dense<0.000000e+00> : vector<65x32xf32>
    %58 = tpu.matmul %57, %46, %cst_21 {dimension_numbers = #tpu.dot_dimension_numbers<[1], [0], [0], [1], [0, 0, 1, 1], [], []>} : vector<65x65xf32>, vector<65x32xf32>, vector<65x32xf32> -> vector<65x32xf32>
    %59 = vector.extract_strided_slice %13 {offsets = [0, 96], sizes = [65, 32], strides = [1, 1]} : vector<65x384xf32> to vector<65x32xf32>
    %60 = vector.extract_strided_slice %13 {offsets = [0, 224], sizes = [65, 32], strides = [1, 1]} : vector<65x384xf32> to vector<65x32xf32>
    %61 = vector.extract_strided_slice %13 {offsets = [0, 352], sizes = [65, 32], strides = [1, 1]} : vector<65x384xf32> to vector<65x32xf32>
    %cst_22 = arith.constant dense<0.000000e+00> : vector<65x65xf32>
    %62 = tpu.matmul %59, %60, %cst_22 {dimension_numbers = #tpu.dot_dimension_numbers<[1], [1], [0], [0], [0, 0, 1, 0], [], []>} : vector<65x32xf32>, vector<65x32xf32>, vector<65x65xf32> -> vector<65x65xf32>
    %cst_23 = arith.constant dense<0xFF800000> : vector<65xf32>
    %63 = vector.multi_reduction <maximumf>, %62, %cst_23 [1] : vector<65x65xf32> to vector<65xf32>
    %64 = vector.shape_cast %63 : vector<65xf32> to vector<65x1xf32>
    %65 = vector.broadcast %64 : vector<65x1xf32> to vector<65x65xf32>
    %66 = arith.subf %62, %65 : vector<65x65xf32>
    %67 = math.exp %66 : vector<65x65xf32>
    %cst_24 = arith.constant dense<0.000000e+00> : vector<65xf32>
    %68 = vector.multi_reduction <add>, %67, %cst_24 [1] : vector<65x65xf32> to vector<65xf32>
    %69 = vector.shape_cast %68 : vector<65xf32> to vector<65x1xf32>
    %70 = tpu.reciprocal %69 {approx = true} : vector<65x1xf32> -> vector<65x1xf32>
    %71 = vector.broadcast %70 : vector<65x1xf32> to vector<65x65xf32>
    %72 = arith.mulf %67, %71 : vector<65x65xf32>
    %cst_25 = arith.constant dense<0.000000e+00> : vector<65x32xf32>
    %73 = tpu.matmul %72, %61, %cst_25 {dimension_numbers = #tpu.dot_dimension_numbers<[1], [0], [0], [1], [0, 0, 1, 1], [], []>} : vector<65x65xf32>, vector<65x32xf32>, vector<65x32xf32> -> vector<65x32xf32>
    %74 = tpu.concatenate %28, %43, %58, %73 in 1 : vector<65x32xf32>, vector<65x32xf32>, vector<65x32xf32>, vector<65x32xf32> -> vector<65x128xf32>
    %c0_26 = arith.constant 0 : index
    %c0_27 = arith.constant 0 : index
    %75 = vector.load %arg3[%c0_26, %c0_27] : memref<128x128xf32, #tpu.memory_space<vmem>>, vector<128x128xf32>
    %cst_28 = arith.constant dense<0.000000e+00> : vector<65x128xf32>
    %76 = tpu.matmul %74, %75, %cst_28 {dimension_numbers = #tpu.dot_dimension_numbers<[1], [0], [0], [1], [0, 0, 1, 1], [], []>} : vector<65x128xf32>, vector<128x128xf32>, vector<65x128xf32> -> vector<65x128xf32>
    %c0_29 = arith.constant 0 : index
    %c0_30 = arith.constant 0 : index
    %77 = vector.load %arg4[%c0_29, %c0_30] : memref<1x128xf32, #tpu.memory_space<vmem>>, vector<1x128xf32>
    %78 = vector.broadcast %77 : vector<1x128xf32> to vector<65x128xf32>
    %79 = arith.addf %76, %78 : vector<65x128xf32>
    %c0_31 = arith.constant 0 : index
    %c0_32 = arith.constant 0 : index
    %c0_33 = arith.constant 0 : index
    %80 = vector.load %arg8[%c0_31, %c0_32, %c0_33] : memref<1x65x128xf32, #tpu.memory_space<vmem>>, vector<1x65x128xf32>
    %81 = vector.shape_cast %80 : vector<1x65x128xf32> to vector<65x128xf32>
    %82 = vector.shape_cast %79 : vector<65x128xf32> to vector<1x65x128xf32>
    tpu.vector_store %arg8[%c0_31, %c0_32, %c0_33], %82 {strides = array<i32>} : memref<1x65x128xf32, #tpu.memory_space<vmem>>, vector<1x65x128xf32>,
    return
  }
  func.func @transform_0(%arg0: i32) -> (i32, i32, i32) {
    %c0_i32 = arith.constant 0 : i32
    %c0_i32_0 = arith.constant 0 : i32
    %c0_i32_1 = arith.constant 0 : i32
    return %arg0, %c0_i32, %c0_i32_0 : i32, i32, i32
  }
  func.func @transform_1(%arg0: i32) -> (i32, i32) {
    %c0_i32 = arith.constant 0 : i32
    %c0_i32_0 = arith.constant 0 : i32
    %c0_i32_1 = arith.constant 0 : i32
    return %c0_i32, %c0_i32_0 : i32, i32
  }
  func.func @transform_2(%arg0: i32) -> (i32, i32) {
    %c0_i32 = arith.constant 0 : i32
    %c0_i32_0 = arith.constant 0 : i32
    %c0_i32_1 = arith.constant 0 : i32
    return %c0_i32, %c0_i32_0 : i32, i32
  }
  func.func @transform_3(%arg0: i32) -> (i32, i32) {
    %c0_i32 = arith.constant 0 : i32
    %c0_i32_0 = arith.constant 0 : i32
    %c0_i32_1 = arith.constant 0 : i32
    return %c0_i32, %c0_i32_0 : i32, i32
  }
  func.func @transform_4(%arg0: i32) -> (i32, i32) {
    %c0_i32 = arith.constant 0 : i32
    %c0_i32_0 = arith.constant 0 : i32
    %c0_i32_1 = arith.constant 0 : i32
    return %c0_i32, %c0_i32_0 : i32, i32
  }
  func.func @transform_5(%arg0: i32) -> (i32, i32) {
    %c0_i32 = arith.constant 0 : i32
    %c0_i32_0 = arith.constant 0 : i32
    %c0_i32_1 = arith.constant 0 : i32
    return %c0_i32, %c0_i32_0 : i32, i32
  }
  func.func @transform_6(%arg0: i32) -> (i32, i32) {
    %c0_i32 = arith.constant 0 : i32
    %c0_i32_0 = arith.constant 0 : i32
    %c0_i32_1 = arith.constant 0 : i32
    return %c0_i32, %c0_i32_0 : i32, i32
  }
  func.func @transform_7(%arg0: i32) -> (i32, i32, i32) {
    %c0_i32 = arith.constant 0 : i32
    %c0_i32_0 = arith.constant 0 : i32
    %c0_i32_1 = arith.constant 0 : i32
    return %arg0, %c0_i32, %c0_i32_0 : i32, i32, i32
  }
}

</mosaic_0001>

<bundles_post_ra>
// kernel: tpu_custom_call.1
= control target key start
LH: loop header
LB: loop body
LE: loop exit
PB: predicated region body
PF: predicated region fallthrough
CT: control target
= control target key end

     0   :  { %12 = vsyncpa [#allocation3], 0  ;;  %s6290_s0 = inlined_call_operand.vmem [shape: f32[2,65,128], index: 0, kind: input, shape index: {}]   ;;  %s6291_s1 = inlined_call_operand.hbm [shape: f32[128,384], index: 1, kind: input, shape index: {}]   ;;  %s6292_s2 = inlined_call_operand.hbm [shape: f32[128,128], index: 2, kind: input, shape index: {}]   ;;  %s6293_s3 = inlined_call_operand.vmem [shape: f32[1,128], index: 3, kind: input, shape index: {}]   ;;  %s6294_s4 = inlined_call_operand.vmem [shape: f32[65,384], index: 4, kind: input, shape index: {}]   ;;  %s6295_s5 = inlined_call_operand.hbm [shape: f32[65,384], index: 5, kind: input, shape index: {}]   ;;  %s6296_s6 = inlined_call_operand.hbm [shape: f32[65,384], index: 6, kind: input, shape index: {}]   ;;  %s6297_s7 = inlined_call_operand.vmem [shape: f32[2,65,128], index: 7, kind: output, shape index: {}]  }
   0x1   :  { %13 = vsyncpa [#allocation5], 0 }
   0x2   :  { %14 = vsyncpa [#allocation8], 0  ;;  %s4412_s24 = smov 0  }
   0x3 LB: > { %s4357_s25 = smov [#allocation4]   ;;  %s4418_s27 = sadd.s32 4294967295, %s4355_s24   ;;  %s4355_s24 = sphi %s4412_s24, %s20_s24  }
   0x4   : > { %s228_s26 = sshll.u32 %s4357_s25, 4  ;;  %p3136_p0 = scmp.ge.s32.totalorder %s4355_s24, 1  ;;  %s229_s26 = int_to_ptr.vmem [resolvable:$true] %s228_s26 }
   0x5   : > { %p203_p1 = scmp.lt.s32.totalorder %s4355_s24, 3  ;;  %p6298_p2 = scmp.eq.s32.totalorder %s4418_s27, 0 }
   0x6   : > { %s4358_s29 = smov [#allocation2]   ;;  %s4359_s9 = smov [#allocation6]  }
   0x7   : > { %p4423_p3 = pnand %p3136_p0, %p203_p1  ;;  %s215_s30 = sshll.u32 %s4358_s29, 4  ;;  %s4429_s30 = int_to_ptr.vmem [resolvable:$true] %s215_s30 }
   0x8   : > { %s4437_s10 = sshll.u32 %s4359_s9, 4  ;;  %s4244_s11 = scalar_lea.vmem %s229_s26, 2048  ;;  %s248_s10 = int_to_ptr.vmem [resolvable:$true] %s4437_s10 }
   0x9   : > { %p3985_p4 = pneg %p4423_p3  ;;  %p4245_p7 = scmp.ne.s32.totalorder %s229_s26, %s4244_s11 }
   0xa   : > { %p4252_p10 = scmp.lt.s32.totalorder %s229_s26, %s229_s26  ;;  %p4253_p11 = scmp.lt.s32.totalorder %s4244_s11, %s4244_s11 }
   0xb   : > { %p4433_p5 = pnand %p6298_p2, %p3985_p4 }
   0xc   : > { %p4254_p12 = por %p4253_p11, %p4252_p10 }
   0xd   : > { %p4235_p6 = pneg %p4433_p5 }
   0xf   : > { %p4247_p8 = pnand %p4245_p7, %p4235_p6 }
  0x11   : > { %p4248_p9 = pneg %p4247_p8 }
  0x13   : > { %p4255_p13 = pnand %p4254_p12, %p4248_p9 }
  0x15   : > { %4258 = shalt.err (!%p4255_p13)
}
  0x16   : > { %s4360_s12 = smov 128   ;;  %s4361_s13 = smov 8  }
  0x17   : > { %3991 = dma.hbm_to_vmem [thread:$0]  (!%p4433_p5), %s6292_s2, 2048, %s229_s26, [#allocation5], %s4360_s12, %s4360_s12, %s4361_s13  }
  0x18   : > { %s4270_s16 = scalar_lea.vmem %s4429_s30, 6144  ;;  %p4278_p7 = scmp.lt.s32.totalorder %s4429_s30, %s4429_s30 }
  0x19   : > { %p4271_p0 = scmp.ne.s32.totalorder %s4429_s30, %s4270_s16  ;;  %p4279_p8 = scmp.lt.s32.totalorder %s4270_s16, %s4270_s16 }
  0x1b   : > { %p4273_p1 = pnand %p4271_p0, %p4235_p6  ;;  %p4280_p9 = por %p4279_p8, %p4278_p7 }
  0x1d   : > { %p4274_p4 = pneg %p4273_p1 }
  0x1f   : > { %p4281_p10 = pnand %p4280_p9, %p4274_p4 }
  0x21   : > { %4284 = shalt.err (!%p4281_p10)
}
  0x22   : > { %s4362_s17 = smov 384   ;;  %s4363_s18 = smov 24  }
  0x23   : > { %3988 = dma.hbm_to_vmem [thread:$0]  (!%p4433_p5), %s6291_s1, 6144, %s4429_s30, [#allocation3], %s4362_s17, %s4362_s17, %s4363_s18  }
  0x24   : > { %s4364_s21 = smov [#allocation7]   ;;  %s4296_s23 = scalar_lea.vmem %s248_s10, 3456 }
  0x25   : > { %s260_s22 = sshll.u32 %s4364_s21, 4  ;;  %p4297_p11 = scmp.ne.s32.totalorder %s248_s10, %s4296_s23  ;;  %s261_s22 = int_to_ptr.vmem [resolvable:$true] %s260_s22 }
  0x26   : > { %p4304_p0 = scmp.lt.s32.totalorder %s248_s10, %s248_s10  ;;  %p4305_p1 = scmp.lt.s32.totalorder %s4296_s23, %s4296_s23 }
  0x27   : > { %p4299_p12 = pnand %p4297_p11, %p4235_p6 }
  0x28   : > { %p4306_p4 = por %p4305_p1, %p4304_p0 }
  0x29   : > { %p4300_p13 = pneg %p4299_p12 }
  0x2b   : > { %p4307_p7 = pnand %p4306_p4, %p4300_p13 }
  0x2d   : > { %4310 = shalt.err (!%p4307_p7)
}
  0x2e   : > { %3994 = dma.hbm_to_vmem [thread:$0]  (!%p4433_p5), %s6295_s5, 3456, %s248_s10, [#allocation5], %s4362_s17, %s4362_s17, %s4363_s18  }
  0x2f   : > { %s4322_s29 = scalar_lea.vmem %s261_s22, 3456  ;;  %p4330_p11 = scmp.lt.s32.totalorder %s261_s22, %s261_s22 }
  0x30   : > { %p4323_p8 = scmp.ne.s32.totalorder %s261_s22, %s4322_s29  ;;  %p4331_p12 = scmp.lt.s32.totalorder %s4322_s29, %s4322_s29 }
  0x32   : > { %p4325_p9 = pnand %p4323_p8, %p4235_p6  ;;  %p4332_p2 = por %p4331_p12, %p4330_p11 }
  0x34   : > { %p4326_p10 = pneg %p4325_p9 }
  0x36   : > { %p4333_p0 = pnand %p4332_p2, %p4326_p10 }
  0x38   : > { %4336 = shalt.err (!%p4333_p0)
}
  0x39   : > { %3997 = dma.hbm_to_vmem [thread:$0]  (!%p4433_p5), %s6296_s6, 3456, %s261_s22, [#allocation8], %s4362_s17, %s4362_s17, %s4363_s18  }
  0x3a   : > { %284 = sbr.rel (%p4423_p3) target bundleno = 1896 (0x768), region = 48 }
  0x3f   : > { %p6323_p13 = scmp.eq.s32.totalorder %s4418_s27, 0 }
  0x41   : > { %4342 = dma.done.wait (%p6323_p13), [#allocation3], 6144   ;;  %p6324_p6 = pmov %p6323_p13 }
  0x43   : > { %4344 = vsyncadd (%p6324_p6), [#allocation3], 4294961152  ;;  %p6325_p1 = pmov %p6324_p6 }
  0x45   : > { %4346 = dma.done.wait (%p6325_p1), [#allocation5], 5504   ;;  %p6326_p2 = pmov %p6325_p1 }
  0x46   : > { %p6327_p4 = pmov %p6325_p1 }
  0x47   : > { %4348 = vsyncadd (%p6326_p2), [#allocation5], 4294961792 }
  0x48   : > { %4350 = dma.done.wait (%p6327_p4), [#allocation8], 3456   ;;  %p6328_p5 = pmov %p6325_p1 }
  0x49   : > { %v6299_v0 = vmov 0.0   ;;  %vm4366_vm0 = vmmov 0   ;;  %v393_v1 = vld [vmem:[#allocation2 + $0x170] sm:$0xff]  ;;  %v394_v2 = vld [vmem:[#allocation2 + $0x178] sm:$0xff]  ;;  %v392_v3 = vld [vmem:[#allocation2 + $0x168] sm:$0xff]  ;;  %p328_p3 = scmp.lt.s32.totalorder %s4418_s27, 1 }
  0x4a   : > { %4352 = vsyncadd (%p6328_p5), [#allocation8], 4294963840  ;;  %3458 = vmatprep.subr.mxu1 %v6299_v0  ;;  %3490 = vmatprep.mubr.msk.f32.mxu1 %vm4366_vm0, %v6299_v0  ;;  %v390_v4 = vld [vmem:[#allocation2 + $0x158] sm:$0xff]  ;;  %v391_v5 = vld [vmem:[#allocation2 + $0x160] sm:$0xff]  ;;  %s4367_s12 = smov 127   ;;  %s4368_s13 = smov 1  }
  0x4b   : > { %459 = vmatprep.mubr.f32.mxu0 %v6299_v0  ;;  %395 = vmatprep.subr.mxu0 %v393_v1  ;;  %v389_v6 = vld [vmem:[#allocation2 + $0x150] sm:$0xff]  ;;  %v387_v7 = vld [vmem:[#allocation2 + $0x140] sm:$0xff]  ;;  %v388_v8 = vld [vmem:[#allocation2 + $0x148] sm:$0xff]  ;;  %s6389_s27 = smov (!%p328_p3, %s4418_s27), 1  ;;  %s4369_s20 = smov 96   ;;  %vm1006_vm3 = vcmask 261120  }
  0x4c   : > { %3459 = vmatpush3.msra.mxu1 %v394_v2  ;;  %396 = vmatpush1.msra.mxu0 %v392_v3  ;;  %v386_v9 = vld [vmem:[#allocation2 + $0x138] sm:$0xff]  ;;  %v384_v10 = vld [vmem:[#allocation2 + $0x128] sm:$0xff]  ;;  %v385_v11 = vld [vmem:[#allocation2 + $0x130] sm:$0xff]  ;;  %s3968_s28 = smul.u32 72, %s6389_s27  ;;  %s4370_s17 = smov 64   ;;  %vm1299_vm4 = vcmask 1040384  }
  0x4d   : > { %3460 = vmatprep.subr.mxu1 %v6299_v0  ;;  %397 = vmatprep.subr.mxu0 %v390_v4  ;;  %v383_v12 = vld [vmem:[#allocation2 + $0x120] sm:$0xff]  ;;  %v381_v13 = vld [vmem:[#allocation2 + $0x110] sm:$0xff]  ;;  %v382_v14 = vld [vmem:[#allocation2 + $0x118] sm:$0xff]  ;;  %vm1171_vm5 = vcmask 531456   ;;  %vm1196_vm6 = vcmask 524288   ;;  %vm2876_vm7 = vcmask 523264  }
  0x4e   : > { %3461 = vmatpush3.msra.mxu1 %v391_v5  ;;  %398 = vmatpush1.msra.mxu0 %v389_v6  ;;  %v380_v15 = vld [vmem:[#allocation2 + $0x108] sm:$0xff]  ;;  %v378_v16 = vld [vmem:[#allocation2 + $0xf8] sm:$0xff]  ;;  %v379_v17 = vld [vmem:[#allocation2 + $0x100] sm:$0xff]  ;;  %s4522_s11 = scalar_lea.vmem %s6290_s0, %s3968_s28  ;;  %vm2886_vm8 = vcmask 785408   ;;  %s6276_s16 = scalar_lea.vmem %s6297_s7, %s3968_s28 }
  0x4f   : > { %3462 = vmatprep.subr.mxu1 %v6299_v0  ;;  %399 = vmatprep.subr.mxu0 %v387_v7  ;;  %v377_v18 = vld [vmem:[#allocation2 + $0xf0] sm:$0xff]  ;;  %v375_v19 = vld [vmem:[#allocation2 + $0xe0] sm:$0xff]  ;;  %v376_v20 = vld [vmem:[#allocation2 + $0xe8] sm:$0xff] }
  0x50   : > { %3463 = vmatpush3.msra.mxu1 %v388_v8  ;;  %400 = vmatpush1.msra.mxu0 %v386_v9  ;;  %v374_v21 = vld [vmem:[#allocation2 + $0xd8] sm:$0xff]  ;;  %v372_v22 = vld [vmem:[#allocation2 + $0xc8] sm:$0xff]  ;;  %v373_v23 = vld [vmem:[#allocation2 + $0xd0] sm:$0xff] }
  0x51   : > { %3464 = vmatprep.subr.mxu1 %v6299_v0  ;;  %401 = vmatprep.subr.mxu0 %v384_v10  ;;  %v371_v24 = vld [vmem:[#allocation2 + $0xc0] sm:$0xff]  ;;  %v369_v25 = vld [vmem:[#allocation2 + $0xb0] sm:$0xff]  ;;  %v370_v26 = vld [vmem:[#allocation2 + $0xb8] sm:$0xff] }
  0x52   : > { %3465 = vmatpush3.msra.mxu1 %v385_v11  ;;  %402 = vmatpush1.msra.mxu0 %v383_v12  ;;  %v368_v27 = vld [vmem:[#allocation2 + $0xa8] sm:$0xff]  ;;  %v366_v28 = vld [vmem:[#allocation2 + $0x98] sm:$0xff]  ;;  %v367_v29 = vld [vmem:[#allocation2 + $0xa0] sm:$0xff] }
  0x53   : > { %3466 = vmatprep.subr.mxu1 %v6299_v0  ;;  %403 = vmatprep.subr.mxu0 %v381_v13  ;;  %v365_v30 = vld [vmem:[#allocation2 + $0x90] sm:$0xff]  ;;  %v363_v31 = vld [vmem:[#allocation2 + $0x80] sm:$0xff]  ;;  %v364_v32 = vld [vmem:[#allocation2 + $0x88] sm:$0xff] }
  0x54   : > { %3467 = vmatpush3.msra.mxu1 %v382_v14  ;;  %404 = vmatpush1.msra.mxu0 %v380_v15  ;;  %v362_v33 = vld [vmem:[#allocation2 + $0x78] sm:$0xff]  ;;  %v360_v34 = vld [vmem:[#allocation2 + $0x68] sm:$0xff]  ;;  %v361_v35 = vld [vmem:[#allocation2 + $0x70] sm:$0xff] }
  0x55   : > { %3468 = vmatprep.subr.mxu1 %v6299_v0  ;;  %405 = vmatprep.subr.mxu0 %v378_v16  ;;  %v359_v36 = vld [vmem:[#allocation2 + $0x60] sm:$0xff]  ;;  %v357_v37 = vld [vmem:[#allocation2 + $0x50] sm:$0xff]  ;;  %v358_v38 = vld [vmem:[#allocation2 + $0x58] sm:$0xff] }
  0x56   : > { %3469 = vmatpush3.msra.mxu1 %v379_v17  ;;  %406 = vmatpush1.msra.mxu0 %v377_v18  ;;  %v356_v39 = vld [vmem:[#allocation2 + $0x48] sm:$0xff]  ;;  %v354_v40 = vld [vmem:[#allocation2 + $0x38] sm:$0xff]  ;;  %v355_v41 = vld [vmem:[#allocation2 + $0x40] sm:$0xff] }
  0x57   : > { %3470 = vmatprep.subr.mxu1 %v6299_v0  ;;  %407 = vmatprep.subr.mxu0 %v375_v19  ;;  %v353_v42 = vld [vmem:[#allocation2 + $0x30] sm:$0xff]  ;;  %v351_v43 = vld [vmem:[#allocation2 + $0x20] sm:$0xff]  ;;  %v352_v44 = vld [vmem:[#allocation2 + $0x28] sm:$0xff] }
  0x58   : > { %3471 = vmatpush3.msra.mxu1 %v376_v20  ;;  %408 = vmatpush1.msra.mxu0 %v374_v21  ;;  %v350_v45 = vld [vmem:[#allocation2 + $0x18] sm:$0xff]  ;;  %v348_v46 = vld [vmem:[#allocation2 + $0x8] sm:$0xff]  ;;  %v349_v47 = vld [vmem:[#allocation2 + $0x10] sm:$0xff] }
  0x59   : > { %3472 = vmatprep.subr.mxu1 %v6299_v0  ;;  %409 = vmatprep.subr.mxu0 %v372_v22  ;;  %v347_v48 = vld [vmem:[#allocation2] sm:$0xff]  ;;  %v339_v50 = vld [vmem:[%s4522_s11 + $0x8] sm:$0xff]  ;;  %v340_v51 = vld [vmem:[%s4522_s11 + $0x10] sm:$0xff] }
  0x5a   : > { %3473 = vmatpush3.msra.mxu1 %v373_v23  ;;  %410 = vmatpush1.msra.mxu0 %v371_v24  ;;  %v338_v49 = vld [vmem:[%s4522_s11] sm:$0xff]  ;;  %v341_v52 = vld [vmem:[%s4522_s11 + $0x18] sm:$0xff]  ;;  %v343_v54 = vld [vmem:[%s4522_s11 + $0x28] sm:$0xff] }
  0x5b   : > { %3474 = vmatprep.subr.mxu1 %v6299_v0  ;;  %411 = vmatprep.subr.mxu0 %v369_v25  ;;  %v342_v53 = vld [vmem:[%s4522_s11 + $0x20] sm:$0xff]  ;;  %v344_v55 = vld [vmem:[%s4522_s11 + $0x30] sm:$0xff]  ;;  %v345_v56 = vld [vmem:[%s4522_s11 + $0x38] sm:$0xff] }
  0x5c   : > { %3475 = vmatpush3.msra.mxu1 %v370_v26  ;;  %412 = vmatpush1.msra.mxu0 %v368_v27  ;;  %v346_v57 = vld [vmem:[%s4522_s11 + $0x40] sm:$0x1]  ;;  %s4371_s11 = smov 32  }
  0x5d   : > { %3476 = vmatprep.subr.mxu1 %v6299_v0  ;;  %413 = vmatprep.subr.mxu0 %v366_v28 }
  0x5e   : > { %3477 = vmatpush3.msra.mxu1 %v367_v29  ;;  %414 = vmatpush1.msra.mxu0 %v365_v30 }
  0x5f   : > { %3478 = vmatprep.subr.mxu1 %v6299_v0  ;;  %415 = vmatprep.subr.mxu0 %v363_v31 }
  0x60   : > { %3479 = vmatpush3.msra.mxu1 %v364_v32  ;;  %416 = vmatpush1.msra.mxu0 %v362_v33 }
  0x61   : > { %3480 = vmatprep.subr.mxu1 %v6299_v0  ;;  %417 = vmatprep.subr.mxu0 %v360_v34 }
  0x62   : > { %3481 = vmatpush3.msra.mxu1 %v361_v35  ;;  %418 = vmatpush1.msra.mxu0 %v359_v36 }
  0x63   : > { %3482 = vmatprep.subr.mxu1 %v6299_v0  ;;  %419 = vmatprep.subr.mxu0 %v357_v37 }
  0x64   : > { %3483 = vmatpush3.msra.mxu1 %v358_v38  ;;  %420 = vmatpush1.msra.mxu0 %v356_v39 }
  0x65   : > { %3484 = vmatprep.subr.mxu1 %v6299_v0  ;;  %421 = vmatprep.subr.mxu0 %v354_v40 }
  0x66   : > { %3485 = vmatpush3.msra.mxu1 %v355_v41  ;;  %422 = vmatpush1.msra.mxu0 %v353_v42  ;;  %v678_v41 = vlaneseq }
  0x67   : > { %3486 = vmatprep.subr.mxu1 %v6299_v0  ;;  %423 = vmatprep.subr.mxu0 %v351_v43 }
  0x68   : > { %3487 = vmatpush3.msra.mxu1 %v352_v44  ;;  %424 = vmatpush1.msra.mxu0 %v350_v45  ;;  %v4749_v44 = vand.u32 127, %v678_v41 }
  0x69   : > { %3488 = vmatprep.subr.mxu1 %v6299_v0  ;;  %425 = vmatprep.subr.mxu0 %v348_v46 }
  0x6a   : > { %3489 = vmatpush3.msra.mxu1 %v349_v47  ;;  %426 = vmatpush1.msra.mxu0 %v347_v48  ;;  %vm680_vm1 = vcmp.lt.s32.totalorder %v4749_v44, 127  ;;  %v812_v47 = vld [vmem:[%s6294_s4 + $0xb0] sm:$0xff]  ;;  %v860_v48 = vld [vmem:[#allocation6 + $0x80] sm:$0xff]  ;;  %vm762_vm2 = vcmp.lt.s32.totalorder %v4749_v44, 1 }
  0x6b   : > { %3491 = vmatmul.mubr.f32.vlgmr.msra.gmra.mxu1 %v338_v49  ;;  %460 = vmatmul.mubr.f32.vlgmr.msra.gmra.mxu0 %v338_v49 }
  0x6c   : > { %3493 = vmatprep.mubr.msk.f32.mxu1 %vm4366_vm0, %v6299_v0  ;;  %465 = vmatprep.mubr.f32.mxu0 %v6299_v0 }
  0x6d   : > { %3517 = vmatprep.subr.mxu0 %v6299_v0  ;;  %3562 = vmatprep.subr.mxu1 %v6299_v0 }
  0x6f   : > { %3494 = vmatmul.mubr.f32.gmra.mxu1 %v339_v50  ;;  %466 = vmatmul.mubr.f32.gmra.mxu0 %v339_v50 }
  0x70   : > { %3496 = vmatprep.mubr.msk.f32.mxu1 %vm4366_vm0, %v6299_v0  ;;  %471 = vmatprep.mubr.f32.mxu0 %v6299_v0 }
  0x73   : > { %3497 = vmatmul.mubr.f32.gmra.mxu1 %v340_v51  ;;  %472 = vmatmul.mubr.f32.gmra.mxu0 %v340_v51  ;;  %v866_v51 = vld [vmem:[#allocation6 + $0xb0] sm:$0xff] }
  0x74   : > { %3499 = vmatprep.mubr.msk.f32.mxu1 %vm4366_vm0, %v6299_v0  ;;  %477 = vmatprep.mubr.f32.mxu0 %v6299_v0 }
  0x77   : > { %3500 = vmatmul.mubr.f32.gmra.mxu1 %v341_v52  ;;  %478 = vmatmul.mubr.f32.gmra.mxu0 %v341_v52 }
  0x78   : > { %3502 = vmatprep.mubr.msk.f32.mxu1 %vm4366_vm0, %v6299_v0  ;;  %483 = vmatprep.mubr.f32.mxu0 %v6299_v0 }
  0x7b   : > { %3503 = vmatmul.mubr.f32.gmra.mxu1 %v342_v53  ;;  %484 = vmatmul.mubr.f32.gmra.mxu0 %v342_v53  ;;  %v806_v53 = vld [vmem:[%s6294_s4 + $0x80] sm:$0xff] }
  0x7c   : > { %3505 = vmatprep.mubr.msk.f32.mxu1 %vm4366_vm0, %v6299_v0  ;;  %489 = vmatprep.mubr.f32.mxu0 %v6299_v0 }
  0x7f   : > { %3506 = vmatmul.mubr.f32.gmra.mxu1 %v343_v54  ;;  %490 = vmatmul.mubr.f32.gmra.mxu0 %v343_v54  ;;  %v947_v54 = vld [vmem:[#allocation7 + $0xb0] sm:$0xff] }
  0x80   : > { %3508 = vmatprep.mubr.msk.f32.mxu1 %vm4366_vm0, %v6299_v0  ;;  %495 = vmatprep.mubr.f32.mxu0 %v6299_v0 }
  0x83   : > { %3509 = vmatmul.mubr.f32.gmra.mxu1 %v344_v55  ;;  %496 = vmatmul.mubr.f32.gmra.mxu0 %v344_v55 }
  0x84   : > { %3511 = vmatprep.mubr.msk.f32.mxu1 %vm4366_vm0, %v6299_v0  ;;  %501 = vmatprep.mubr.f32.mxu0 %v6299_v0 }
  0x87   : > { %3512 = vmatmul.mubr.f32.gmra.mxu1 %v345_v56  ;;  %502 = vmatmul.mubr.f32.gmra.mxu0 %v345_v56 }
  0x88   : > { %3514 = vmatprep.mubr.msk.f32.mxu1 %vm4366_vm0, %v6299_v0  ;;  %507 = vmatprep.mubr.f32.mxu0 %v6299_v0 }
  0x8b   : > { %3515 = vmatmul.mubr.f32.gmra.mxu1 %v346_v57  ;;  %508 = vmatmul.mubr.f32.gmra.mxu0 %v346_v57 }
  0x8c   : > { %3580 = vmatprep.mubr.msk.f32.mxu1 %vm4366_vm0, %v6299_v0  ;;  %3535 = vmatprep.mubr.msk.f32.mxu0 %vm4366_vm0, %v6299_v0 }
 0x12b   : > { %v4565_v58 = vpop.f32.mrf.mxu1  ;;  %v4567_v59 = vpop.f32.mrf.mxu0 }
 0x12c   : > { %6329 = vst [vmem:[#allocation12_spill] sm:$0xff] %v4565_v58 }
 0x12d   : > { %v3492_v60 = vpop.f32.mrf.mxu1  ;;  %v4569_v61 = vpop.f32.mrf.mxu0 }
 0x12f   : > { %v4571_v62 = vpop.f32.mrf.mxu1  ;;  %v4573_v63 = vpop.f32.mrf.mxu0 }
 0x130   : > { %6330 = vst [vmem:[#allocation13_spill] sm:$0xff] %v4571_v62 }
 0x131   : > { %v3495_v1 = vpop.f32.mrf.mxu1  ;;  %v4575_v2 = vpop.f32.mrf.mxu0 }
 0x133   : > { %v4577_v3 = vpop.f32.mrf.mxu1  ;;  %v4579_v4 = vpop.f32.mrf.mxu0 }
 0x134   : > { %6331 = vst [vmem:[#allocation14_spill] sm:$0xff] %v4577_v3 }
 0x135   : > { %v3498_v5 = vpop.f32.mrf.mxu1  ;;  %v4581_v6 = vpop.f32.mrf.mxu0 }
 0x137   : > { %v4583_v7 = vpop.f32.mrf.mxu1  ;;  %v4585_v8 = vpop.f32.mrf.mxu0 }
 0x139   : > { %v3501_v9 = vpop.f32.mrf.mxu1  ;;  %v4587_v10 = vpop.f32.mrf.mxu0 }
 0x13b   : > { %v4589_v11 = vpop.f32.mrf.mxu1  ;;  %v4593_v12 = vpop.f32.mrf.mxu0 }
 0x13c   : > { %668 = vrot.lane.b32.xlu1 %v4589_v11, %s4367_s12  ;;  %716 = vrot.lane.b32.xlu0 %v4593_v12, %s4368_s13 }
 0x13d   : > { %v3504_v13 = vpop.f32.mrf.mxu1  ;;  %v4597_v14 = vpop.f32.mrf.mxu0 }
 0x13f   : > { %v4599_v15 = vpop.f32.mrf.mxu1  ;;  %v4605_v17 = vpop.f32.mrf.mxu0 }
 0x140   : > { %6332 = vst [vmem:[#allocation15_spill] sm:$0xff] %v4599_v15  ;;  %734 = vrot.lane.b32.xlu1 %v4597_v14, %s4368_s13  ;;  %650 = vrot.lane.b32.xlu0 %v4597_v14, %s4367_s12 }
 0x141   : > { %v3507_v16 = vpop.f32.mrf.mxu1  ;;  %v4613_v20 = vpop.f32.mrf.mxu0 }
 0x142   : > { %v833_v9 = vmul.f32 %v806_v53, %v4613_v20 }
 0x143   : > { %v4607_v18 = vpop.f32.mrf.mxu1  ;;  %v4621_v23 = vpop.f32.mrf.mxu0 }
 0x144   : > { %670 = vrot.lane.b32.xlu1 %v4599_v15, %s4367_s12  ;;  %718 = vrot.lane.b32.xlu0 %v4605_v17, %s4368_s13 }
 0x145   : > { %v3510_v19 = vpop.f32.mrf.mxu1  ;;  %v4629_v26 = vpop.f32.mrf.mxu0 }
 0x147   : > { %v4615_v21 = vpop.f32.mrf.mxu1  ;;  %v4635_v27 = vpop.f32.mrf.mxu0 }
 0x148   : > { %736 = vrot.lane.b32.xlu1 %v4613_v20, %s4368_s13  ;;  %652 = vrot.lane.b32.xlu0 %v4613_v20, %s4367_s12  ;;  %v869_v20 = vld [vmem:[#allocation6 + $0xc8] sm:$0x1] }
 0x149   : > { %v3513_v22 = vpop.f32.mrf.mxu1  ;;  %v4641_v28 = vpop.f32.mrf.mxu0 }
 0x14a   : > { %v839_v57 = vmul.f32 %v812_v47, %v4641_v28  ;;  %v941_v22 = vld [vmem:[#allocation7 + $0x80] sm:$0xff] }
 0x14b   : > { %v4623_v24 = vpop.f32.mrf.mxu1  ;;  %v4647_v29 = vpop.f32.mrf.mxu0 }
 0x14c   : > { %672 = vrot.lane.b32.xlu1 %v4607_v18, %s4367_s12  ;;  %720 = vrot.lane.b32.xlu0 %v4621_v23, %s4368_s13 }
 0x14d   : > { %v3516_v25 = vpop.f32.mrf.mxu1  ;;  %v4653_v30 = vpop.f32.mrf.mxu0 }
 0x150   : > { %738 = vrot.lane.b32.xlu1 %v4629_v26, %s4368_s13  ;;  %654 = vrot.lane.b32.xlu0 %v4629_v26, %s4367_s12 }
 0x154   : > { %674 = vrot.lane.b32.xlu1 %v4615_v21, %s4367_s12  ;;  %722 = vrot.lane.b32.xlu0 %v4635_v27, %s4368_s13 }
 0x158   : > { %740 = vrot.lane.b32.xlu1 %v4641_v28, %s4368_s13  ;;  %656 = vrot.lane.b32.xlu0 %v4641_v28, %s4367_s12  ;;  %v815_v28 = vld [vmem:[%s6294_s4 + $0xc8] sm:$0x1] }
 0x159   : > { %v842_v53 = vmul.f32 %v815_v28, %v4653_v30  ;;  %v809_v28 = vld [vmem:[%s6294_s4 + $0x98] sm:$0xff] }
 0x15c   : > { %724 = vrot.lane.b32.xlu1 %v4647_v29, %s4368_s13  ;;  %676 = vrot.lane.b32.xlu0 %v4623_v24, %s4367_s12 }
 0x160   : > { %666 = vrot.lane.b32.xlu1 %v4583_v7, %s4367_s12  ;;  %658 = vrot.lane.b32.xlu0 %v4653_v30, %s4367_s12 }
 0x164   : > { %742 = vrot.lane.b32.xlu1 %v4653_v30, %s4368_s13  ;;  %648 = vrot.lane.b32.xlu0 %v4587_v10, %s4367_s12 }
 0x168   : > { %732 = vrot.lane.b32.xlu1 %v4587_v10, %s4368_s13  ;;  %714 = vrot.lane.b32.xlu0 %v4585_v8, %s4368_s13 }
 0x16c   : > { %664 = vrot.lane.b32.xlu1 %v4577_v3, %s4367_s12  ;;  %646 = vrot.lane.b32.xlu0 %v4581_v6, %s4367_s12 }
 0x170   : > { %730 = vrot.lane.b32.xlu1 %v4581_v6, %s4368_s13  ;;  %712 = vrot.lane.b32.xlu0 %v4579_v4, %s4368_s13 }
 0x174   : > { %662 = vrot.lane.b32.xlu1 %v4571_v62, %s4367_s12  ;;  %644 = vrot.lane.b32.xlu0 %v4575_v2, %s4367_s12 }
 0x178   : > { %728 = vrot.lane.b32.xlu1 %v4575_v2, %s4368_s13  ;;  %710 = vrot.lane.b32.xlu0 %v4573_v63, %s4368_s13 }
 0x17c   : > { %660 = vrot.lane.b32.xlu1 %v4565_v58, %s4367_s12  ;;  %642 = vrot.lane.b32.xlu0 %v4569_v61, %s4367_s12 }
 0x180   : > { %726 = vrot.lane.b32.xlu1 %v4569_v61, %s4368_s13  ;;  %708 = vrot.lane.b32.xlu0 %v4567_v59, %s4368_s13 }
 0x184   : > { %744 = vrot.lane.b32.xlu1 %v4565_v58, %s4368_s13  ;;  %624 = vrot.lane.b32.xlu0 %v4567_v59, %s4367_s12 }
 0x188   : > { %746 = vrot.lane.b32.xlu1 %v4571_v62, %s4368_s13  ;;  %626 = vrot.lane.b32.xlu0 %v4573_v63, %s4367_s12 }
 0x18c   : > { %748 = vrot.lane.b32.xlu1 %v4577_v3, %s4368_s13  ;;  %628 = vrot.lane.b32.xlu0 %v4579_v4, %s4367_s12 }
 0x190   : > { %750 = vrot.lane.b32.xlu1 %v4583_v7, %s4368_s13  ;;  %630 = vrot.lane.b32.xlu0 %v4585_v8, %s4367_s12 }
 0x194   : > { %752 = vrot.lane.b32.xlu1 %v4589_v11, %s4368_s13  ;;  %632 = vrot.lane.b32.xlu0 %v4593_v12, %s4367_s12 }
 0x198   : > { %754 = vrot.lane.b32.xlu1 %v4599_v15, %s4368_s13  ;;  %634 = vrot.lane.b32.xlu0 %v4605_v17, %s4367_s12 }
 0x19c   : > { %756 = vrot.lane.b32.xlu1 %v4607_v18, %s4368_s13  ;;  %636 = vrot.lane.b32.xlu0 %v4621_v23, %s4367_s12 }
 0x1a0   : > { %758 = vrot.lane.b32.xlu1 %v4615_v21, %s4368_s13  ;;  %638 = vrot.lane.b32.xlu0 %v4635_v27, %s4367_s12 }
 0x1a4   : > { %640 = vrot.lane.b32.xlu1 %v4647_v29, %s4367_s12 }
 0x1ae   : > { %v4725_v31 = vpop.permute.xlu1 %668  ;;  %v4727_v32 = vpop.permute.xlu0 %716 }
 0x1b2   : > { %v4729_v33 = vpop.permute.xlu1 %734  ;;  %v4731_v34 = vpop.permute.xlu0 %650 }
 0x1b6   : > { %v4733_v35 = vpop.permute.xlu1 %670  ;;  %v4735_v36 = vpop.permute.xlu0 %718 }
 0x1ba   : > { %v4737_v37 = vpop.permute.xlu1 %736  ;;  %v4739_v38 = vpop.permute.xlu0 %652 }
 0x1bb   : > { %6333 = vst [vmem:[#allocation16_spill] sm:$0xff] %v4737_v37  ;;  %v686_v49 = vsel %vm680_vm1, %v4739_v38, %v4733_v35  ;;  %v777_v25 = vsel %vm762_vm2, %v4735_v36, %v4737_v37  ;;  %v836_v37 = vmul.f32 %v809_v28, %v4629_v26 }
 0x1bc   : > { %v887_v60 = vmul.f32 %v860_v48, %v686_v49  ;;  %v968_v48 = vmul.f32 %v941_v22, %v777_v25  ;;  %v800_v22 = vld [vmem:[%s6294_s4 + $0x50] sm:$0xff] }
 0x1bd   : > { %v827_v62 = vmul.f32 %v800_v22, %v4587_v10  ;;  %v803_v10 = vld [vmem:[%s6294_s4 + $0x68] sm:$0xff]  ;;  %v6337_v22 = vmov 0.0  }
 0x1be   : > { %v4741_v39 = vpop.permute.xlu1 %672  ;;  %v4743_v40 = vpop.permute.xlu0 %720  ;;  %v914_v41 = vadd.f32 %v887_v60, %v833_v9  ;;  %v854_v60 = vld [vmem:[#allocation6 + $0x50] sm:$0xff] }
 0x1c2   : > { %v4745_v42 = vpop.permute.xlu1 %738  ;;  %v4747_v43 = vpop.permute.xlu0 %654 }
 0x1c3   : > { %6334 = vst [vmem:[#allocation17_spill] sm:$0xff] %v4745_v42  ;;  %v687_v9 = vsel %vm680_vm1, %v4747_v43, %v4741_v39  ;;  %v778_v26 = vsel %vm762_vm2, %v4743_v40, %v4745_v42  ;;  %v844_v42 = vld [vmem:[#allocation6] sm:$0xff] }
 0x1c6   : > { %v4751_v45 = vpop.permute.xlu1 %674  ;;  %v4753_v46 = vpop.permute.xlu0 %722 }
 0x1ca   : > { %v4763_v50 = vpop.permute.xlu1 %740  ;;  %v4766_v52 = vpop.permute.xlu0 %656 }
 0x1cb   : > { %v779_v55 = vsel %vm762_vm2, %v4753_v46, %v4763_v50  ;;  %v688_v56 = vsel %vm680_vm1, %v4766_v52, %v4751_v45 }
 0x1cc   : > { %v893_v1 = vmul.f32 %v866_v51, %v688_v56  ;;  %v974_v13 = vmul.f32 %v947_v54, %v779_v55  ;;  %v950_v55 = vld [vmem:[#allocation7 + $0xc8] sm:$0x1]  ;;  %v4805_v56 = vadd.f32 %v968_v48, %v914_v41 }
 0x1ce   : > { %v4780_v5 = vpop.permute.xlu1 %724  ;;  %v920_v16 = vadd.f32 %v893_v1, %v839_v57  ;;  %v4783_v19 = vpop.permute.xlu0 %676  ;;  %v863_v1 = vld [vmem:[#allocation6 + $0x98] sm:$0xff] }
 0x1cf   : > { %6335 = vst [vmem:[#allocation18_spill] sm:$0xff] %v4780_v5  ;;  %v890_v48 = vmul.f32 %v863_v1, %v687_v9  ;;  %v944_v1 = vld [vmem:[#allocation7 + $0x98] sm:$0xff] }
 0x1d0   : > { %v4789_v0 = vadd.f32 %v974_v13, %v920_v16 }
 0x1d2   : > { %v4794_v47 = vpop.permute.xlu1 %666  ;;  %1445 = vrot.lane.b32.xlu1 %v4789_v0, %s4369_s20  ;;  %v4798_v49 = vpop.permute.xlu0 %658 }
 0x1d3   : > { %v689_v51 = vsel %vm680_vm1, %v4798_v49, %v4783_v19 }
 0x1d4   : > { %v896_v54 = vmul.f32 %v869_v20, %v689_v51 }
 0x1d6   : > { %v4807_v57 = vpop.permute.xlu1 %742  ;;  %v923_v13 = vadd.f32 %v896_v54, %v842_v53  ;;  %1441 = vrot.lane.b32.xlu1 %v4805_v56, %s4369_s20  ;;  %v4819_v30 = vpop.permute.xlu0 %648  ;;  %v935_v54 = vld [vmem:[#allocation7 + $0x50] sm:$0xff] }
 0x1d7   : > { %v780_v16 = vsel %vm762_vm2, %v4780_v5, %v4807_v57  ;;  %v684_v41 = vsel %vm680_vm1, %v4819_v30, %v4794_v47  ;;  %v971_v5 = vmul.f32 %v944_v1, %v778_v26 }
 0x1d8   : > { %v977_v25 = vmul.f32 %v950_v55, %v780_v16  ;;  %v881_v20 = vmul.f32 %v854_v60, %v684_v41  ;;  %v857_v55 = vld [vmem:[#allocation6 + $0x68] sm:$0xff]  ;;  %v685_v16 = vsel %vm680_vm1, %v4731_v34, %v4725_v31  ;;  %v917_v41 = vadd.f32 %v890_v48, %v836_v37 }
 0x1d9   : > { %v776_v37 = vsel %vm762_vm2, %v4727_v32, %v4729_v33 }
 0x1da   : > { %v4831_v51 = vadd.f32 %v977_v25, %v923_v13  ;;  %v4833_v53 = vpop.permute.xlu1 %732  ;;  %v4840_v58 = vpop.permute.xlu0 %714  ;;  %v908_v9 = vadd.f32 %v881_v20, %v827_v62  ;;  %v884_v25 = vmul.f32 %v857_v55, %v685_v16  ;;  %v938_v62 = vld [vmem:[#allocation7 + $0x68] sm:$0xff]  ;;  %v851_v20 = vld [vmem:[#allocation6 + $0x38] sm:$0xff]  ;;  %v4883_v55 = vadd.f32 %v971_v5, %v917_v41 }
 0x1db   : > { %6336 = vst [vmem:[#allocation19_spill] sm:$0xff] %v4833_v53  ;;  %v775_v60 = vsel %vm762_vm2, %v4840_v58, %v4833_v53  ;;  %v830_v53 = vmul.f32 %v803_v10, %v4597_v14  ;;  %v797_v16 = vld [vmem:[%s6294_s4 + $0x38] sm:$0xff]  ;;  %v965_v1 = vmul.f32 %v938_v62, %v776_v37  ;;  %v794_v37 = vld [vmem:[%s6294_s4 + $0x20] sm:$0xff] }
 0x1dc   : > { %1447 = vrot.lane.b32.xlu0 %v4831_v51, %s4369_s20  ;;  %3518 = vmatpush3.xpose.msk.msra.mxu0 %vm1006_vm3, %v4831_v51  ;;  %v962_v13 = vmul.f32 %v935_v54, %v775_v60  ;;  %v932_v60 = vld [vmem:[#allocation7 + $0x38] sm:$0xff]  ;;  %v824_v5 = vmul.f32 %v797_v16, %v4581_v6 }
 0x1dd   : > { %3519 = vmatprep.subr.mxu0 %v6337_v22  ;;  %v911_v14 = vadd.f32 %v884_v25, %v830_v53  ;;  %v848_v25 = vld [vmem:[#allocation6 + $0x20] sm:$0xff] }
 0x1de   : > { %v4859_v28 = vpop.permute.xlu1 %664  ;;  %v4861_v3 = vadd.f32 %v962_v13, %v908_v9  ;;  %v4863_v15 = vpop.permute.xlu0 %646 }
 0x1df   : > { %v683_v48 = vsel %vm680_vm1, %v4863_v15, %v4859_v28  ;;  %v4902_v41 = vadd.f32 %v965_v1, %v911_v14  ;;  %v821_v1 = vmul.f32 %v794_v37, %v4575_v2  ;;  %v791_v37 = vld [vmem:[%s6294_s4 + $0x8] sm:$0xff] }
 0x1e0   : > { %760 = vrot.lane.b32.xlu0 %v4623_v24, %s4368_s13  ;;  %3520 = vmatpush3.xpose.msk.msra.mxu0 %vm1006_vm3, %v4789_v0  ;;  %v878_v26 = vmul.f32 %v851_v20, %v683_v48 }
 0x1e1   : > { %1437 = vrot.lane.b32.xlu1 %v4861_v3, %s4369_s20  ;;  %3521 = vmatprep.subr.mxu0 %v6337_v22 }
 0x1e2   : > { %v4881_v54 = vpop.permute.xlu1 %730  ;;  %v4888_v10 = vpop.permute.xlu0 %712  ;;  %v905_v20 = vadd.f32 %v878_v26, %v824_v5 }
 0x1e3   : > { %6338 = vst [vmem:[#allocation20_spill] sm:$0xff] %v4881_v54  ;;  %v774_v9 = vsel %vm762_vm2, %v4888_v10, %v4881_v54 }
 0x1e4   : > { %1443 = vrot.lane.b32.xlu0 %v4883_v55, %s4369_s20  ;;  %3522 = vmatpush3.xpose.msk.msra.mxu0 %vm1006_vm3, %v4883_v55  ;;  %v959_v53 = vmul.f32 %v932_v60, %v774_v9  ;;  %v929_v60 = vld [vmem:[#allocation7 + $0x20] sm:$0xff] }
 0x1e5   : > { %3523 = vmatprep.subr.mxu0 %v6337_v22 }
 0x1e6   : > { %v4900_v13 = vpop.permute.xlu1 %662  ;;  %v645_v62 = vpop.permute.xlu0 %644  ;;  %v4915_v14 = vadd.f32 %v959_v53, %v905_v20  ;;  %v845_v20 = vld [vmem:[#allocation6 + $0x8] sm:$0xff] }
 0x1e7   : > { %6339 = vst [vmem:[#allocation21_spill] sm:$0xff] %v4900_v13  ;;  %v682_v48 = vsel %vm680_vm1, %v645_v62, %v4900_v13 }
 0x1e8   : > { %1439 = vrot.lane.b32.xlu0 %v4902_v41, %s4369_s20  ;;  %3524 = vmatpush3.xpose.msk.msra.mxu0 %vm1006_vm3, %v4805_v56  ;;  %v875_v6 = vmul.f32 %v848_v25, %v682_v48 }
 0x1e9   : > { %3525 = vmatprep.subr.mxu0 %v6337_v22 }
 0x1ea   : > { %v4917_v16 = vpop.permute.xlu1 %728  ;;  %v711_v26 = vpop.permute.xlu0 %710  ;;  %v902_v5 = vadd.f32 %v875_v6, %v821_v1  ;;  %v926_v1 = vld [vmem:[#allocation7 + $0x8] sm:$0xff] }
 0x1eb   : > { %6340 = vst [vmem:[#allocation22_spill] sm:$0xff] %v4917_v16  ;;  %v773_v9 = vsel %vm762_vm2, %v711_v26, %v4917_v16 }
 0x1ec   : > { %1435 = vrot.lane.b32.xlu0 %v4915_v14, %s4369_s20  ;;  %3526 = vmatpush3.xpose.msk.msra.mxu0 %vm1006_vm3, %v4902_v41  ;;  %v956_v25 = vmul.f32 %v929_v60, %v773_v9  ;;  %v818_v9 = vmul.f32 %v791_v37, %v4569_v61 }
 0x1ed   : > { %3527 = vmatprep.subr.mxu0 %v6337_v22 }
 0x1ee   : > { %v4928_v53 = vpop.permute.xlu1 %660  ;;  %v4930_v48 = vadd.f32 %v956_v25, %v902_v5  ;;  %v643_v2 = vpop.permute.xlu0 %642 }
 0x1ef   : > { %6341 = vst [vmem:[#allocation23_spill] sm:$0xff] %v4928_v53  ;;  %v681_v16 = vsel %vm680_vm1, %v643_v2, %v4928_v53  ;;  %v925_v53 = vld [vmem:[#allocation7] sm:$0xff] }
 0x1f0   : > { %3528 = vmatpush3.xpose.msk.msra.mxu0 %vm1006_vm3, %v4861_v3  ;;  %v872_v6 = vmul.f32 %v845_v20, %v681_v16  ;;  %1433 = vrot.lane.b32.xlu1 %v4930_v48, %s4369_s20  ;;  %v790_v20 = vld [vmem:[%s6294_s4] sm:$0xff] }
 0x1f1   : > { %3529 = vmatprep.subr.mxu0 %v6337_v22 }
 0x1f2   : > { %v4943_v60 = vpop.permute.xlu1 %726  ;;  %v709_v5 = vpop.permute.xlu0 %708  ;;  %v899_v54 = vadd.f32 %v872_v6, %v818_v9 }
 0x1f3   : > { %6342 = vst [vmem:[#allocation24_spill] sm:$0xff] %v4943_v60  ;;  %v772_v25 = vsel %vm762_vm2, %v709_v5, %v4943_v60 }
 0x1f4   : > { %3530 = vmatpush3.xpose.msk.msra.mxu0 %vm1006_vm3, %v4915_v14  ;;  %v953_v16 = vmul.f32 %v926_v1, %v772_v25  ;;  %v817_v1 = vmul.f32 %v790_v20, %v4567_v59  ;;  %v847_v25 = vld [vmem:[#allocation6 + $0x18] sm:$0xff] }
 0x1f5   : > { %3531 = vmatprep.subr.mxu0 %v6337_v22 }
 0x1f6   : > { %v4955_v13 = vpop.permute.xlu1 %744  ;;  %v4957_v61 = vadd.f32 %v953_v16, %v899_v54  ;;  %v4959_v37 = vpop.permute.xlu0 %624  ;;  %v793_v54 = vld [vmem:[%s6294_s4 + $0x18] sm:$0xff] }
 0x1f7   : > { %6343 = vst [vmem:[#allocation25_spill] sm:$0xff] %v4955_v13  ;;  %6344 = vst [vmem:[#allocation26_spill] sm:$0xff] %v4959_v37  ;;  %v781_v60 = vsel %vm762_vm2, %v4955_v13, %v709_v5  ;;  %v690_v6 = vsel %vm680_vm1, %v4959_v37, %v643_v2  ;;  %v928_v37 = vld [vmem:[#allocation7 + $0x18] sm:$0xff]  ;;  %v820_v20 = vmul.f32 %v793_v54, %v4573_v63  ;;  %v931_v54 = vld [vmem:[#allocation7 + $0x30] sm:$0xff] }
 0x1f8   : > { %3532 = vmatpush3.xpose.msk.msra.mxu0 %vm1006_vm3, %v4930_v48  ;;  %v871_v9 = vmul.f32 %v844_v42, %v690_v6  ;;  %1431 = vrot.lane.b32.xlu0 %v4957_v61, %s4369_s20  ;;  %v952_v16 = vmul.f32 %v925_v53, %v781_v60 }
 0x1f9   : > { %3533 = vmatprep.subr.mxu0 %v6337_v22 }
 0x1fa   : > { %v4976_v5 = vpop.permute.xlu1 %746  ;;  %v898_v2 = vadd.f32 %v871_v9, %v817_v1  ;;  %v4978_v13 = vpop.permute.xlu0 %626 }
 0x1fb   : > { %v782_v59 = vsel %vm762_vm2, %v4976_v5, %v711_v26  ;;  %v691_v42 = vsel %vm680_vm1, %v4978_v13, %v645_v62  ;;  %v796_v26 = vld [vmem:[%s6294_s4 + $0x30] sm:$0xff] }
 0x1fc   : > { %3534 = vmatpush3.xpose.msk.msra.mxu0 %vm1006_vm3, %v4957_v61  ;;  %v874_v6 = vmul.f32 %v847_v25, %v691_v42  ;;  %1899 = vrot.lane.b32.xlu0 %v4789_v0, %s4370_s17  ;;  %v4991_v53 = vadd.f32 %v952_v16, %v898_v2  ;;  %v850_v62 = vld [vmem:[#allocation6 + $0x30] sm:$0xff]  ;;  %v955_v1 = vmul.f32 %v928_v37, %v782_v59 }
 0x1fd   : > { %3607 = vmatprep.subr.mxu0 %v6337_v22  ;;  %v823_v37 = vmul.f32 %v796_v26, %v4579_v4  ;;  %v934_v26 = vld [vmem:[#allocation7 + $0x48] sm:$0xff] }
 0x1fe   : > { %v4997_v60 = vpop.permute.xlu1 %748  ;;  %v901_v9 = vadd.f32 %v874_v6, %v820_v20  ;;  %1413 = vrot.lane.b32.xlu1 %v4991_v53, %s4369_s20  ;;  %v5001_v63 = vpop.permute.xlu0 %628 }
 0x1ff   : > { %v783_v25 = vsel %vm762_vm2, %v4997_v60, %v4888_v10  ;;  %v692_v16 = vsel %vm680_vm1, %v5001_v63, %v4863_v15  ;;  %3536 = vmatmul.mubr.msk.f32.vlgmr.msra.gmra.mxu0 %vm1006_vm3, %v4991_v53  ;;  %v799_v10 = vld [vmem:[%s6294_s4 + $0x48] sm:$0xff] }
 0x200   : > { %v877_v2 = vmul.f32 %v850_v62, %v692_v16  ;;  %1901 = vrot.lane.b32.xlu0 %v4831_v51, %s4370_s17  ;;  %3538 = vmatprep.mubr.msk.f32.mxu0 %vm4366_vm0, %v6337_v22  ;;  %v5018_v59 = vadd.f32 %v955_v1, %v901_v9  ;;  %v853_v15 = vld [vmem:[#allocation6 + $0x48] sm:$0xff]  ;;  %v958_v20 = vmul.f32 %v931_v54, %v783_v25 }
 0x201   : > { %v826_v9 = vmul.f32 %v799_v10, %v4585_v8  ;;  %v937_v10 = vld [vmem:[#allocation7 + $0x60] sm:$0xff] }
 0x202   : > { %v5023_v42 = vpop.permute.xlu1 %750  ;;  %v904_v6 = vadd.f32 %v877_v2, %v823_v37  ;;  %1415 = vrot.lane.b32.xlu1 %v5018_v59, %s4369_s20  ;;  %v5027_v4 = vpop.permute.xlu0 %630 }
 0x203   : > { %v784_v62 = vsel %vm762_vm2, %v5023_v42, %v4840_v58  ;;  %v693_v1 = vsel %vm680_vm1, %v5027_v4, %v4819_v30  ;;  %3539 = vmatmul.mubr.msk.f32.gmra.mxu0 %vm1006_vm3, %v5018_v59  ;;  %v802_v58 = vld [vmem:[%s6294_s4 + $0x60] sm:$0xff] }
 0x204   : > { %v880_v54 = vmul.f32 %v853_v15, %v693_v1  ;;  %1897 = vrot.lane.b32.xlu0 %v4883_v55, %s4370_s17  ;;  %3541 = vmatprep.mubr.msk.f32.mxu0 %vm4366_vm0, %v6337_v22  ;;  %v5044_v25 = vadd.f32 %v958_v20, %v904_v6  ;;  %v856_v30 = vld [vmem:[#allocation6 + $0x60] sm:$0xff]  ;;  %v961_v37 = vmul.f32 %v934_v26, %v784_v62 }
 0x205   : > { %v829_v6 = vmul.f32 %v802_v58, %v4593_v12  ;;  %v940_v58 = vld [vmem:[#allocation7 + $0x78] sm:$0xff] }
 0x206   : > { %v5049_v16 = vpop.permute.xlu1 %752  ;;  %v907_v2 = vadd.f32 %v880_v54, %v826_v9  ;;  %1417 = vrot.lane.b32.xlu1 %v5044_v25, %s4369_s20  ;;  %v5053_v8 = vpop.permute.xlu0 %632 }
 0x207   : > { %v785_v15 = vsel %vm762_vm2, %v5049_v16, %v4727_v32  ;;  %v694_v20 = vsel %vm680_vm1, %v5053_v8, %v4731_v34  ;;  %3542 = vmatmul.mubr.msk.f32.gmra.mxu0 %vm1006_vm3, %v5044_v25  ;;  %v805_v32 = vld [vmem:[%s6294_s4 + $0x78] sm:$0xff] }
 0x208   : > { %v883_v26 = vmul.f32 %v856_v30, %v694_v20  ;;  %1895 = vrot.lane.b32.xlu0 %v4805_v56, %s4370_s17  ;;  %3544 = vmatprep.mubr.msk.f32.mxu0 %vm4366_vm0, %v6337_v22  ;;  %v5070_v62 = vadd.f32 %v961_v37, %v907_v2  ;;  %v859_v34 = vld [vmem:[#allocation6 + $0x78] sm:$0xff]  ;;  %v964_v9 = vmul.f32 %v937_v10, %v785_v15 }
 0x209   : > { %v832_v2 = vmul.f32 %v805_v32, %v4605_v17  ;;  %v943_v32 = vld [vmem:[#allocation7 + $0x90] sm:$0xff] }
 0x20a   : > { %v5075_v1 = vpop.permute.xlu1 %754  ;;  %v910_v54 = vadd.f32 %v883_v26, %v829_v6  ;;  %1419 = vrot.lane.b32.xlu1 %v5070_v62, %s4369_s20  ;;  %v5079_v12 = vpop.permute.xlu0 %634 }
 0x20b   : > { %v786_v30 = vsel %vm762_vm2, %v5075_v1, %v4735_v36  ;;  %v695_v37 = vsel %vm680_vm1, %v5079_v12, %v4739_v38  ;;  %3545 = vmatmul.mubr.msk.f32.gmra.mxu0 %vm1006_vm3, %v5070_v62  ;;  %v808_v36 = vld [vmem:[%s6294_s4 + $0x90] sm:$0xff] }
 0x20c   : > { %v886_v10 = vmul.f32 %v859_v34, %v695_v37  ;;  %1893 = vrot.lane.b32.xlu0 %v4902_v41, %s4370_s17  ;;  %3547 = vmatprep.mubr.msk.f32.mxu0 %vm4366_vm0, %v6337_v22  ;;  %v5096_v15 = vadd.f32 %v964_v9, %v910_v54  ;;  %v862_v38 = vld [vmem:[#allocation6 + $0x90] sm:$0xff]  ;;  %v967_v6 = vmul.f32 %v940_v58, %v786_v30 }
 0x20d   : > { %v835_v54 = vmul.f32 %v808_v36, %v4621_v23  ;;  %v946_v36 = vld [vmem:[#allocation7 + $0xa8] sm:$0xff] }
 0x20e   : > { %v5101_v20 = vpop.permute.xlu1 %756  ;;  %v913_v26 = vadd.f32 %v886_v10, %v832_v2  ;;  %1421 = vrot.lane.b32.xlu1 %v5096_v15, %s4369_s20  ;;  %v5105_v17 = vpop.permute.xlu0 %636 }
 0x20f   : > { %v787_v34 = vsel %vm762_vm2, %v5101_v20, %v4743_v40  ;;  %v696_v9 = vsel %vm680_vm1, %v5105_v17, %v4747_v43  ;;  %3548 = vmatmul.mubr.msk.f32.gmra.mxu0 %vm1006_vm3, %v5096_v15  ;;  %v811_v40 = vld [vmem:[%s6294_s4 + $0xa8] sm:$0xff] }
 0x210   : > { %v889_v58 = vmul.f32 %v862_v38, %v696_v9  ;;  %1891 = vrot.lane.b32.xlu0 %v4861_v3, %s4370_s17  ;;  %3550 = vmatprep.mubr.msk.f32.mxu0 %vm4366_vm0, %v6337_v22  ;;  %v5122_v30 = vadd.f32 %v967_v6, %v913_v26  ;;  %v865_v43 = vld [vmem:[#allocation6 + $0xa8] sm:$0xff]  ;;  %v970_v2 = vmul.f32 %v943_v32, %v787_v34 }
 0x211   : > { %v838_v26 = vmul.f32 %v811_v40, %v4635_v27  ;;  %v870_v40 = vld [vmem:[#allocation6 + $0xd0] sm:$0x1] }
 0x212   : > { %v759_v37 = vpop.permute.xlu1 %758  ;;  %v916_v10 = vadd.f32 %v889_v58, %v835_v54  ;;  %1423 = vrot.lane.b32.xlu1 %v5122_v30, %s4369_s20  ;;  %v639_v23 = vpop.permute.xlu0 %638  ;;  %v816_v54 = vld [vmem:[%s6294_s4 + $0xd0] sm:$0x1]  ;;  %v868_v58 = vld [vmem:[#allocation6 + $0xc0] sm:$0x1] }
 0x213   : > { %v788_v38 = vsel %vm762_vm2, %v759_v37, %v4753_v46  ;;  %v697_v6 = vsel %vm680_vm1, %v639_v23, %v4766_v52  ;;  %3551 = vmatmul.mubr.msk.f32.gmra.mxu0 %vm1006_vm3, %v5122_v30  ;;  %v706_v52 = vsel %vm680_vm1, %v4751_v45, %v639_v23  ;;  %v804_v45 = vld [vmem:[%s6294_s4 + $0x70] sm:$0xff]  ;;  %v770_v23 = vsel %vm762_vm2, %v4763_v50, %v759_v37 }
 0x214   : > { %v892_v32 = vmul.f32 %v865_v43, %v697_v6  ;;  %1889 = vrot.lane.b32.xlu0 %v4915_v14, %s4370_s17  ;;  %3553 = vmatprep.mubr.msk.f32.mxu0 %vm4366_vm0, %v6337_v22  ;;  %v5142_v34 = vadd.f32 %v970_v2, %v916_v10  ;;  %v973_v9 = vmul.f32 %v946_v36, %v788_v38  ;;  %v948_v10 = vld [vmem:[#allocation7 + $0xb8] sm:$0xff]  ;;  %v855_v38 = vld [vmem:[#allocation6 + $0x58] sm:$0xff] }
 0x215   : > { %v831_v36 = vmul.f32 %v804_v45, %v4589_v11  ;;  %v705_v50 = vsel %vm680_vm1, %v4741_v39, %v5105_v17  ;;  %v939_v17 = vld [vmem:[#allocation7 + $0x70] sm:$0xff] }
 0x216   : > { %v919_v46 = vadd.f32 %v892_v32, %v838_v26  ;;  %1425 = vrot.lane.b32.xlu1 %v5142_v34, %s4369_s20  ;;  %v843_v26 = vmul.f32 %v816_v54, %v4623_v24  ;;  %v864_v32 = vld [vmem:[#allocation6 + $0xa0] sm:$0xff]  ;;  %v949_v24 = vld [vmem:[#allocation7 + $0xc0] sm:$0x1]  ;;  %v6347_v54 = vld [vmem:[#allocation23_spill] sm:$0xff] }
 0x217   : > { %3554 = vmatmul.mubr.msk.f32.gmra.mxu0 %vm1006_vm3, %v5142_v34 }
 0x218   : > { %1887 = vrot.lane.b32.xlu0 %v4930_v48, %s4370_s17  ;;  %3556 = vmatprep.mubr.msk.f32.mxu0 %vm4366_vm0, %v6337_v22  ;;  %v5152_v27 = vadd.f32 %v973_v9, %v919_v46  ;;  %v951_v9 = vld [vmem:[#allocation7 + $0xd0] sm:$0x1]  ;;  %v852_v46 = vld [vmem:[#allocation6 + $0x40] sm:$0xff] }
 0x21a   : > { %1427 = vrot.lane.b32.xlu1 %v5152_v27, %s4369_s20 }
 0x21b   : > { %3557 = vmatmul.mubr.msk.f32.gmra.mxu0 %vm1006_vm3, %v5152_v27 }
 0x21c   : > { %1885 = vrot.lane.b32.xlu0 %v4957_v61, %s4370_s17  ;;  %3559 = vmatprep.mubr.msk.f32.mxu0 %vm4366_vm0, %v6337_v22 }
 0x220   : > { %2345 = vrot.lane.b32.xlu0 %v4789_v0, %s4371_s11  ;;  %v867_v0 = vld [vmem:[#allocation6 + $0xb8] sm:$0xff] }
 0x224   : > { %2347 = vrot.lane.b32.xlu0 %v4831_v51, %s4371_s11  ;;  %v801_v51 = vld [vmem:[%s6294_s4 + $0x58] sm:$0xff] }
 0x225   : > { %v828_v43 = vmul.f32 %v801_v51, %v4583_v7  ;;  %v702_v7 = vsel %vm680_vm1, %v4794_v47, %v5027_v4  ;;  %v701_v47 = vsel %vm680_vm1, %v4859_v28, %v5001_v63  ;;  %v975_v4 = vmul.f32 %v948_v10, %v770_v23  ;;  %v945_v23 = vld [vmem:[#allocation7 + $0xa0] sm:$0xff] }
 0x226   : > { %v882_v39 = vmul.f32 %v855_v38, %v702_v7  ;;  %v704_v28 = vsel %vm680_vm1, %v4733_v35, %v5079_v12 }
 0x228   : > { %2343 = vrot.lane.b32.xlu0 %v4883_v55, %s4371_s11  ;;  %v858_v55 = vld [vmem:[#allocation6 + $0x70] sm:$0xff] }
 0x22c   : > { %2341 = vrot.lane.b32.xlu0 %v4805_v56, %s4371_s11  ;;  %v641_v56 = vpop.permute.xlu1 %640 }
 0x230   : > { %2339 = vrot.lane.b32.xlu0 %v4902_v41, %s4371_s11  ;;  %v703_v41 = vsel %vm680_vm1, %v4725_v31, %v5053_v8  ;;  %v698_v31 = vsel %vm680_vm1, %v641_v56, %v4798_v49  ;;  %v707_v8 = vsel %vm680_vm1, %v4783_v19, %v641_v56  ;;  %v891_v56 = vmul.f32 %v864_v32, %v705_v50 }
 0x231   : > { %v885_v2 = vmul.f32 %v858_v55, %v703_v41  ;;  %v895_v11 = vmul.f32 %v868_v58, %v698_v31  ;;  %v897_v37 = vmul.f32 %v870_v40, %v707_v8  ;;  %v6345_v55 = vld [vmem:[#allocation18_spill] sm:$0xff]  ;;  %v879_v40 = vmul.f32 %v852_v46, %v701_v47 }
 0x232   : > { %v909_v50 = vadd.f32 %v882_v39, %v828_v43  ;;  %v792_v43 = vld [vmem:[%s6294_s4 + $0x10] sm:$0xff]  ;;  %v6353_v39 = vld [vmem:[#allocation21_spill] sm:$0xff] }
 0x233   : > { %v924_v12 = vadd.f32 %v897_v37, %v843_v26  ;;  %v6350_v26 = vld [vmem:[#allocation15_spill] sm:$0xff] }
 0x234   : > { %2337 = vrot.lane.b32.xlu0 %v4861_v3, %s4371_s11  ;;  %v813_v3 = vld [vmem:[%s6294_s4 + $0xb8] sm:$0xff] }
 0x238   : > { %2335 = vrot.lane.b32.xlu0 %v4915_v14, %s4371_s11  ;;  %v894_v14 = vmul.f32 %v867_v0, %v706_v52  ;;  %v912_v0 = vadd.f32 %v885_v2, %v831_v36  ;;  %v861_v52 = vld [vmem:[#allocation6 + $0x88] sm:$0xff] }
 0x239   : > { %v888_v8 = vmul.f32 %v861_v52, %v704_v28  ;;  %v6348_v2 = vld [vmem:[#allocation19_spill] sm:$0xff] }
 0x23a   : > { %v766_v10 = vsel %vm762_vm2, %v6348_v2, %v5023_v42  ;;  %v6351_v42 = vld [vmem:[#allocation14_spill] sm:$0xff] }
 0x23c   : > { %2333 = vrot.lane.b32.xlu0 %v4930_v48, %s4371_s11  ;;  %v810_v48 = vld [vmem:[%s6294_s4 + $0xa0] sm:$0xff] }
 0x23d   : > { %v837_v19 = vmul.f32 %v810_v48, %v4607_v18  ;;  %v846_v48 = vld [vmem:[#allocation6 + $0x10] sm:$0xff] }
 0x240   : > { %2331 = vrot.lane.b32.xlu0 %v4957_v61, %s4371_s11  ;;  %v840_v61 = vmul.f32 %v813_v3, %v4615_v21  ;;  %v814_v21 = vld [vmem:[%s6294_s4 + $0xc0] sm:$0x1] }
 0x241   : > { %v841_v18 = vmul.f32 %v814_v21, %v4647_v29  ;;  %v767_v29 = vsel %vm762_vm2, %v4729_v33, %v5049_v16  ;;  %v807_v16 = vld [vmem:[%s6294_s4 + $0x88] sm:$0xff]  ;;  %v936_v21 = vld [vmem:[#allocation7 + $0x58] sm:$0xff] }
 0x242   : > { %v921_v6 = vadd.f32 %v894_v14, %v840_v61  ;;  %v6346_v61 = vld [vmem:[#allocation26_spill] sm:$0xff]  ;;  %v966_v31 = vmul.f32 %v939_v17, %v767_v29  ;;  %v834_v32 = vmul.f32 %v807_v16, %v6350_v26  ;;  %v700_v17 = vsel %vm680_vm1, %v6353_v39, %v4978_v13  ;;  %v933_v29 = vld [vmem:[#allocation7 + $0x40] sm:$0xff] }
 0x243   : > { %v922_v35 = vadd.f32 %v895_v11, %v841_v18  ;;  %v699_v58 = vsel %vm680_vm1, %v6347_v54, %v6346_v61  ;;  %v918_v11 = vadd.f32 %v891_v56, %v837_v19  ;;  %v963_v19 = vmul.f32 %v936_v21, %v766_v10  ;;  %v6358_v61 = vld [vmem:[#allocation13_spill] sm:$0xff] }
 0x244   : > { %2315 = vrot.lane.b32.xlu0 %v5018_v59, %s4371_s11  ;;  %v1446_v63 = vpop.permute.xlu1 %1445  ;;  %v5257_v33 = vadd.f32 %v975_v4, %v921_v6  ;;  %v5286_v37 = vadd.f32 %v966_v31, %v912_v0  ;;  %v873_v47 = vmul.f32 %v846_v48, %v699_v58  ;;  %v942_v4 = vld [vmem:[#allocation7 + $0x88] sm:$0xff]  ;;  %v6354_v0 = vld [vmem:[#allocation20_spill] sm:$0xff] }
 0x245   : > { %v765_v52 = vsel %vm762_vm2, %v6354_v0, %v4997_v60  ;;  %v5318_v13 = vadd.f32 %v963_v19, %v909_v50  ;;  %v795_v60 = vld [vmem:[%s6294_s4 + $0x28] sm:$0xff]  ;;  %v930_v31 = vld [vmem:[#allocation7 + $0x28] sm:$0xff] }
 0x246   : > { %v960_v16 = vmul.f32 %v933_v29, %v765_v52  ;;  %v822_v54 = vmul.f32 %v795_v60, %v6358_v61 }
 0x248   : > { %2319 = vrot.lane.b32.xlu0 %v5070_v62, %s4371_s11 }
 0x24c   : > { %2323 = vrot.lane.b32.xlu0 %v5122_v30, %s4371_s11 }
 0x24e   : > { %v1448_v49 = vpop.permute.xlu0 %1447 }
 0x24f   : > { %3608 = vmatpush3.xpose.msk.msra.mxu0 %vm1006_vm3, %v1448_v49  ;;  %v6349_v49 = vld [vmem:[#allocation17_spill] sm:$0xff] }
 0x250   : > { %3609 = vmatprep.subr.mxu0 %v6337_v22  ;;  %2327 = vrot.lane.b32.xlu0 %v5152_v27, %s4371_s11  ;;  %v769_v36 = vsel %vm762_vm2, %v6349_v49, %v5101_v20 }
 0x251   : > { %v972_v46 = vmul.f32 %v945_v23, %v769_v36 }
 0x252   : > { %v761_v3 = vpop.permute.xlu0 %760 }
 0x253   : > { %v771_v51 = vsel %vm762_vm2, %v4807_v57, %v761_v3  ;;  %v789_v41 = vsel %vm762_vm2, %v761_v3, %v6345_v55  ;;  %3610 = vmatpush3.xpose.msk.msra.mxu0 %vm1006_vm3, %v1446_v63  ;;  %v798_v57 = vld [vmem:[%s6294_s4 + $0x40] sm:$0xff]  ;;  %v1442_v63 = vpop.permute.xlu1 %1441  ;;  %v5316_v56 = vadd.f32 %v972_v46, %v918_v11 }
 0x254   : > { %v976_v14 = vmul.f32 %v949_v24, %v789_v41  ;;  %v978_v45 = vmul.f32 %v951_v9, %v771_v51  ;;  %3611 = vmatprep.subr.mxu0 %v6337_v22  ;;  %1716 = vrot.lane.b32.xlu0 %v5257_v33, %s4369_s20  ;;  %v825_v18 = vmul.f32 %v798_v57, %v6351_v42  ;;  %v6352_v24 = vld [vmem:[#allocation16_spill] sm:$0xff] }
 0x255   : > { %v768_v20 = vsel %vm762_vm2, %v6352_v24, %v5075_v1  ;;  %v915_v9 = vadd.f32 %v888_v8, %v834_v32  ;;  %v849_v1 = vld [vmem:[#allocation6 + $0x28] sm:$0xff]  ;;  %v6355_v51 = vld [vmem:[#allocation12_spill] sm:$0xff]  ;;  %v6359_v8 = vld [vmem:[#allocation22_spill] sm:$0xff] }
 0x256   : > { %v5280_v38 = vadd.f32 %v976_v14, %v922_v35  ;;  %v5282_v7 = vadd.f32 %v978_v45, %v924_v12  ;;  %v1444_v6 = vpop.permute.xlu0 %1443  ;;  %v906_v28 = vadd.f32 %v879_v40, %v825_v18  ;;  %v969_v3 = vmul.f32 %v942_v4, %v768_v20  ;;  %v927_v12 = vld [vmem:[#allocation7 + $0x10] sm:$0xff]  ;;  %v6356_v14 = vld [vmem:[#allocation25_spill] sm:$0xff]  ;;  %v6357_v45 = vld [vmem:[#allocation24_spill] sm:$0xff] }
 0x257   : > { %3612 = vmatpush3.xpose.msk.msra.mxu0 %vm1006_vm3, %v1444_v6  ;;  %v819_v55 = vmul.f32 %v792_v43, %v6355_v51  ;;  %v876_v41 = vmul.f32 %v849_v1, %v700_v17  ;;  %v763_v57 = vsel %vm762_vm2, %v6357_v45, %v6356_v14  ;;  %v764_v21 = vsel %vm762_vm2, %v6359_v8, %v4976_v5  ;;  %v1438_v23 = vpop.permute.xlu1 %1437 }
 0x258   : > { %1429 = vrot.lane.b32.xlu1 %v5280_v38, %s4369_s20  ;;  %3560 = vmatmul.mubr.msk.f32.gmra.mxu0 %vm1006_vm3, %v5280_v38  ;;  %v5330_v35 = vadd.f32 %v969_v3, %v915_v9  ;;  %v5341_v40 = vadd.f32 %v960_v16, %v906_v28  ;;  %v954_v2 = vmul.f32 %v927_v12, %v763_v57 }
 0x259   : > { %3563 = vmatpush3.msk.msra.mxu1 %vm1299_vm4, %v5282_v7  ;;  %1710 = vrot.lane.b32.xlu0 %v5286_v37, %s4369_s20  ;;  %v900_v58 = vadd.f32 %v873_v47, %v819_v55  ;;  %v903_v10 = vadd.f32 %v876_v41, %v822_v54  ;;  %v957_v49 = vmul.f32 %v930_v31, %v764_v21 }
 0x25a   : > { %3564 = vmatprep.subr.mxu1 %v6337_v22  ;;  %3613 = vmatprep.subr.mxu0 %v6337_v22  ;;  %v1440_v48 = vpop.permute.xlu0 %1439 }
 0x25b   : > { %3565 = vmatpush3.msra.mxu1 %v5257_v33  ;;  %3614 = vmatpush3.xpose.msk.msra.mxu0 %vm1006_vm3, %v1442_v63  ;;  %v5357_v44 = vadd.f32 %v954_v2, %v900_v58  ;;  %v5365_v5 = vadd.f32 %v957_v49, %v903_v10 }
 0x25c   : > { %3566 = vmatprep.subr.mxu1 %v6337_v22  ;;  %1867 = vrot.lane.b32.xlu1 %v4991_v53, %s4370_s17 }
 0x25d   : > { %3567 = vmatpush3.msra.mxu1 %v5316_v56  ;;  %1708 = vrot.lane.b32.xlu0 %v5318_v13, %s4369_s20  ;;  %6360 = vst [vmem:[#allocation18_spill] sm:$0xff] %v5357_v44  ;;  %6361 = vst [vmem:[#allocation26_spill] sm:$0xff] %v5365_v5 }
 0x25e   : > { %3568 = vmatprep.subr.mxu1 %v6337_v22  ;;  %3615 = vmatprep.subr.mxu0 %v6337_v22 }
 0x25f   : > { %3569 = vmatpush3.msra.mxu1 %v5330_v35  ;;  %3616 = vmatpush3.xpose.msk.msra.mxu0 %vm1006_vm3, %v1440_v48 }
 0x260   : > { %3570 = vmatprep.subr.mxu1 %v6337_v22  ;;  %1869 = vrot.lane.b32.xlu1 %v5018_v59, %s4370_s17  ;;  %v1436_v59 = vpop.permute.xlu0 %1435 }
 0x261   : > { %3571 = vmatpush3.msra.mxu1 %v5286_v37  ;;  %1706 = vrot.lane.b32.xlu0 %v5341_v40, %s4369_s20 }
 0x262   : > { %3572 = vmatprep.subr.mxu1 %v6337_v22  ;;  %3617 = vmatprep.subr.mxu0 %v6337_v22  ;;  %v1434_v36 = vpop.permute.xlu1 %1433 }
 0x263   : > { %3573 = vmatpush3.msra.mxu1 %v5318_v13  ;;  %3618 = vmatpush3.xpose.msk.msra.mxu0 %vm1006_vm3, %v1438_v23 }
 0x264   : > { %3574 = vmatprep.subr.mxu1 %v6337_v22  ;;  %1871 = vrot.lane.b32.xlu1 %v5044_v25, %s4370_s17 }
 0x265   : > { %3575 = vmatpush3.msra.mxu1 %v5341_v40  ;;  %1702 = vrot.lane.b32.xlu0 %v5357_v44, %s4369_s20 }
 0x266   : > { %3576 = vmatprep.subr.mxu1 %v6337_v22  ;;  %3619 = vmatprep.subr.mxu0 %v6337_v22 }
 0x267   : > { %3577 = vmatpush3.msra.mxu1 %v5365_v5  ;;  %3620 = vmatpush3.xpose.msk.msra.mxu0 %vm1006_vm3, %v1436_v59 }
 0x268   : > { %3578 = vmatprep.subr.mxu1 %v6337_v22  ;;  %1873 = vrot.lane.b32.xlu1 %v5070_v62, %s4370_s17 }
 0x269   : > { %3579 = vmatpush3.msra.mxu1 %v5357_v44  ;;  %2162 = vrot.lane.b32.xlu0 %v5257_v33, %s4370_s17 }
 0x26a   : > { %3621 = vmatprep.subr.mxu0 %v6337_v22  ;;  %3625 = vmatprep.mubr.msk.f32.mxu0 %vm4366_vm0, %v6337_v22  ;;  %v1432_v6 = vpop.permute.xlu0 %1431 }
 0x26b   : > { %3622 = vmatpush3.xpose.msk.msra.mxu0 %vm1006_vm3, %v1434_v36  ;;  %3652 = vmatprep.subr.mxu1 %v6337_v22 }
 0x26c   : > { %1875 = vrot.lane.b32.xlu1 %v5096_v15, %s4370_s17  ;;  %3623 = vmatprep.subr.mxu0 %v6337_v22 }
 0x26d   : > { %2158 = vrot.lane.b32.xlu0 %v5330_v35, %s4370_s17 }
 0x26e   : > { %v1900_v62 = vpop.permute.xlu0 %1899 }
 0x26f   : > { %3624 = vmatpush3.xpose.msk.msra.mxu0 %vm1006_vm3, %v1432_v6 }
 0x270   : > { %1877 = vrot.lane.b32.xlu1 %v5122_v30, %s4370_s17  ;;  %3697 = vmatprep.subr.mxu0 %v6337_v22  ;;  %v1414_v26 = vpop.permute.xlu1 %1413 }
 0x271   : > { %2156 = vrot.lane.b32.xlu0 %v5286_v37, %s4370_s17 }
 0x272   : > { %3626 = vmatmul.mubr.msk.f32.vlgmr.msra.gmra.mxu0 %vm1006_vm3, %v1414_v26  ;;  %v1902_v32 = vpop.permute.xlu0 %1901 }
 0x273   : > { %3628 = vmatprep.mubr.msk.f32.mxu0 %vm4366_vm0, %v6337_v22  ;;  %3698 = vmatpush3.xpose.msk.msra.mxu0 %vm1006_vm3, %v1902_v32 }
 0x274   : > { %1879 = vrot.lane.b32.xlu1 %v5142_v34, %s4370_s17  ;;  %v1416_v50 = vpop.permute.xlu1 %1415  ;;  %3699 = vmatprep.subr.mxu0 %v6337_v22 }
 0x275   : > { %2152 = vrot.lane.b32.xlu0 %v5341_v40, %s4370_s17 }
 0x276   : > { %3629 = vmatmul.mubr.msk.f32.gmra.mxu0 %vm1006_vm3, %v1416_v50  ;;  %v1898_v30 = vpop.permute.xlu0 %1897 }
 0x277   : > { %3631 = vmatprep.mubr.msk.f32.mxu0 %vm4366_vm0, %v6337_v22  ;;  %3700 = vmatpush3.xpose.msk.msra.mxu0 %vm1006_vm3, %v1900_v62 }
 0x278   : > { %1881 = vrot.lane.b32.xlu1 %v5152_v27, %s4370_s17  ;;  %v1418_v11 = vpop.permute.xlu1 %1417  ;;  %3701 = vmatprep.subr.mxu0 %v6337_v22 }
 0x279   : > { %2150 = vrot.lane.b32.xlu0 %v5365_v5, %s4370_s17 }
 0x27a   : > { %3632 = vmatmul.mubr.msk.f32.gmra.mxu0 %vm1006_vm3, %v1418_v11  ;;  %v1896_v42 = vpop.permute.xlu0 %1895 }
 0x27b   : > { %3634 = vmatprep.mubr.msk.f32.mxu0 %vm4366_vm0, %v6337_v22  ;;  %3702 = vmatpush3.xpose.msk.msra.mxu0 %vm1006_vm3, %v1898_v30 }
 0x27c   : > { %1883 = vrot.lane.b32.xlu1 %v5280_v38, %s4370_s17  ;;  %v1420_v27 = vpop.permute.xlu1 %1419  ;;  %3703 = vmatprep.subr.mxu0 %v6337_v22 }
 0x27d   : > { %2148 = vrot.lane.b32.xlu0 %v5357_v44, %s4370_s17 }
 0x27e   : > { %3635 = vmatmul.mubr.msk.f32.gmra.mxu0 %vm1006_vm3, %v1420_v27  ;;  %v1894_v18 = vpop.permute.xlu0 %1893 }
 0x27f   : > { %3637 = vmatprep.mubr.msk.f32.mxu0 %vm4366_vm0, %v6337_v22  ;;  %3704 = vmatpush3.xpose.msk.msra.mxu0 %vm1006_vm3, %v1896_v42 }
 0x280   : > { %2313 = vrot.lane.b32.xlu1 %v4991_v53, %s4371_s11  ;;  %v1422_v47 = vpop.permute.xlu1 %1421  ;;  %3705 = vmatprep.subr.mxu0 %v6337_v22 }
 0x281   : > { %2608 = vrot.lane.b32.xlu0 %v5257_v33, %s4371_s11 }
 0x282   : > { %3638 = vmatmul.mubr.msk.f32.gmra.mxu0 %vm1006_vm3, %v1422_v47  ;;  %v1892_v4 = vpop.permute.xlu0 %1891 }
 0x283   : > { %3640 = vmatprep.mubr.msk.f32.mxu0 %vm4366_vm0, %v6337_v22  ;;  %3706 = vmatpush3.xpose.msk.msra.mxu0 %vm1006_vm3, %v1894_v18 }
 0x284   : > { %2317 = vrot.lane.b32.xlu1 %v5044_v25, %s4371_s11  ;;  %v1424_v53 = vpop.permute.xlu1 %1423  ;;  %3707 = vmatprep.subr.mxu0 %v6337_v22 }
 0x286   : > { %3641 = vmatmul.mubr.msk.f32.gmra.mxu0 %vm1006_vm3, %v1424_v53  ;;  %v1890_v24 = vpop.permute.xlu0 %1889 }
 0x287   : > { %3643 = vmatprep.mubr.msk.f32.mxu0 %vm4366_vm0, %v6337_v22  ;;  %3708 = vmatpush3.xpose.msk.msra.mxu0 %vm1006_vm3, %v1892_v4 }
 0x288   : > { %2321 = vrot.lane.b32.xlu1 %v5096_v15, %s4371_s11  ;;  %v1426_v33 = vpop.permute.xlu1 %1425  ;;  %3709 = vmatprep.subr.mxu0 %v6337_v22 }
 0x28a   : > { %3644 = vmatmul.mubr.msk.f32.gmra.mxu0 %vm1006_vm3, %v1426_v33  ;;  %v1888_v25 = vpop.permute.xlu0 %1887 }
 0x28b   : > { %3646 = vmatprep.mubr.msk.f32.mxu0 %vm4366_vm0, %v6337_v22  ;;  %3710 = vmatpush3.xpose.msk.msra.mxu0 %vm1006_vm3, %v1890_v24 }
 0x28c   : > { %2325 = vrot.lane.b32.xlu1 %v5142_v34, %s4371_s11  ;;  %v1428_v20 = vpop.permute.xlu1 %1427  ;;  %3711 = vmatprep.subr.mxu0 %v6337_v22 }
 0x28e   : > { %3647 = vmatmul.mubr.msk.f32.gmra.mxu0 %vm1006_vm3, %v1428_v20  ;;  %v1886_v15 = vpop.permute.xlu0 %1885 }
 0x28f   : > { %3649 = vmatprep.mubr.msk.f32.mxu0 %vm4366_vm0, %v6337_v22  ;;  %3712 = vmatpush3.xpose.msk.msra.mxu0 %vm1006_vm3, %v1888_v25 }
 0x290   : > { %2329 = vrot.lane.b32.xlu1 %v5280_v38, %s4371_s11  ;;  %3713 = vmatprep.subr.mxu0 %v6337_v22 }
 0x292   : > { %v2346_v34 = vpop.permute.xlu0 %2345 }
 0x293   : > { %3714 = vmatpush3.xpose.msk.msra.mxu0 %vm1006_vm3, %v1886_v15 }
 0x294   : > { %1718 = vrot.lane.b32.xlu1 %v5282_v7, %s4369_s20  ;;  %3787 = vmatprep.subr.mxu0 %v6337_v22 }
 0x296   : > { %v2348_v46 = vpop.permute.xlu0 %2347 }
 0x298   : > { %1714 = vrot.lane.b32.xlu1 %v5316_v56, %s4369_s20 }
 0x29a   : > { %v2344_v0 = vpop.permute.xlu0 %2343 }
 0x29c   : > { %1712 = vrot.lane.b32.xlu1 %v5330_v35, %s4369_s20 }
 0x29e   : > { %v2342_v55 = vpop.permute.xlu0 %2341 }
 0x2a0   : > { %1704 = vrot.lane.b32.xlu1 %v5365_v5, %s4369_s20 }
 0x2a2   : > { %v2340_v48 = vpop.permute.xlu0 %2339 }
 0x2a4   : > { %2164 = vrot.lane.b32.xlu1 %v5282_v7, %s4370_s17 }
 0x2a6   : > { %v2338_v2 = vpop.permute.xlu0 %2337 }
 0x2a8   : > { %2160 = vrot.lane.b32.xlu1 %v5316_v56, %s4370_s17 }
 0x2aa   : > { %v2336_v36 = vpop.permute.xlu0 %2335 }
 0x2ac   : > { %2154 = vrot.lane.b32.xlu1 %v5318_v13, %s4370_s17 }
 0x2ae   : > { %v2334_v62 = vpop.permute.xlu0 %2333 }
 0x2b0   : > { %2610 = vrot.lane.b32.xlu1 %v5282_v7, %s4371_s11 }
 0x2b2   : > { %v2332_v50 = vpop.permute.xlu0 %2331 }
 0x2b6   : > { %v2316_v11 = vpop.permute.xlu0 %2315 }
 0x2ba   : > { %v2320_v27 = vpop.permute.xlu0 %2319 }
 0x2be   : > { %v2324_v47 = vpop.permute.xlu0 %2323 }
 0x2bf   : > { %v5475_v38 = vpop.f32.mrf.mxu0 }
 0x2c0   : > { %v1172_v43 = vsel %vm1171_vm5, %v5475_v38, -inf }
 0x2c1   : > { %1173 = vmax.xlane.f32.xlu0 %v1172_v43  ;;  %v3537_v19 = vpop.f32.mrf.mxu0 }
 0x2c2   : > { %v2328_v53 = vpop.permute.xlu0 %2327 }
 0x2c3   : > { %v5479_v9 = vpop.f32.mrf.mxu0 }
 0x2c4   : > { %v1175_v16 = vsel %vm1171_vm5, %v5479_v9, -inf }
 0x2c5   : > { %v3540_v1 = vpop.f32.mrf.mxu0 }
 0x2c7   : > { %v5481_v39 = vpop.f32.mrf.mxu0 }
 0x2c8   : > { %v1178_v17 = vsel %vm1171_vm5, %v5481_v39, -inf }
 0x2c9   : > { %1179 = vmax.xlane.f32.xlu0 %v1178_v17  ;;  %v3543_v7 = vpop.f32.mrf.mxu0 }
 0x2ca   : > { %v1430_v29 = vpop.permute.xlu1 %1429 }
 0x2cb   : > { %3650 = vmatmul.mubr.msk.f32.gmra.mxu0 %vm1006_vm3, %v1430_v29  ;;  %v5486_v52 = vpop.f32.mrf.mxu0 }
 0x2cc   : > { %3715 = vmatprep.mubr.msk.f32.mxu0 %vm4366_vm0, %v6337_v22  ;;  %v1181_v28 = vsel %vm1171_vm5, %v5486_v52, -inf }
 0x2cd   : > { %1182 = vmax.xlane.f32.xlu0 %v1181_v28  ;;  %v3546_v63 = vpop.f32.mrf.mxu0 }
 0x2ce   : > { %v1868_v3 = vpop.permute.xlu1 %1867 }
 0x2cf   : > { %3716 = vmatmul.mubr.msk.f32.vlgmr.msra.gmra.mxu0 %vm1006_vm3, %v1868_v3  ;;  %v5493_v51 = vpop.f32.mrf.mxu0 }
 0x2d0   : > { %3788 = vmatpush3.xpose.msk.msra.mxu0 %vm1006_vm3, %v2348_v46  ;;  %3718 = vmatprep.mubr.msk.f32.mxu0 %vm4366_vm0, %v6337_v22  ;;  %v1184_v61 = vsel %vm1171_vm5, %v5493_v51, -inf  ;;  %v5592_v46 = vpop.permute.xlu0 %1716 }
 0x2d1   : > { %3789 = vmatprep.subr.mxu0 %v6337_v22  ;;  %v3549_v60 = vpop.f32.mrf.mxu0 }
 0x2d2   : > { %v1870_v41 = vpop.permute.xlu1 %1869 }
 0x2d3   : > { %3719 = vmatmul.mubr.msk.f32.gmra.mxu0 %vm1006_vm3, %v1870_v41  ;;  %v5502_v12 = vpop.f32.mrf.mxu0 }
 0x2d4   : > { %3790 = vmatpush3.xpose.msk.msra.mxu0 %vm1006_vm3, %v2346_v34  ;;  %1176 = vmax.xlane.f32.xlu1 %v1175_v16  ;;  %v1187_v14 = vsel %vm1171_vm5, %v5502_v12, -inf  ;;  %v5600_v28 = vpop.permute.xlu0 %1710 }
 0x2d5   : > { %3721 = vmatprep.mubr.msk.f32.mxu0 %vm4366_vm0, %v6337_v22  ;;  %3791 = vmatprep.subr.mxu0 %v6337_v22  ;;  %v3552_v45 = vpop.f32.mrf.mxu0 }
 0x2d6   : > { %1188 = vmax.xlane.f32.xlu0 %v1187_v14  ;;  %v1872_v57 = vpop.permute.xlu1 %1871 }
 0x2d7   : > { %3722 = vmatmul.mubr.msk.f32.gmra.mxu0 %vm1006_vm3, %v1872_v57  ;;  %v5513_v54 = vpop.f32.mrf.mxu0 }
 0x2d8   : > { %3792 = vmatpush3.xpose.msk.msra.mxu0 %vm1006_vm3, %v2344_v0  ;;  %1185 = vmax.xlane.f32.xlu1 %v1184_v61  ;;  %v1190_v8 = vsel %vm1171_vm5, %v5513_v54, -inf  ;;  %v5608_v41 = vpop.permute.xlu0 %1708 }
 0x2d9   : > { %3724 = vmatprep.mubr.msk.f32.mxu0 %vm4366_vm0, %v6337_v22  ;;  %3793 = vmatprep.subr.mxu0 %v6337_v22  ;;  %v3555_v58 = vpop.f32.mrf.mxu0 }
 0x2da   : > { %v1874_v31 = vpop.permute.xlu1 %1873 }
 0x2db   : > { %3725 = vmatmul.mubr.msk.f32.gmra.mxu0 %vm1006_vm3, %v1874_v31  ;;  %v5522_v21 = vpop.f32.mrf.mxu0 }
 0x2dc   : > { %3794 = vmatpush3.xpose.msk.msra.mxu0 %vm1006_vm3, %v2342_v55  ;;  %1191 = vmax.xlane.f32.xlu1 %v1190_v8  ;;  %v1193_v10 = vsel %vm1171_vm5, %v5522_v21, -inf  ;;  %v5612_v57 = vpop.permute.xlu0 %1706 }
 0x2dd   : > { %3727 = vmatprep.mubr.msk.f32.mxu0 %vm4366_vm0, %v6337_v22  ;;  %3795 = vmatprep.subr.mxu0 %v6337_v22  ;;  %v3558_v23 = vpop.f32.mrf.mxu0 }
 0x2de   : > { %1194 = vmax.xlane.f32.xlu0 %v1193_v10  ;;  %v1876_v49 = vpop.permute.xlu1 %1875 }
 0x2df   : > { %3728 = vmatmul.mubr.msk.f32.gmra.mxu0 %vm1006_vm3, %v1876_v49 }
 0x2e0   : > { %3796 = vmatpush3.xpose.msk.msra.mxu0 %vm1006_vm3, %v2340_v48  ;;  %3730 = vmatprep.mubr.msk.f32.mxu0 %vm4366_vm0, %v6337_v22  ;;  %v5618_v31 = vpop.permute.xlu0 %1702 }
 0x2e1   : > { %3797 = vmatprep.subr.mxu0 %v6337_v22 }
 0x2e2   : > { %v1878_v59 = vpop.permute.xlu1 %1877 }
 0x2e3   : > { %3731 = vmatmul.mubr.msk.f32.gmra.mxu0 %vm1006_vm3, %v1878_v59 }
 0x2e4   : > { %3798 = vmatpush3.xpose.msk.msra.mxu0 %vm1006_vm3, %v2338_v2  ;;  %3733 = vmatprep.mubr.msk.f32.mxu0 %vm4366_vm0, %v6337_v22  ;;  %v5626_v10 = vpop.permute.xlu0 %2162 }
 0x2e5   : > { %3799 = vmatprep.subr.mxu0 %v6337_v22 }
 0x2e6   : > { %v1880_v6 = vpop.permute.xlu1 %1879 }
 0x2e7   : > { %3734 = vmatmul.mubr.msk.f32.gmra.mxu0 %vm1006_vm3, %v1880_v6 }
 0x2e8   : > { %3800 = vmatpush3.xpose.msk.msra.mxu0 %vm1006_vm3, %v2336_v36  ;;  %3736 = vmatprep.mubr.msk.f32.mxu0 %vm4366_vm0, %v6337_v22  ;;  %v5632_v49 = vpop.permute.xlu0 %2158 }
 0x2e9   : > { %3801 = vmatprep.subr.mxu0 %v6337_v22 }
 0x2ea   : > { %v1882_v26 = vpop.permute.xlu1 %1881 }
 0x2eb   : > { %3737 = vmatmul.mubr.msk.f32.gmra.mxu0 %vm1006_vm3, %v1882_v26 }
 0x2ec   : > { %3802 = vmatpush3.xpose.msk.msra.mxu0 %vm1006_vm3, %v2334_v62  ;;  %3739 = vmatprep.mubr.msk.f32.mxu0 %vm4366_vm0, %v6337_v22  ;;  %v5636_v36 = vpop.permute.xlu0 %2156 }
 0x2ed   : > { %3803 = vmatprep.subr.mxu0 %v6337_v22 }
 0x2ee   : > { %v1884_v32 = vpop.permute.xlu1 %1883 }
 0x2ef   : > { %3740 = vmatmul.mubr.msk.f32.gmra.mxu0 %vm1006_vm3, %v1884_v32 }
 0x2f0   : > { %3804 = vmatpush3.xpose.msk.msra.mxu0 %vm1006_vm3, %v2332_v50  ;;  %3805 = vmatprep.mubr.msk.f32.mxu0 %vm4366_vm0, %v6337_v22 }
 0x2f1   : > { %3877 = vmatprep.subr.mxu0 %v6337_v22 }
 0x2f2   : > { %v2314_v30 = vpop.permute.xlu1 %2313 }
 0x2f3   : > { %3806 = vmatmul.mubr.msk.f32.vlgmr.msra.gmra.mxu0 %vm1006_vm3, %v2314_v30 }
 0x2f4   : > { %3808 = vmatprep.mubr.msk.f32.mxu0 %vm4366_vm0, %v6337_v22 }
 0x2f6   : > { %v2318_v42 = vpop.permute.xlu1 %2317 }
 0x2f7   : > { %3809 = vmatmul.mubr.msk.f32.gmra.mxu0 %vm1006_vm3, %v2316_v11 }
 0x2f8   : > { %3811 = vmatprep.mubr.msk.f32.mxu0 %vm4366_vm0, %v6337_v22 }
 0x2fa   : > { %v2322_v18 = vpop.permute.xlu1 %2321 }
 0x2fb   : > { %3812 = vmatmul.mubr.msk.f32.gmra.mxu0 %vm1006_vm3, %v2318_v42 }
 0x2fc   : > { %3814 = vmatprep.mubr.msk.f32.mxu0 %vm4366_vm0, %v6337_v22 }
 0x2fe   : > { %v2326_v4 = vpop.permute.xlu1 %2325 }
 0x2ff   : > { %3815 = vmatmul.mubr.msk.f32.gmra.mxu0 %vm1006_vm3, %v2320_v27 }
 0x300   : > { %3817 = vmatprep.mubr.msk.f32.mxu0 %vm4366_vm0, %v6337_v22 }
 0x302   : > { %v2330_v24 = vpop.permute.xlu1 %2329 }
 0x303   : > { %3818 = vmatmul.mubr.msk.f32.gmra.mxu0 %vm1006_vm3, %v2322_v18 }
 0x304   : > { %3820 = vmatprep.mubr.msk.f32.mxu0 %vm4366_vm0, %v6337_v22 }
 0x306   : > { %v5624_v2 = vpop.permute.xlu1 %1718 }
 0x307   : > { %3821 = vmatmul.mubr.msk.f32.gmra.mxu0 %vm1006_vm3, %v2324_v47 }
 0x308   : > { %3823 = vmatprep.mubr.msk.f32.mxu0 %vm4366_vm0, %v6337_v22 }
 0x30a   : > { %v5630_v23 = vpop.permute.xlu1 %1714 }
 0x30b   : > { %3824 = vmatmul.mubr.msk.f32.gmra.mxu0 %vm1006_vm3, %v2326_v4 }
 0x30c   : > { %3826 = vmatprep.mubr.msk.f32.mxu0 %vm4366_vm0, %v6337_v22 }
 0x30e   : > { %v5634_v59 = vpop.permute.xlu1 %1712 }
 0x30f   : > { %3827 = vmatmul.mubr.msk.f32.gmra.mxu0 %vm1006_vm3, %v2328_v53 }
 0x310   : > { %3829 = vmatprep.mubr.msk.f32.mxu0 %vm4366_vm0, %v6337_v22 }
 0x312   : > { %v5638_v6 = vpop.permute.xlu1 %1704 }
 0x313   : > { %3830 = vmatmul.mubr.msk.f32.gmra.mxu0 %vm1006_vm3, %v2330_v24 }
 0x314   : > { %3909 = vmatprep.mubr.msk.f32.mxu0 %vm4366_vm0, %v6337_v22 }
 0x318   : > { %v5582_v33 = vpop.f32.mrf.mxu0 }
 0x319   : > { %v1197_v25 = vsel %vm1196_vm6, %v5582_v33, -inf }
 0x31a   : > { %1198 = vmax.xlane.f32.xlu1 %v1197_v25  ;;  %v3561_v20 = vpop.f32.mrf.mxu0 }
 0x332   : > { %v5586_v15 = vpop.f32.mrf.mxu0 }
 0x333   : > { %v1595_v34 = vsel %vm1171_vm5, %v5586_v15, -inf }
 0x334   : > { %1596 = vmax.xlane.f32.xlu0 %v1595_v34  ;;  %v3627_v43 = vpop.f32.mrf.mxu0 }
 0x336   : > { %v5590_v19 = vpop.f32.mrf.mxu0 }
 0x337   : > { %v1598_v1 = vsel %vm1171_vm5, %v5590_v19, -inf }
 0x338   : > { %1599 = vmax.xlane.f32.xlu1 %v1598_v1  ;;  %v3630_v17 = vpop.f32.mrf.mxu0 }
 0x33a   : > { %v5596_v7 = vpop.f32.mrf.mxu0 }
 0x33b   : > { %v1601_v29 = vsel %vm1171_vm5, %v5596_v7, -inf }
 0x33c   : > { %1602 = vmax.xlane.f32.xlu0 %v1601_v29  ;;  %v3633_v0 = vpop.f32.mrf.mxu0 }
 0x33e   : > { %v5602_v63 = vpop.f32.mrf.mxu0 }
 0x33f   : > { %v1604_v3 = vsel %vm1171_vm5, %v5602_v63, -inf }
 0x340   : > { %1605 = vmax.xlane.f32.xlu1 %v1604_v3  ;;  %v3636_v55 = vpop.f32.mrf.mxu0 }
 0x342   : > { %v5606_v60 = vpop.f32.mrf.mxu0 }
 0x344   : > { %v3639_v16 = vpop.f32.mrf.mxu0 }
 0x346   : > { %v5610_v14 = vpop.f32.mrf.mxu0 }
 0x347   : > { %v1610_v50 = vsel %vm1171_vm5, %v5610_v14, -inf }
 0x348   : > { %v3642_v45 = vpop.f32.mrf.mxu0 }
 0x34a   : > { %v5614_v48 = vpop.f32.mrf.mxu0 }
 0x34b   : > { %v1613_v11 = vsel %vm1171_vm5, %v5614_v48, -inf }
 0x34c   : > { %v3645_v61 = vpop.f32.mrf.mxu0 }
 0x34e   : > { %v5616_v58 = vpop.f32.mrf.mxu0 }
 0x34f   : > { %v1616_v42 = vsel %vm1171_vm5, %v5616_v58, -inf }
 0x350   : > { %v3648_v8 = vpop.f32.mrf.mxu0 }
 0x351   : > { %2606 = vrot.lane.b32.xlu1 %v5316_v56, %s4371_s11  ;;  %v5640_v56 = vpop.permute.xlu0 %2152 }
 0x352   : > { %2604 = vrot.lane.b32.xlu0 %v5330_v35, %s4371_s11  ;;  %6362 = vst [vmem:[#allocation23_spill] sm:$0xff] %v5640_v56  ;;  %v5642_v35 = vpop.permute.xlu1 %2164 }
 0x355   : > { %v5644_v62 = vpop.permute.xlu0 %2150 }
 0x356   : > { %2602 = vrot.lane.b32.xlu0 %v5286_v37, %s4371_s11  ;;  %6363 = vst [vmem:[#allocation19_spill] sm:$0xff] %v5644_v62  ;;  %v5646_v26 = vpop.permute.xlu1 %2160  ;;  %v1607_v37 = vsel %vm1171_vm5, %v5606_v60, -inf }
 0x359   : > { %v5648_v32 = vpop.permute.xlu0 %2148 }
 0x35a   : > { %6364 = vst [vmem:[#allocation17_spill] sm:$0xff] %v5648_v32  ;;  %v5654_v30 = vpop.permute.xlu1 %2154 }
 0x35b   : > { %6365 = vst [vmem:[#allocation15_spill] sm:$0xff] %v5654_v30 }
 0x35d   : > { %v5660_v27 = vpop.permute.xlu0 %2608 }
 0x35e   : > { %6366 = vst [vmem:[#allocation14_spill] sm:$0xff] %v5660_v27  ;;  %v5662_v18 = vpop.permute.xlu1 %2610 }
 0x35f   : > { %6367 = vst [vmem:[#allocation16_spill] sm:$0xff] %v5662_v18 }
 0x361   : > { %v1174_v47 = vpop.xlane.xlu0 %1173 }
 0x362   : > { %v1200_v4 = vsub.f32 %v5475_v38, %v1174_v47  ;;  %v1177_v53 = vpop.xlane.xlu1 %1176 }
 0x363   : > { %v1201_v25 = vsub.f32 %v5479_v9, %v1177_v53 }
 0x364   : > { %v1209_v24 = vmul.f32 1.442695, %v1200_v4 }
 0x365   : > { %v1180_v20 = vpop.xlane.xlu0 %1179  ;;  %v1211_v34 = vmul.f32 1.442695, %v1201_v25 }
 0x366   : > { %4089 = vpow2.f32 %v1209_v24  ;;  %v1202_v43 = vsub.f32 %v5481_v39, %v1180_v20  ;;  %v1186_v16 = vpop.xlane.xlu1 %1185 }
 0x367   : > { %4091 = vpow2.f32 %v1211_v34 }
 0x368   : > { %v1213_v3 = vmul.f32 1.442695, %v1202_v43 }
 0x369   : > { %v1183_v29 = vpop.xlane.xlu0 %1182 }
 0x36a   : > { %v1203_v55 = vsub.f32 %v5486_v52, %v1183_v29  ;;  %4093 = vpow2.f32 %v1213_v3  ;;  %v1192_v25 = vpop.xlane.xlu1 %1191 }
 0x36c   : > { %v1215_v61 = vmul.f32 1.442695, %v1203_v55 }
 0x36d   : > { %v1189_v8 = vpop.xlane.xlu0 %1188 }
 0x36e   : > { %4095 = vpow2.f32 %v1215_v61 }
 0x371   : > { %v1195_v29 = vpop.xlane.xlu0 %1194 }
 0x375   : > { %1608 = vmax.xlane.f32.xlu0 %v1607_v37  ;;  %1611 = vmax.xlane.f32.xlu1 %v1610_v50  ;;  %v1204_v37 = vsub.f32 %v5493_v51, %v1186_v16  ;;  %v1207_v16 = vsub.f32 %v5522_v21, %v1195_v29 }
 0x377   : > { %v1217_v4 = vmul.f32 1.442695, %v1204_v37 }
 0x379   : > { %1614 = vmax.xlane.f32.xlu0 %v1613_v11  ;;  %1617 = vmax.xlane.f32.xlu1 %v1616_v42  ;;  %v5681_v11 = vpop.eup %4089  ;;  %v1205_v42 = vsub.f32 %v5502_v12, %v1189_v8  ;;  %4097 = vpow2.f32 %v1217_v4  ;;  %v1206_v12 = vsub.f32 %v5513_v54, %v1192_v25 }
 0x37a   : > { %v1227_v53 = vsel %vm1171_vm5, %v5681_v11, 0.0  ;;  %v5690_v51 = vpop.eup %4091 }
 0x37b   : > { %v1219_v34 = vmul.f32 1.442695, %v1205_v42  ;;  %v5699_v55 = vpop.eup %4093 }
 0x37c   : > { %v5713_v4 = vpop.eup %4095 }
 0x37d   : > { %4099 = vpow2.f32 %v1219_v34 }
 0x38b   : > { %v5667_v1 = vpop.f32.mrf.mxu0 }
 0x38c   : > { %v1619_v17 = vsel %vm1196_vm6, %v5667_v1, -inf }
 0x38d   : > { %1620 = vmax.xlane.f32.xlu0 %v1619_v17  ;;  %v3651_v0 = vpop.f32.mrf.mxu0  ;;  %v1230_v17 = vsel %vm1171_vm5, %v5690_v51, 0.0 }
 0x38f   : > { %v5671_v38 = vpop.f32.mrf.mxu0 }
 0x390   : > { %v2049_v9 = vsel %vm1171_vm5, %v5671_v38, -inf }
 0x391   : > { %2050 = vmax.xlane.f32.xlu1 %v2049_v9  ;;  %v3717_v39 = vpop.f32.mrf.mxu0  ;;  %v1221_v9 = vmul.f32 1.442695, %v1206_v12  ;;  %v5721_v12 = vpop.eup %4097 }
 0x392   : > { %v5725_v29 = vpop.eup %4099 }
 0x393   : > { %v5676_v45 = vpop.f32.mrf.mxu0  ;;  %4101 = vpow2.f32 %v1221_v9 }
 0x394   : > { %v2052_v50 = vsel %vm1171_vm5, %v5676_v45, -inf }
 0x395   : > { %2053 = vmax.xlane.f32.xlu0 %v2052_v50  ;;  %v3720_v52 = vpop.f32.mrf.mxu0  ;;  %v1233_v50 = vsel %vm1171_vm5, %v5699_v55, 0.0 }
 0x396   : > { %v1223_v52 = vmul.f32 1.442695, %v1207_v16 }
 0x397   : > { %v5684_v47 = vpop.f32.mrf.mxu0 }
 0x398   : > { %v2055_v24 = vsel %vm1171_vm5, %v5684_v47, -inf  ;;  %4103 = vpow2.f32 %v1223_v52 }
 0x399   : > { %1228 = vadd.xlane.f32.xlu0 %v1227_v53  ;;  %2056 = vmax.xlane.f32.xlu1 %v2055_v24  ;;  %v3723_v20 = vpop.f32.mrf.mxu0 }
 0x39a   : > { %v1236_v20 = vsel %vm1171_vm5, %v5713_v4, 0.0 }
 0x39b   : > { %v5692_v43 = vpop.f32.mrf.mxu0 }
 0x39c   : > { %v2058_v39 = vsel %vm1171_vm5, %v5692_v43, -inf }
 0x39d   : > { %1231 = vadd.xlane.f32.xlu0 %v1230_v17  ;;  %v3726_v0 = vpop.f32.mrf.mxu0 }
 0x39e   : > { %v1239_v0 = vsel %vm1171_vm5, %v5721_v12, 0.0 }
 0x39f   : > { %v5697_v3 = vpop.f32.mrf.mxu0 }
 0x3a0   : > { %v2061_v54 = vsel %vm1171_vm5, %v5697_v3, -inf }
 0x3a1   : > { %2059 = vmax.xlane.f32.xlu0 %v2058_v39  ;;  %2062 = vmax.xlane.f32.xlu1 %v2061_v54  ;;  %v3729_v61 = vpop.f32.mrf.mxu0  ;;  %v1242_v54 = vsel %vm1171_vm5, %v5725_v29, 0.0 }
 0x3a3   : > { %v1199_v8 = vpop.xlane.xlu1 %1198  ;;  %v5706_v37 = vpop.f32.mrf.mxu0 }
 0x3a4   : > { %v1208_v42 = vsub.f32 %v5582_v33, %v1199_v8  ;;  %v2064_v21 = vsel %vm1171_vm5, %v5706_v37, -inf  ;;  %v5737_v8 = vpop.eup %4101 }
 0x3a5   : > { %1234 = vadd.xlane.f32.xlu0 %v1233_v50  ;;  %2065 = vmax.xlane.f32.xlu1 %v2064_v21  ;;  %v3732_v53 = vpop.f32.mrf.mxu0 }
 0x3a6   : > { %v1225_v25 = vmul.f32 1.442695, %v1208_v42  ;;  %v1245_v42 = vsel %vm1171_vm5, %v5737_v8, 0.0  ;;  %v5745_v53 = vpop.eup %4103 }
 0x3a7   : > { %v5715_v24 = vpop.f32.mrf.mxu0 }
 0x3a8   : > { %v2067_v34 = vsel %vm1171_vm5, %v5715_v24, -inf  ;;  %4105 = vpow2.f32 %v1225_v25 }
 0x3a9   : > { %1237 = vadd.xlane.f32.xlu0 %v1236_v20  ;;  %2068 = vmax.xlane.f32.xlu1 %v2067_v34  ;;  %v3735_v33 = vpop.f32.mrf.mxu0  ;;  %v1248_v34 = vsel %vm1171_vm5, %v5745_v53, 0.0 }
 0x3ab   : > { %v5723_v17 = vpop.f32.mrf.mxu0 }
 0x3ac   : > { %v2070_v9 = vsel %vm1171_vm5, %v5723_v17, -inf }
 0x3ad   : > { %1240 = vadd.xlane.f32.xlu0 %v1239_v0  ;;  %2071 = vmax.xlane.f32.xlu1 %v2070_v9  ;;  %v3738_v16 = vpop.f32.mrf.mxu0 }
 0x3af   : > { %v5731_v39 = vpop.f32.mrf.mxu0 }
 0x3b0   : > { %v2073_v61 = vsel %vm1196_vm6, %v5731_v39, -inf }
 0x3b1   : > { %1243 = vadd.xlane.f32.xlu0 %v1242_v54  ;;  %2074 = vmax.xlane.f32.xlu1 %v2073_v61  ;;  %v3741_v50 = vpop.f32.mrf.mxu0 }
 0x3b3   : > { %v5739_v52 = vpop.f32.mrf.mxu0 }
 0x3b4   : > { %v2495_v21 = vsel %vm1171_vm5, %v5739_v52, -inf }
 0x3b5   : > { %1246 = vadd.xlane.f32.xlu0 %v1245_v42  ;;  %2496 = vmax.xlane.f32.xlu1 %v2495_v21  ;;  %v3807_v25 = vpop.f32.mrf.mxu0  ;;  %v5753_v0 = vpop.eup %4105 }
 0x3b6   : > { %v1251_v54 = vsel %vm1196_vm6, %v5753_v0, 0.0 }
 0x3b7   : > { %v5747_v20 = vpop.f32.mrf.mxu0 }
 0x3b8   : > { %v2498_v33 = vsel %vm1171_vm5, %v5747_v20, -inf }
 0x3b9   : > { %1249 = vadd.xlane.f32.xlu0 %v1248_v34  ;;  %2499 = vmax.xlane.f32.xlu1 %v2498_v33  ;;  %v3810_v9 = vpop.f32.mrf.mxu0 }
 0x3bb   : > { %v5755_v16 = vpop.f32.mrf.mxu0 }
 0x3bc   : > { %v2501_v61 = vsel %vm1171_vm5, %v5755_v16, -inf }
 0x3bd   : > { %v1597_v50 = vpop.xlane.xlu0 %1596  ;;  %1252 = vadd.xlane.f32.xlu0 %v1251_v54  ;;  %2502 = vmax.xlane.f32.xlu1 %v2501_v61  ;;  %v3813_v42 = vpop.f32.mrf.mxu0 }
 0x3be   : > { %v1622_v21 = vsub.f32 %v5586_v15, %v1597_v50 }
 0x3bf   : > { %v5762_v25 = vpop.f32.mrf.mxu0 }
 0x3c0   : > { %v2504_v34 = vsel %vm1171_vm5, %v5762_v25, -inf  ;;  %v1631_v33 = vmul.f32 1.442695, %v1622_v21 }
 0x3c1   : > { %v1600_v9 = vpop.xlane.xlu1 %1599  ;;  %2505 = vmax.xlane.f32.xlu1 %v2504_v34  ;;  %v3816_v27 = vpop.f32.mrf.mxu0 }
 0x3c2   : > { %v1623_v18 = vsub.f32 %v5590_v19, %v1600_v9  ;;  %4107 = vpow2.f32 %v1631_v33 }
 0x3c3   : > { %v5767_v44 = vpop.f32.mrf.mxu0 }
 0x3c4   : > { %v2507_v54 = vsel %vm1171_vm5, %v5767_v44, -inf  ;;  %v1633_v61 = vmul.f32 1.442695, %v1623_v18 }
 0x3c5   : > { %v1603_v42 = vpop.xlane.xlu0 %1602  ;;  %2508 = vmax.xlane.f32.xlu1 %v2507_v54  ;;  %v3819_v15 = vpop.f32.mrf.mxu0 }
 0x3c6   : > { %v1624_v50 = vsub.f32 %v5596_v7, %v1603_v42  ;;  %4109 = vpow2.f32 %v1633_v61 }
 0x3c7   : > { %v5772_v5 = vpop.f32.mrf.mxu0 }
 0x3c8   : > { %v2510_v21 = vsel %vm1171_vm5, %v5772_v5, -inf  ;;  %v1635_v27 = vmul.f32 1.442695, %v1624_v50 }
 0x3c9   : > { %v1606_v19 = vpop.xlane.xlu1 %1605  ;;  %2511 = vmax.xlane.f32.xlu1 %v2510_v21  ;;  %v3822_v9 = vpop.f32.mrf.mxu0 }
 0x3ca   : > { %v1625_v34 = vsub.f32 %v5602_v63, %v1606_v19  ;;  %4111 = vpow2.f32 %v1635_v27 }
 0x3cb   : > { %v5777_v32 = vpop.f32.mrf.mxu0 }
 0x3cc   : > { %6368 = vst [vmem:[#allocation21_spill] sm:$0xff] %v5777_v32  ;;  %v1637_v18 = vmul.f32 1.442695, %v1625_v34  ;;  %v2513_v33 = vsel %vm1171_vm5, %v5777_v32, -inf }
 0x3cd   : > { %2514 = vmax.xlane.f32.xlu1 %v2513_v33  ;;  %v3825_v7 = vpop.f32.mrf.mxu0 }
 0x3ce   : > { %4113 = vpow2.f32 %v1637_v18 }
 0x3cf   : > { %v5781_v54 = vpop.f32.mrf.mxu0  ;;  %v5785_v42 = vpop.eup %4107 }
 0x3d0   : > { %6369 = vst [vmem:[#allocation20_spill] sm:$0xff] %v5781_v54  ;;  %v2516_v61 = vsel %vm1171_vm5, %v5781_v54, -inf  ;;  %v1649_v50 = vsel %vm1171_vm5, %v5785_v42, 0.0 }
 0x3d1   : > { %2517 = vmax.xlane.f32.xlu0 %v2516_v61  ;;  %v3828_v63 = vpop.f32.mrf.mxu0  ;;  %v5805_v61 = vpop.permute.xlu0 %2604 }
 0x3d2   : > { %6371 = vst [vmem:[#allocation25_spill] sm:$0xff] %v5805_v61 }
 0x3d3   : > { %v5787_v15 = vpop.f32.mrf.mxu0  ;;  %v5793_v27 = vpop.eup %4109 }
 0x3d4   : > { %6370 = vst [vmem:[#allocation12_spill] sm:$0xff] %v5787_v15  ;;  %v2519_v21 = vsel %vm1196_vm6, %v5787_v15, -inf  ;;  %v1652_v34 = vsel %vm1171_vm5, %v5793_v27, 0.0 }
 0x3d5   : > { %1650 = vadd.xlane.f32.xlu0 %v1649_v50  ;;  %2520 = vmax.xlane.f32.xlu1 %v2519_v21  ;;  %v3831_v19 = vpop.f32.mrf.mxu0  ;;  %v5807_v63 = vpop.permute.xlu0 %2602 }
 0x3d6   : > { %6372 = vst [vmem:[#allocation24_spill] sm:$0xff] %v5807_v63  ;;  %v5809_v50 = vpop.permute.xlu1 %2606 }
 0x3d7   : > { %v5797_v9 = vpop.eup %4111  ;;  %6373 = vst [vmem:[#allocation13_spill] sm:$0xff] %v5809_v50 }
 0x3d8   : > { %v1655_v18 = vsel %vm1171_vm5, %v5797_v9, 0.0 }
 0x3d9   : > { %1653 = vadd.xlane.f32.xlu0 %v1652_v34 }
 0x3db   : > { %v5801_v33 = vpop.eup %4113 }
 0x3dc   : > { %v1658_v7 = vsel %vm1171_vm5, %v5801_v33, 0.0 }
 0x3dd   : > { %1656 = vadd.xlane.f32.xlu0 %v1655_v18 }
 0x3e1   : > { %1659 = vadd.xlane.f32.xlu0 %v1658_v7 }
 0x3fe   : > { %v1609_v21 = vpop.xlane.xlu0 %1608  ;;  %v1612_v19 = vpop.xlane.xlu1 %1611 }
 0x3ff   : > { %v1626_v34 = vsub.f32 %v5606_v60, %v1609_v21  ;;  %v1627_v54 = vsub.f32 %v5610_v14, %v1612_v19 }
 0x401   : > { %v1639_v15 = vmul.f32 1.442695, %v1626_v34  ;;  %v1641_v62 = vmul.f32 1.442695, %v1627_v54 }
 0x402   : > { %v1615_v56 = vpop.xlane.xlu0 %1614  ;;  %v1618_v18 = vpop.xlane.xlu1 %1617 }
 0x403   : > { %4115 = vpow2.f32 %v1639_v15  ;;  %v1628_v32 = vsub.f32 %v5614_v48, %v1615_v56  ;;  %v1629_v7 = vsub.f32 %v5616_v58, %v1618_v18 }
 0x404   : > { %4117 = vpow2.f32 %v1641_v62 }
 0x405   : > { %v1643_v61 = vmul.f32 1.442695, %v1628_v32  ;;  %v1645_v63 = vmul.f32 1.442695, %v1629_v7 }
 0x407   : > { %4119 = vpow2.f32 %v1643_v61 }
 0x408   : > { %4121 = vpow2.f32 %v1645_v63 }
 0x410   : > { %v5815_v50 = vpop.eup %4115 }
 0x411   : > { %v5817_v30 = vpop.eup %4117  ;;  %v1661_v60 = vsel %vm1171_vm5, %v5815_v50, 0.0 }
 0x412   : > { %1662 = vadd.xlane.f32.xlu0 %v1661_v60  ;;  %v1664_v14 = vsel %vm1171_vm5, %v5817_v30, 0.0 }
 0x413   : > { %1665 = vadd.xlane.f32.xlu1 %v1664_v14 }
 0x414   : > { %v5823_v48 = vpop.eup %4119 }
 0x415   : > { %v5825_v58 = vpop.eup %4121  ;;  %v1667_v56 = vsel %vm1171_vm5, %v5823_v48, 0.0 }
 0x416   : > { %v1621_v62 = vpop.xlane.xlu0 %1620  ;;  %1668 = vadd.xlane.f32.xlu0 %v1667_v56  ;;  %v1670_v32 = vsel %vm1171_vm5, %v5825_v58, 0.0 }
 0x417   : > { %v1630_v54 = vsub.f32 %v5667_v1, %v1621_v62  ;;  %1671 = vadd.xlane.f32.xlu1 %v1670_v32 }
 0x419   : > { %v1647_v15 = vmul.f32 1.442695, %v1630_v54 }
 0x41a   : > { %v2051_v61 = vpop.xlane.xlu1 %2050 }
 0x41b   : > { %4123 = vpow2.f32 %v1647_v15  ;;  %v2076_v63 = vsub.f32 %v5671_v38, %v2051_v61 }
 0x41d   : > { %v2085_v21 = vmul.f32 1.442695, %v2076_v63 }
 0x41e   : > { %v2054_v19 = vpop.xlane.xlu0 %2053 }
 0x41f   : > { %4125 = vpow2.f32 %v2085_v21  ;;  %v2077_v34 = vsub.f32 %v5676_v45, %v2054_v19 }
 0x421   : > { %v2087_v18 = vmul.f32 1.442695, %v2077_v34 }
 0x422   : > { %v1229_v7 = vpop.xlane.xlu0 %1228  ;;  %v2057_v60 = vpop.xlane.xlu1 %2056 }
 0x423   : > { %4127 = vpow2.f32 %v2087_v18  ;;  %v2078_v14 = vsub.f32 %v5684_v47, %v2057_v60 }
 0x424   : > { %4129 = vrcp.f32 %v1229_v7 }
 0x425   : > { %v2089_v56 = vmul.f32 1.442695, %v2078_v14 }
 0x426   : > { %v1232_v1 = vpop.xlane.xlu0 %1231 }
 0x427   : > { %4131 = vpow2.f32 %v2089_v56 }
 0x428   : > { %v5835_v62 = vpop.eup %4123  ;;  %4133 = vrcp.f32 %v1232_v1 }
 0x429   : > { %v1673_v38 = vsel %vm1196_vm6, %v5835_v62, 0.0 }
 0x42a   : > { %v2060_v32 = vpop.xlane.xlu0 %2059  ;;  %v2063_v54 = vpop.xlane.xlu1 %2062  ;;  %1674 = vadd.xlane.f32.xlu0 %v1673_v38 }
 0x42b   : > { %v2079_v45 = vsub.f32 %v5692_v43, %v2060_v32  ;;  %v2080_v15 = vsub.f32 %v5697_v3, %v2063_v54 }
 0x42c   : > { %v5841_v61 = vpop.eup %4125 }
 0x42d   : > { %v2091_v47 = vmul.f32 1.442695, %v2079_v45  ;;  %v2093_v63 = vmul.f32 1.442695, %v2080_v15  ;;  %v2103_v21 = vsel %vm1171_vm5, %v5841_v61, 0.0 }
 0x42e   : > { %v1235_v19 = vpop.xlane.xlu0 %1234  ;;  %v2066_v34 = vpop.xlane.xlu1 %2065  ;;  %2104 = vadd.xlane.f32.xlu1 %v2103_v21 }
 0x42f   : > { %4135 = vpow2.f32 %v2091_v47  ;;  %v2081_v18 = vsub.f32 %v5706_v37, %v2066_v34 }
 0x430   : > { %v5846_v7 = vpop.eup %4127  ;;  %4137 = vpow2.f32 %v2093_v63 }
 0x431   : > { %v4130_v60 = vpop.eup %4129  ;;  %4139 = vrcp.f32 %v1235_v19  ;;  %v2095_v43 = vmul.f32 1.442695, %v2081_v18  ;;  %v2106_v3 = vsel %vm1171_vm5, %v5846_v7, 0.0 }
 0x432   : > { %v1263_v14 = vmul.f32 %v4130_v60, %v5681_v11  ;;  %v1238_v56 = vpop.xlane.xlu0 %1237  ;;  %v2069_v1 = vpop.xlane.xlu1 %2068  ;;  %2107 = vadd.xlane.f32.xlu1 %v2106_v3 }
 0x433   : > { %4141 = vpow2.f32 %v2095_v43  ;;  %v2082_v38 = vsub.f32 %v5715_v24, %v2069_v1 }
 0x434   : > { %v5852_v32 = vpop.eup %4131  ;;  %4143 = vrcp.f32 %v1238_v56  ;;  %3581 = vmatmul.mubr.msk.f32.vlgmr.msra.gmra.mxu1 %vm1171_vm5, %v1263_v14 }
 0x435   : > { %v4134_v37 = vpop.eup %4133  ;;  %v2097_v54 = vmul.f32 1.442695, %v2082_v38  ;;  %3653 = vmatpush3.msk.msra.mxu1 %vm1299_vm4, %v5624_v2  ;;  %3583 = vmatprep.mubr.msk.f32.mxu1 %vm4366_vm0, %v6337_v22  ;;  %v2109_v11 = vsel %vm1171_vm5, %v5852_v32, 0.0 }
 0x436   : > { %3654 = vmatprep.subr.mxu1 %v6337_v22  ;;  %v1241_v45 = vpop.xlane.xlu0 %1240  ;;  %v2072_v24 = vpop.xlane.xlu1 %2071  ;;  %2110 = vadd.xlane.f32.xlu1 %v2109_v11  ;;  %v1264_v15 = vmul.f32 %v4134_v37, %v5690_v51 }
 0x437   : > { %4145 = vpow2.f32 %v2097_v54  ;;  %3655 = vmatpush3.msra.mxu1 %v5592_v46  ;;  %v2083_v47 = vsub.f32 %v5723_v17, %v2072_v24 }
 0x438   : > { %3656 = vmatprep.subr.mxu1 %v6337_v22  ;;  %4147 = vrcp.f32 %v1241_v45  ;;  %3584 = vmatmul.mubr.msk.f32.gmra.mxu1 %vm1171_vm5, %v1264_v15 }
 0x439   : > { %v2099_v2 = vmul.f32 1.442695, %v2083_v47  ;;  %3657 = vmatpush3.msra.mxu1 %v5630_v23  ;;  %3586 = vmatprep.mubr.msk.f32.mxu1 %vm4366_vm0, %v6337_v22 }
 0x43a   : > { %3658 = vmatprep.subr.mxu1 %v6337_v22  ;;  %v1244_v63 = vpop.xlane.xlu0 %1243  ;;  %v2075_v51 = vpop.xlane.xlu1 %2074 }
 0x43b   : > { %4149 = vpow2.f32 %v2099_v2  ;;  %3659 = vmatpush3.msra.mxu1 %v5634_v59  ;;  %v2084_v46 = vsub.f32 %v5731_v39, %v2075_v51 }
 0x43c   : > { %v5873_v17 = vpop.eup %4135  ;;  %3660 = vmatprep.subr.mxu1 %v6337_v22  ;;  %4151 = vrcp.f32 %v1244_v63 }
 0x43d   : > { %v5876_v21 = vpop.eup %4137  ;;  %v2101_v23 = vmul.f32 1.442695, %v2084_v46  ;;  %3661 = vmatpush3.msra.mxu1 %v5600_v28  ;;  %v2112_v19 = vsel %vm1171_vm5, %v5873_v17, 0.0 }
 0x43e   : > { %v4140_v34 = vpop.eup %4139  ;;  %3662 = vmatprep.subr.mxu1 %v6337_v22  ;;  %v1247_v18 = vpop.xlane.xlu0 %1246  ;;  %2113 = vadd.xlane.f32.xlu0 %v2112_v19  ;;  %v2115_v39 = vsel %vm1171_vm5, %v5876_v21, 0.0 }
 0x43f   : > { %v2497_v59 = vpop.xlane.xlu1 %2496  ;;  %4153 = vpow2.f32 %v2101_v23  ;;  %3663 = vmatpush3.msra.mxu1 %v5608_v41  ;;  %2116 = vadd.xlane.f32.xlu1 %v2115_v39  ;;  %v1265_v28 = vmul.f32 %v4140_v34, %v5699_v55 }
 0x440   : > { %v2522_v60 = vsub.f32 %v5739_v52, %v2497_v59  ;;  %v5887_v43 = vpop.eup %4141  ;;  %3664 = vmatprep.subr.mxu1 %v6337_v22  ;;  %4155 = vrcp.f32 %v1247_v18 }
 0x441   : > { %v4144_v3 = vpop.eup %4143  ;;  %3587 = vmatmul.mubr.msk.f32.gmra.mxu1 %vm1171_vm5, %v1265_v28  ;;  %v2118_v56 = vsel %vm1171_vm5, %v5887_v43, 0.0 }
 0x442   : > { %v2531_v14 = vmul.f32 1.442695, %v2522_v60  ;;  %3665 = vmatpush3.msra.mxu1 %v5612_v57  ;;  %3589 = vmatprep.mubr.msk.f32.mxu1 %vm4366_vm0, %v6337_v22  ;;  %v1250_v41 = vpop.xlane.xlu0 %1249  ;;  %v1266_v55 = vmul.f32 %v4144_v3, %v5713_v4 }
 0x443   : > { %v2500_v52 = vpop.xlane.xlu1 %2499  ;;  %3666 = vmatprep.subr.mxu1 %v6337_v22  ;;  %2119 = vadd.xlane.f32.xlu0 %v2118_v56 }
 0x444   : > { %4157 = vpow2.f32 %v2531_v14  ;;  %v2523_v1 = vsub.f32 %v5747_v20, %v2500_v52  ;;  %v5899_v38 = vpop.eup %4145  ;;  %3667 = vmatpush3.msra.mxu1 %v5638_v6 }
 0x445   : > { %4159 = vrcp.f32 %v1250_v41  ;;  %v4148_v37 = vpop.eup %4147  ;;  %3668 = vmatprep.subr.mxu1 %v6337_v22  ;;  %3590 = vmatmul.mubr.msk.f32.gmra.mxu1 %vm1171_vm5, %v1266_v55  ;;  %v2121_v4 = vsel %vm1171_vm5, %v5899_v38, 0.0 }
 0x446   : > { %v2533_v57 = vmul.f32 1.442695, %v2523_v1  ;;  %3669 = vmatpush3.msra.mxu1 %v5618_v31  ;;  %3592 = vmatprep.mubr.msk.f32.mxu1 %vm4366_vm0, %v6337_v22  ;;  %v1253_v20 = vpop.xlane.xlu0 %1252  ;;  %v1267_v11 = vmul.f32 %v4148_v37, %v5721_v12 }
 0x447   : > { %v2503_v54 = vpop.xlane.xlu1 %2502  ;;  %2122 = vadd.xlane.f32.xlu1 %v2121_v4  ;;  %3742 = vmatprep.subr.mxu1 %v6337_v22 }
 0x448   : > { %4161 = vpow2.f32 %v2533_v57  ;;  %v2524_v6 = vsub.f32 %v5755_v16, %v2503_v54  ;;  %v5912_v45 = vpop.eup %4149 }
 0x449   : > { %4163 = vrcp.f32 %v1253_v20  ;;  %v4152_v24 = vpop.eup %4151  ;;  %3593 = vmatmul.mubr.msk.f32.gmra.mxu1 %vm1171_vm5, %v1267_v11  ;;  %v2124_v31 = vsel %vm1171_vm5, %v5912_v45, 0.0 }
 0x44a   : > { %v2535_v15 = vmul.f32 1.442695, %v2524_v6  ;;  %3595 = vmatprep.mubr.msk.f32.mxu1 %vm4366_vm0, %v6337_v22  ;;  %2125 = vadd.xlane.f32.xlu0 %v2124_v31  ;;  %v1268_v16 = vmul.f32 %v4152_v24, %v5725_v29  ;;  %v6378_v31 = vld [vmem:[#allocation12_spill] sm:$0xff] }
 0x44b   : > { %v2506_v12 = vpop.xlane.xlu1 %2505 }
 0x44c   : > { %4165 = vpow2.f32 %v2535_v15  ;;  %v2525_v47 = vsub.f32 %v5762_v25, %v2506_v12  ;;  %v5921_v2 = vpop.eup %4153 }
 0x44d   : > { %v4156_v63 = vpop.eup %4155  ;;  %3596 = vmatmul.mubr.msk.f32.gmra.mxu1 %vm1171_vm5, %v1268_v16  ;;  %v2127_v46 = vsel %vm1196_vm6, %v5921_v2, 0.0  ;;  %v6379_v16 = vld [vmem:[#allocation17_spill] sm:$0xff] }
 0x44e   : > { %v2537_v51 = vmul.f32 1.442695, %v2525_v47  ;;  %3598 = vmatprep.mubr.msk.f32.mxu1 %vm4366_vm0, %v6337_v22  ;;  %2128 = vadd.xlane.f32.xlu1 %v2127_v46  ;;  %v1269_v19 = vmul.f32 %v4156_v63, %v5737_v8 }
 0x44f   : > { %v2509_v23 = vpop.xlane.xlu1 %2508 }
 0x450   : > { %4167 = vpow2.f32 %v2537_v51  ;;  %v2526_v29 = vsub.f32 %v5767_v44, %v2509_v23 }
 0x451   : > { %v5930_v25 = vpop.eup %4157  ;;  %3599 = vmatmul.mubr.msk.f32.gmra.mxu1 %vm1171_vm5, %v1269_v19 }
 0x452   : > { %v4160_v34 = vpop.eup %4159  ;;  %v2539_v18 = vmul.f32 1.442695, %v2526_v29  ;;  %v2549_v59 = vsel %vm1171_vm5, %v5930_v25, 0.0  ;;  %3601 = vmatprep.mubr.msk.f32.mxu1 %vm4366_vm0, %v6337_v22 }
 0x453   : > { %2550 = vadd.xlane.f32.xlu1 %v2549_v59  ;;  %v1270_v39 = vmul.f32 %v4160_v34, %v5745_v53  ;;  %v2512_v6 = vpop.xlane.xlu1 %2511 }
 0x454   : > { %4169 = vpow2.f32 %v2539_v18 }
 0x455   : > { %v5938_v8 = vpop.eup %4161  ;;  %3602 = vmatmul.mubr.msk.f32.gmra.mxu1 %vm1171_vm5, %v1270_v39 }
 0x456   : > { %v4164_v60 = vpop.eup %4163  ;;  %v2552_v44 = vsel %vm1171_vm5, %v5938_v8, 0.0  ;;  %3604 = vmatprep.mubr.msk.f32.mxu1 %vm4366_vm0, %v6337_v22 }
 0x457   : > { %2553 = vadd.xlane.f32.xlu1 %v2552_v44  ;;  %v1271_v28 = vmul.f32 %v4164_v60, %v5753_v0  ;;  %v6380_v44 = vld [vmem:[#allocation26_spill] sm:$0xff] }
 0x459   : > { %v5946_v3 = vpop.eup %4165  ;;  %3605 = vmatmul.mubr.msk.f32.gmra.mxu1 %vm1171_vm5, %v1271_v28 }
 0x45a   : > { %v2555_v53 = vsel %vm1171_vm5, %v5946_v3, 0.0  ;;  %3670 = vmatprep.mubr.msk.f32.mxu1 %vm4366_vm0, %v6337_v22  ;;  %v5953_v14 = vpop.xlane.xlu0 %2517 }
 0x45b   : > { %2556 = vadd.xlane.f32.xlu1 %v2555_v53 }
 0x45d   : > { %v5955_v56 = vpop.eup %4167 }
 0x45e   : > { %v2558_v41 = vsel %vm1171_vm5, %v5955_v56, 0.0  ;;  %v1651_v0 = vpop.xlane.xlu0 %1650 }
 0x45f   : > { %2559 = vadd.xlane.f32.xlu0 %v2558_v41  ;;  %4171 = vrcp.f32 %v1651_v0  ;;  %v6381_v41 = vld [vmem:[#allocation18_spill] sm:$0xff] }
 0x461   : > { %v5959_v52 = vpop.eup %4169 }
 0x462   : > { %v2561_v55 = vsel %vm1171_vm5, %v5959_v52, 0.0  ;;  %v1654_v1 = vpop.xlane.xlu0 %1653 }
 0x463   : > { %2562 = vadd.xlane.f32.xlu1 %v2561_v55  ;;  %4173 = vrcp.f32 %v1654_v1 }
 0x466   : > { %v1657_v37 = vpop.xlane.xlu0 %1656 }
 0x467   : > { %4175 = vrcp.f32 %v1657_v37  ;;  %v6382_v37 = vld [vmem:[#allocation20_spill] sm:$0xff] }
 0x46a   : > { %v1660_v57 = vpop.xlane.xlu0 %1659 }
 0x46b   : > { %4177 = vrcp.f32 %v1660_v57  ;;  %v2529_v57 = vsub.f32 %v6382_v37, %v5953_v14 }
 0x46c   : > { %v4172_v4 = vpop.eup %4171 }
 0x46d   : > { %v1685_v20 = vmul.f32 %v4172_v4, %v5785_v42 }
 0x46f   : > { %3671 = vmatmul.mubr.msk.f32.vlgmr.msra.gmra.mxu1 %vm1171_vm5, %v1685_v20  ;;  %v2545_v20 = vmul.f32 1.442695, %v2529_v57 }
 0x470   : > { %v4174_v54 = vpop.eup %4173  ;;  %3743 = vmatpush3.msk.msra.mxu1 %vm1299_vm4, %v5642_v35  ;;  %3673 = vmatprep.mubr.msk.f32.mxu1 %vm4366_vm0, %v6337_v22 }
 0x471   : > { %3744 = vmatprep.subr.mxu1 %v6337_v22  ;;  %v1686_v11 = vmul.f32 %v4174_v54, %v5793_v27  ;;  %v6374_v27 = vld [vmem:[#allocation15_spill] sm:$0xff] }
 0x472   : > { %3745 = vmatpush3.msra.mxu1 %v5626_v10 }
 0x473   : > { %3746 = vmatprep.subr.mxu1 %v6337_v22  ;;  %3674 = vmatmul.mubr.msk.f32.gmra.mxu1 %vm1171_vm5, %v1686_v11 }
 0x474   : > { %2600 = vrot.lane.b32.xlu1 %v5318_v13, %s4371_s11  ;;  %v4176_v42 = vpop.eup %4175  ;;  %3747 = vmatpush3.msra.mxu1 %v5646_v26  ;;  %v2515_v26 = vpop.xlane.xlu1 %2514 }
 0x475   : > { %2598 = vrot.lane.b32.xlu0 %v5341_v40, %s4371_s11  ;;  %3676 = vmatprep.mubr.msk.f32.mxu1 %vm4366_vm0, %v6337_v22  ;;  %v1687_v35 = vmul.f32 %v4176_v42, %v5797_v9  ;;  %v2527_v40 = vsub.f32 %v5772_v5, %v2512_v6  ;;  %v6375_v9 = vld [vmem:[#allocation21_spill] sm:$0xff]  ;;  %v6376_v5 = vld [vmem:[#allocation23_spill] sm:$0xff] }
 0x476   : > { %3748 = vmatprep.subr.mxu1 %v6337_v22  ;;  %v2528_v24 = vsub.f32 %v6375_v9, %v2515_v26  ;;  %v6383_v26 = vld [vmem:[#allocation16_spill] sm:$0xff] }
 0x477   : > { %3749 = vmatpush3.msra.mxu1 %v5632_v49  ;;  %v2541_v49 = vmul.f32 1.442695, %v2527_v40 }
 0x478   : > { %v4178_v13 = vpop.eup %4177  ;;  %3750 = vmatprep.subr.mxu1 %v6337_v22  ;;  %3677 = vmatmul.mubr.msk.f32.gmra.mxu1 %vm1171_vm5, %v1687_v35  ;;  %v2543_v15 = vmul.f32 1.442695, %v2528_v24  ;;  %v6385_v24 = vld [vmem:[#allocation13_spill] sm:$0xff] }
 0x479   : > { %3751 = vmatpush3.msra.mxu1 %v5636_v36  ;;  %3679 = vmatprep.mubr.msk.f32.mxu1 %vm4366_vm0, %v6337_v22  ;;  %v1688_v10 = vmul.f32 %v4178_v13, %v5801_v33  ;;  %v2521_v36 = vpop.xlane.xlu1 %2520  ;;  %v6377_v33 = vld [vmem:[#allocation19_spill] sm:$0xff]  ;;  %4179 = vpow2.f32 %v2541_v49 }
 0x47a   : > { %3752 = vmatprep.subr.mxu1 %v6337_v22  ;;  %v2530_v12 = vsub.f32 %v6378_v31, %v2521_v36  ;;  %4181 = vpow2.f32 %v2543_v15 }
 0x47b   : > { %3753 = vmatpush3.msra.mxu1 %v6374_v27 }
 0x47c   : > { %3754 = vmatprep.subr.mxu1 %v6337_v22  ;;  %3680 = vmatmul.mubr.msk.f32.gmra.mxu1 %vm1171_vm5, %v1688_v10  ;;  %v2547_v47 = vmul.f32 1.442695, %v2530_v12 }
 0x47d   : > { %3755 = vmatpush3.msra.mxu1 %v6376_v5  ;;  %3682 = vmatprep.mubr.msk.f32.mxu1 %vm4366_vm0, %v6337_v22  ;;  %v6386_v5 = vld [vmem:[#allocation25_spill] sm:$0xff] }
 0x47e   : > { %3756 = vmatprep.subr.mxu1 %v6337_v22  ;;  %4183 = vpow2.f32 %v2547_v47 }
 0x47f   : > { %3757 = vmatpush3.msra.mxu1 %v6377_v33  ;;  %v6387_v33 = vld [vmem:[#allocation24_spill] sm:$0xff] }
 0x480   : > { %3758 = vmatprep.subr.mxu1 %v6337_v22 }
 0x481   : > { %3759 = vmatpush3.msra.mxu1 %v6379_v16 }
 0x482   : > { %3832 = vmatprep.subr.mxu1 %v6337_v22 }
 0x486   : > { %v6005_v63 = vpop.eup %4179 }
 0x487   : > { %v2564_v51 = vsel %vm1171_vm5, %v6005_v63, 0.0  ;;  %v6009_v46 = vpop.eup %4181 }
 0x488   : > { %v2567_v23 = vsel %vm1171_vm5, %v6009_v46, 0.0 }
 0x48b   : > { %v6013_v19 = vpop.eup %4183 }
 0x48c   : > { %v2573_v29 = vsel %vm1196_vm6, %v6013_v19, 0.0 }
 0x494   : > { %2565 = vadd.xlane.f32.xlu0 %v2564_v51 }
 0x498   : > { %2568 = vadd.xlane.f32.xlu1 %v2567_v23 }
 0x49b   : > { %v1663_v34 = vpop.xlane.xlu0 %1662 }
 0x49c   : > { %2574 = vadd.xlane.f32.xlu1 %v2573_v29  ;;  %4185 = vrcp.f32 %v1663_v34  ;;  %v1666_v18 = vpop.xlane.xlu1 %1665 }
 0x49d   : > { %4187 = vrcp.f32 %v1666_v18 }
 0x49f   : > { %v1669_v59 = vpop.xlane.xlu0 %1668 }
 0x4a0   : > { %4189 = vrcp.f32 %v1669_v59  ;;  %v1672_v39 = vpop.xlane.xlu1 %1671 }
 0x4a1   : > { %4191 = vrcp.f32 %v1672_v39 }
 0x4a9   : > { %v4186_v60 = vpop.eup %4185 }
 0x4aa   : > { %2596 = vrot.lane.b32.xlu0 %v6380_v44, %s4371_s11  ;;  %v1689_v28 = vmul.f32 %v4186_v60, %v5815_v50  ;;  %v4188_v53 = vpop.eup %4187 }
 0x4ab   : > { %v1690_v0 = vmul.f32 %v4188_v53, %v5817_v30 }
 0x4ac   : > { %3683 = vmatmul.mubr.msk.f32.gmra.mxu1 %vm1171_vm5, %v1689_v28 }
 0x4ad   : > { %3685 = vmatprep.mubr.msk.f32.mxu1 %vm4366_vm0, %v6337_v22  ;;  %v4190_v55 = vpop.eup %4189 }
 0x4ae   : > { %2594 = vrot.lane.b32.xlu0 %v6381_v41, %s4371_s11  ;;  %v1691_v1 = vmul.f32 %v4190_v55, %v5823_v48  ;;  %v4192_v50 = vpop.eup %4191 }
 0x4af   : > { %v1692_v30 = vmul.f32 %v4192_v50, %v5825_v58 }
 0x4b0   : > { %3686 = vmatmul.mubr.msk.f32.gmra.mxu1 %vm1171_vm5, %v1690_v0 }
 0x4b1   : > { %3688 = vmatprep.mubr.msk.f32.mxu1 %vm4366_vm0, %v6337_v22 }
 0x4b3   : > { %v1675_v4 = vpop.xlane.xlu0 %1674 }
 0x4b4   : > { %4193 = vrcp.f32 %v1675_v4  ;;  %3689 = vmatmul.mubr.msk.f32.gmra.mxu1 %vm1171_vm5, %v1691_v1 }
 0x4b5   : > { %3691 = vmatprep.mubr.msk.f32.mxu1 %vm4366_vm0, %v6337_v22 }
 0x4b7   : > { %v2105_v54 = vpop.xlane.xlu1 %2104 }
 0x4b8   : > { %4195 = vrcp.f32 %v2105_v54  ;;  %3692 = vmatmul.mubr.msk.f32.gmra.mxu1 %vm1171_vm5, %v1692_v30 }
 0x4b9   : > { %3694 = vmatprep.mubr.msk.f32.mxu1 %vm4366_vm0, %v6337_v22  ;;  %4197 = vpow2.f32 %v2545_v20 }
 0x4bb   : > { %v2108_v48 = vpop.xlane.xlu1 %2107 }
 0x4bc   : > { %4199 = vrcp.f32 %v2108_v48 }
 0x4bf   : > { %v2111_v14 = vpop.xlane.xlu1 %2110 }
 0x4c0   : > { %4201 = vrcp.f32 %v2111_v14 }
 0x4c1   : > { %v4194_v11 = vpop.eup %4193 }
 0x4c2   : > { %v1693_v42 = vmul.f32 %v4194_v11, %v5835_v62 }
 0x4c4   : > { %3695 = vmatmul.mubr.msk.f32.gmra.mxu1 %vm1171_vm5, %v1693_v42 }
 0x4c5   : > { %v4196_v6 = vpop.eup %4195  ;;  %3760 = vmatprep.mubr.msk.f32.mxu1 %vm4366_vm0, %v6337_v22 }
 0x4c6   : > { %v2139_v58 = vmul.f32 %v4196_v6, %v5841_v61  ;;  %v6044_v13 = vpop.eup %4197  ;;  %v6384_v61 = vld [vmem:[#allocation14_spill] sm:$0xff] }
 0x4c7   : > { %v2114_v35 = vpop.xlane.xlu0 %2113  ;;  %v2570_v27 = vsel %vm1171_vm5, %v6044_v13, 0.0 }
 0x4c8   : > { %4203 = vrcp.f32 %v2114_v35  ;;  %v2117_v40 = vpop.xlane.xlu1 %2116  ;;  %3761 = vmatmul.mubr.msk.f32.vlgmr.msra.gmra.mxu1 %vm1171_vm5, %v2139_v58 }
 0x4c9   : > { %v4200_v10 = vpop.eup %4199  ;;  %3833 = vmatpush3.msk.msra.mxu1 %vm1299_vm4, %v6383_v26  ;;  %3763 = vmatprep.mubr.msk.f32.mxu1 %vm4366_vm0, %v6337_v22  ;;  %4205 = vrcp.f32 %v2117_v40 }
 0x4ca   : > { %3834 = vmatprep.subr.mxu1 %v6337_v22  ;;  %v2140_v62 = vmul.f32 %v4200_v10, %v5846_v7 }
 0x4cb   : > { %3835 = vmatpush3.msra.mxu1 %v6384_v61 }
 0x4cc   : > { %v2120_v49 = vpop.xlane.xlu0 %2119  ;;  %3836 = vmatprep.subr.mxu1 %v6337_v22  ;;  %3764 = vmatmul.mubr.msk.f32.gmra.mxu1 %vm1171_vm5, %v2140_v62 }
 0x4cd   : > { %2571 = vadd.xlane.f32.xlu0 %v2570_v27  ;;  %v4202_v9 = vpop.eup %4201  ;;  %4207 = vrcp.f32 %v2120_v49  ;;  %3837 = vmatpush3.msra.mxu1 %v6385_v24 }
 0x4ce   : > { %3766 = vmatprep.mubr.msk.f32.mxu1 %vm4366_vm0, %v6337_v22  ;;  %v2141_v7 = vmul.f32 %v4202_v9, %v5852_v32  ;;  %3838 = vmatprep.subr.mxu1 %v6337_v22 }
 0x4cf   : > { %3839 = vmatpush3.msra.mxu1 %v6386_v5 }
 0x4d0   : > { %v2123_v36 = vpop.xlane.xlu1 %2122  ;;  %3840 = vmatprep.subr.mxu1 %v6337_v22  ;;  %3767 = vmatmul.mubr.msk.f32.gmra.mxu1 %vm1171_vm5, %v2141_v7 }
 0x4d1   : > { %4209 = vrcp.f32 %v2123_v36  ;;  %3841 = vmatpush3.msra.mxu1 %v6387_v33  ;;  %3769 = vmatprep.mubr.msk.f32.mxu1 %vm4366_vm0, %v6337_v22 }
 0x4d2   : > { %3842 = vmatprep.subr.mxu1 %v6337_v22 }
 0x4d3   : > { %v2126_v15 = vpop.xlane.xlu0 %2125 }
 0x4d4   : > { %4211 = vrcp.f32 %v2126_v15 }
 0x4d5   : > { %v4204_v31 = vpop.eup %4203 }
 0x4d6   : > { %v2142_v32 = vmul.f32 %v4204_v31, %v5873_v17  ;;  %v4206_v12 = vpop.eup %4205 }
 0x4d7   : > { %v2129_v16 = vpop.xlane.xlu1 %2128  ;;  %v2143_v47 = vmul.f32 %v4206_v12, %v5876_v21 }
 0x4d8   : > { %3770 = vmatmul.mubr.msk.f32.gmra.mxu1 %vm1171_vm5, %v2142_v32  ;;  %4213 = vrcp.f32 %v2129_v16 }
 0x4d9   : > { %3772 = vmatprep.mubr.msk.f32.mxu1 %vm4366_vm0, %v6337_v22 }
 0x4da   : > { %v4208_v51 = vpop.eup %4207 }
 0x4db   : > { %v2144_v29 = vmul.f32 %v4208_v51, %v5887_v43 }
 0x4dc   : > { %v2551_v23 = vpop.xlane.xlu1 %2550  ;;  %3773 = vmatmul.mubr.msk.f32.gmra.mxu1 %vm1171_vm5, %v2143_v47 }
 0x4dd   : > { %3775 = vmatprep.mubr.msk.f32.mxu1 %vm4366_vm0, %v6337_v22  ;;  %4215 = vrcp.f32 %v2551_v23 }
 0x4de   : > { %v4210_v17 = vpop.eup %4209 }
 0x4df   : > { %v2145_v18 = vmul.f32 %v4210_v17, %v5899_v38 }
 0x4e0   : > { %3776 = vmatmul.mubr.msk.f32.gmra.mxu1 %vm1171_vm5, %v2144_v29  ;;  %v2554_v34 = vpop.xlane.xlu1 %2553 }
 0x4e1   : > { %3778 = vmatprep.mubr.msk.f32.mxu1 %vm4366_vm0, %v6337_v22  ;;  %v4212_v59 = vpop.eup %4211  ;;  %4217 = vrcp.f32 %v2554_v34 }
 0x4e2   : > { %v2146_v21 = vmul.f32 %v4212_v59, %v5912_v45 }
 0x4e4   : > { %3779 = vmatmul.mubr.msk.f32.gmra.mxu1 %vm1171_vm5, %v2145_v18  ;;  %v2557_v60 = vpop.xlane.xlu1 %2556 }
 0x4e5   : > { %3781 = vmatprep.mubr.msk.f32.mxu1 %vm4366_vm0, %v6337_v22  ;;  %v4214_v39 = vpop.eup %4213  ;;  %4219 = vrcp.f32 %v2557_v60 }
 0x4e6   : > { %v2147_v43 = vmul.f32 %v4214_v39, %v5921_v2 }
 0x4e8   : > { %3782 = vmatmul.mubr.msk.f32.gmra.mxu1 %vm1171_vm5, %v2146_v21  ;;  %v2560_v44 = vpop.xlane.xlu0 %2559 }
 0x4e9   : > { %3784 = vmatprep.mubr.msk.f32.mxu1 %vm4366_vm0, %v6337_v22  ;;  %4221 = vrcp.f32 %v2560_v44 }
 0x4ea   : > { %v4216_v40 = vpop.eup %4215 }
 0x4eb   : > { %v2585_v10 = vmul.f32 %v4216_v40, %v5930_v25 }
 0x4ec   : > { %v2563_v28 = vpop.xlane.xlu1 %2562  ;;  %3785 = vmatmul.mubr.msk.f32.gmra.mxu1 %vm1171_vm5, %v2147_v43  ;;  %v2599_v53 = vpop.permute.xlu0 %2598 }
 0x4ed   : > { %3850 = vmatprep.mubr.msk.f32.mxu1 %vm4366_vm0, %v6337_v22  ;;  %4223 = vrcp.f32 %v2563_v28 }
 0x4ee   : > { %v4218_v62 = vpop.eup %4217 }
 0x4ef   : > { %v2586_v61 = vmul.f32 %v4218_v62, %v5938_v8 }
 0x4f0   : > { %v2601_v38 = vpop.permute.xlu1 %2600 }
 0x4f1   : > { %3843 = vmatpush3.msra.mxu1 %v2601_v38 }
 0x4f2   : > { %3844 = vmatprep.subr.mxu1 %v6337_v22  ;;  %v4220_v27 = vpop.eup %4219 }
 0x4f3   : > { %3845 = vmatpush3.msra.mxu1 %v2599_v53  ;;  %v2587_v25 = vmul.f32 %v4220_v27, %v5946_v3 }
 0x4f4   : > { %3846 = vmatprep.subr.mxu1 %v6337_v22  ;;  %v6096_v45 = vpop.f32.mrf.mxu1 }
 0x4f6   : > { %v3582_v41 = vpop.f32.mrf.mxu1  ;;  %v4222_v9 = vpop.eup %4221 }
 0x4f7   : > { %v2588_v24 = vmul.f32 %v4222_v9, %v5955_v56 }
 0x4f8   : > { %v6098_v0 = vpop.f32.mrf.mxu1 }
 0x4fa   : > { %v3585_v2 = vpop.f32.mrf.mxu1  ;;  %v4224_v7 = vpop.eup %4223 }
 0x4fb   : > { %v2589_v36 = vmul.f32 %v4224_v7, %v5959_v52 }
 0x501   : > { %v6100_v55 = vpop.f32.mrf.mxu1 }
 0x503   : > { %v3588_v1 = vpop.f32.mrf.mxu1 }
 0x505   : > { %v6102_v50 = vpop.f32.mrf.mxu1 }
 0x507   : > { %v3591_v37 = vpop.f32.mrf.mxu1 }
 0x509   : > { %v6104_v57 = vpop.f32.mrf.mxu1 }
 0x50b   : > { %v3594_v4 = vpop.f32.mrf.mxu1 }
 0x50d   : > { %v6106_v30 = vpop.f32.mrf.mxu1 }
 0x50f   : > { %v3597_v20 = vpop.f32.mrf.mxu1 }
 0x511   : > { %v6108_v54 = vpop.f32.mrf.mxu1 }
 0x513   : > { %v3600_v48 = vpop.f32.mrf.mxu1 }
 0x515   : > { %v6110_v14 = vpop.f32.mrf.mxu1 }
 0x517   : > { %v3603_v11 = vpop.f32.mrf.mxu1 }
 0x519   : > { %v6112_v42 = vpop.f32.mrf.mxu1 }
 0x51b   : > { %v3606_v6 = vpop.f32.mrf.mxu1 }
 0x51d   : > { %v2566_v58 = vpop.xlane.xlu0 %2565 }
 0x51e   : > { %4225 = vrcp.f32 %v2566_v58 }
 0x521   : > { %v2597_v35 = vpop.permute.xlu0 %2596  ;;  %v2569_v49 = vpop.xlane.xlu1 %2568 }
 0x522   : > { %3847 = vmatpush3.msra.mxu1 %v2597_v35  ;;  %4227 = vrcp.f32 %v2569_v49 }
 0x523   : > { %3848 = vmatprep.subr.mxu1 %v6337_v22 }
 0x525   : > { %v2595_v26 = vpop.permute.xlu0 %2594  ;;  %v2575_v23 = vpop.xlane.xlu1 %2574 }
 0x526   : > { %3849 = vmatpush3.msra.mxu1 %v2595_v26 }
 0x527   : > { %3851 = vmatmul.mubr.msk.f32.vlgmr.msra.gmra.mxu1 %vm1171_vm5, %v2585_v10  ;;  %3936 = vmatprep.subr.mxu1 %v6337_v22 }
 0x528   : > { %3853 = vmatprep.mubr.msk.f32.mxu1 %vm4366_vm0, %v6337_v22 }
 0x52b   : > { %3854 = vmatmul.mubr.msk.f32.gmra.mxu1 %vm1171_vm5, %v2586_v61  ;;  %v4226_v33 = vpop.eup %4225 }
 0x52c   : > { %3856 = vmatprep.mubr.msk.f32.mxu1 %vm4366_vm0, %v6337_v22  ;;  %v2590_v56 = vmul.f32 %v4226_v33, %v6005_v63  ;;  %v2909_v33 = vld [vmem:[#allocation4 + $0x68] sm:$0xff] }
 0x52f   : > { %3857 = vmatmul.mubr.msk.f32.gmra.mxu1 %vm1171_vm5, %v2587_v25  ;;  %v1823_v8 = vpop.f32.mrf.mxu1  ;;  %v4228_v32 = vpop.eup %4227 }
 0x530   : > { %3859 = vmatprep.mubr.msk.f32.mxu1 %vm4366_vm0, %v6337_v22  ;;  %v2591_v52 = vmul.f32 %v4228_v32, %v6009_v46  ;;  %v2904_v32 = vld [vmem:[#allocation4 + $0x40] sm:$0xff] }
 0x531   : > { %v3672_v5 = vpop.f32.mrf.mxu1 }
 0x532   : > { %v2910_v5 = vld [vmem:[#allocation4 + $0x70] sm:$0xff] }
 0x533   : > { %3860 = vmatmul.mubr.msk.f32.gmra.mxu1 %vm1171_vm5, %v2588_v24  ;;  %v1828_v3 = vpop.f32.mrf.mxu1 }
 0x534   : > { %3862 = vmatprep.mubr.msk.f32.mxu1 %vm4366_vm0, %v6337_v22  ;;  %v4029_v15 = vpack.i.bf16 %v1828_v3, %v1823_v8  ;;  %v2911_v8 = vld [vmem:[#allocation4 + $0x78] sm:$0xff]  ;;  %v2908_v3 = vld [vmem:[#allocation4 + $0x60] sm:$0xff] }
 0x535   : > { %v3675_v31 = vpop.f32.mrf.mxu1  ;;  %3878 = vmatpush3.msra.mxu0 %v2911_v8  ;;  %3952 = vmatpush3.msra.mxu1 %v2911_v8 }
 0x536   : > { %4030 = vrot.lane.b32.xlu1 %v4029_v15, %s4371_s11  ;;  %3879 = vmatprep.subr.mxu0 %v6337_v22  ;;  %v2907_v15 = vld [vmem:[#allocation4 + $0x58] sm:$0xff]  ;;  %v2906_v31 = vld [vmem:[#allocation4 + $0x50] sm:$0xff] }
 0x537   : > { %3863 = vmatmul.mubr.msk.f32.gmra.mxu1 %vm1171_vm5, %v2589_v36  ;;  %3937 = vmatprep.subr.mxu1 %v6337_v22 }
 0x538   : > { %3865 = vmatprep.mubr.msk.f32.mxu1 %vm4366_vm0, %v6337_v22  ;;  %v1833_v12 = vpop.f32.mrf.mxu1  ;;  %3880 = vmatpush3.msra.mxu0 %v2910_v5 }
 0x539   : > { %3953 = vmatpush3.msra.mxu1 %v2910_v5  ;;  %3881 = vmatprep.subr.mxu0 %v6337_v22 }
 0x53a   : > { %v3678_v16 = vpop.f32.mrf.mxu1  ;;  %3938 = vmatprep.subr.mxu1 %v6337_v22  ;;  %3882 = vmatpush3.msra.mxu0 %v2909_v33 }
 0x53b   : > { %3866 = vmatmul.mubr.msk.f32.gmra.mxu1 %vm1171_vm5, %v2590_v56  ;;  %3883 = vmatprep.subr.mxu0 %v6337_v22  ;;  %v2905_v56 = vld [vmem:[#allocation4 + $0x48] sm:$0xff]  ;;  %v2902_v16 = vld [vmem:[#allocation4 + $0x30] sm:$0xff] }
 0x53c   : > { %3868 = vmatprep.mubr.msk.f32.mxu1 %vm4366_vm0, %v6337_v22  ;;  %v1838_v47 = vpop.f32.mrf.mxu1  ;;  %3954 = vmatpush3.msra.mxu1 %v2909_v33 }
 0x53d   : > { %3939 = vmatprep.subr.mxu1 %v6337_v22  ;;  %3884 = vmatpush3.msra.mxu0 %v2908_v3 }
 0x53e   : > { %v3681_v51 = vpop.f32.mrf.mxu1  ;;  %3955 = vmatpush3.msra.mxu1 %v2908_v3  ;;  %3885 = vmatprep.subr.mxu0 %v6337_v22 }
 0x53f   : > { %3869 = vmatmul.mubr.msk.f32.gmra.mxu1 %vm1171_vm5, %v2591_v52  ;;  %3940 = vmatprep.subr.mxu1 %v6337_v22  ;;  %v2901_v52 = vld [vmem:[#allocation4 + $0x28] sm:$0xff]  ;;  %v2899_v51 = vld [vmem:[#allocation4 + $0x18] sm:$0xff] }
 0x540   : > { %3871 = vmatprep.mubr.msk.f32.mxu1 %vm4366_vm0, %v6337_v22  ;;  %3886 = vmatpush3.msra.mxu0 %v2907_v15 }
 0x541   : > { %3956 = vmatpush3.msra.mxu1 %v2907_v15  ;;  %3887 = vmatprep.subr.mxu0 %v6337_v22 }
 0x542   : > { %3941 = vmatprep.subr.mxu1 %v6337_v22  ;;  %3888 = vmatpush3.msra.mxu0 %v2906_v31 }
 0x543   : > { %3957 = vmatpush3.msra.mxu1 %v2906_v31  ;;  %3889 = vmatprep.subr.mxu0 %v6337_v22 }
 0x544   : > { %3942 = vmatprep.subr.mxu1 %v6337_v22  ;;  %3890 = vmatpush3.msra.mxu0 %v2905_v56 }
 0x545   : > { %3958 = vmatpush3.msra.mxu1 %v2905_v56  ;;  %3891 = vmatprep.subr.mxu0 %v6337_v22 }
 0x546   : > { %3943 = vmatprep.subr.mxu1 %v6337_v22  ;;  %3892 = vmatpush3.msra.mxu0 %v2904_v32 }
 0x547   : > { %3959 = vmatpush3.msra.mxu1 %v2904_v32  ;;  %3893 = vmatprep.subr.mxu0 %v6337_v22 }
 0x548   : > { %3944 = vmatprep.subr.mxu1 %v6337_v22 }
 0x556   : > { %v2572_v29 = vpop.xlane.xlu0 %2571 }
 0x557   : > { %4229 = vrcp.f32 %v2572_v29  ;;  %v2897_v29 = vld [vmem:[#allocation4 + $0x8] sm:$0xff] }
 0x558   : > { %4231 = vrcp.f32 %v2575_v23  ;;  %v2898_v23 = vld [vmem:[#allocation4 + $0x10] sm:$0xff] }
 0x564   : > { %v4230_v63 = vpop.eup %4229 }
 0x565   : > { %v2592_v17 = vmul.f32 %v4230_v63, %v6044_v13  ;;  %v4232_v34 = vpop.eup %4231  ;;  %v2896_v63 = vld [vmem:[#allocation4] sm:$0xff] }
 0x566   : > { %v2593_v46 = vmul.f32 %v4232_v34, %v6013_v19 }
 0x567   : > { %3872 = vmatmul.mubr.msk.f32.gmra.mxu1 %vm1171_vm5, %v2592_v17 }
 0x568   : > { %3874 = vmatprep.mubr.msk.f32.mxu1 %vm4366_vm0, %v6337_v22 }
 0x56b   : > { %3875 = vmatmul.mubr.msk.f32.gmra.mxu1 %vm1171_vm5, %v2593_v46 }
 0x56c   : > { %3924 = vmatprep.mubr.msk.f32.mxu1 %vm4366_vm0, %v6337_v22  ;;  %v1843_v18 = vpop.f32.mrf.mxu1 }
 0x56e   : > { %v3684_v59 = vpop.f32.mrf.mxu1 }
 0x570   : > { %v1848_v21 = vpop.f32.mrf.mxu1 }
 0x571   : > { %v4034_v39 = vpack.i.bf16 %v1833_v12, %v1848_v21  ;;  %v2903_v12 = vld [vmem:[#allocation4 + $0x38] sm:$0xff] }
 0x572   : > { %v3687_v60 = vpop.f32.mrf.mxu1  ;;  %3894 = vmatpush3.msra.mxu0 %v2903_v12  ;;  %3960 = vmatpush3.msra.mxu1 %v2903_v12 }
 0x573   : > { %4035 = vrot.lane.b32.xlu1 %v4034_v39, %s4371_s11  ;;  %3895 = vmatprep.subr.mxu0 %v6337_v22 }
 0x574   : > { %v1853_v13 = vpop.f32.mrf.mxu1  ;;  %3945 = vmatprep.subr.mxu1 %v6337_v22  ;;  %3896 = vmatpush3.msra.mxu0 %v2902_v16 }
 0x575   : > { %v4039_v43 = vpack.i.bf16 %v1838_v47, %v1853_v13  ;;  %3961 = vmatpush3.msra.mxu1 %v2902_v16  ;;  %3897 = vmatprep.subr.mxu0 %v6337_v22  ;;  %v2900_v47 = vld [vmem:[#allocation4 + $0x20] sm:$0xff] }
 0x576   : > { %v3690_v44 = vpop.f32.mrf.mxu1  ;;  %3946 = vmatprep.subr.mxu1 %v6337_v22  ;;  %3898 = vmatpush3.msra.mxu0 %v2901_v52 }
 0x577   : > { %4040 = vrot.lane.b32.xlu1 %v4039_v43, %s4371_s11  ;;  %3962 = vmatpush3.msra.mxu1 %v2901_v52 }
 0x578   : > { %v1858_v28 = vpop.f32.mrf.mxu1  ;;  %3899 = vmatprep.subr.mxu0 %v6337_v22  ;;  %3947 = vmatprep.subr.mxu1 %v6337_v22 }
 0x579   : > { %v4049_v48 = vpack.i.bf16 %v1843_v18, %v1858_v28  ;;  %3900 = vmatpush3.msra.mxu0 %v2900_v47  ;;  %3963 = vmatpush3.msra.mxu1 %v2900_v47 }
 0x57a   : > { %v3693_v38 = vpop.f32.mrf.mxu1  ;;  %3901 = vmatprep.subr.mxu0 %v6337_v22  ;;  %3948 = vmatprep.subr.mxu1 %v6337_v22 }
 0x57b   : > { %3902 = vmatpush3.msra.mxu0 %v2899_v51  ;;  %3964 = vmatpush3.msra.mxu1 %v2899_v51 }
 0x57c   : > { %3903 = vmatprep.subr.mxu0 %v6337_v22  ;;  %3949 = vmatprep.subr.mxu1 %v6337_v22 }
 0x57d   : > { %3904 = vmatpush3.msra.mxu0 %v2898_v23  ;;  %3965 = vmatpush3.msra.mxu1 %v2898_v23 }
 0x57e   : > { %3905 = vmatprep.subr.mxu0 %v6337_v22  ;;  %3950 = vmatprep.subr.mxu1 %v6337_v22 }
 0x57f   : > { %3906 = vmatpush3.msra.mxu0 %v2897_v29  ;;  %3966 = vmatpush3.msra.mxu1 %v2897_v29 }
 0x580   : > { %3907 = vmatprep.subr.mxu0 %v6337_v22  ;;  %3951 = vmatprep.subr.mxu1 %v6337_v22 }
 0x581   : > { %3908 = vmatpush3.msra.mxu0 %v2896_v63  ;;  %3967 = vmatpush3.msra.mxu1 %v2896_v63 }
 0x584   : > { %v6155_v19 = vpop.f32.mrf.mxu1 }
 0x586   : > { %v3696_v53 = vpop.f32.mrf.mxu1 }
 0x588   : > { %v2269_v41 = vpop.f32.mrf.mxu1 }
 0x58a   : > { %v3762_v2 = vpop.f32.mrf.mxu1 }
 0x58c   : > { %v2274_v1 = vpop.f32.mrf.mxu1 }
 0x58d   : > { %v4044_v37 = vpack.i.bf16 %v2274_v1, %v2269_v41 }
 0x58e   : > { %v3765_v4 = vpop.f32.mrf.mxu1 }
 0x58f   : > { %4045 = vrot.lane.b32.xlu0 %v4044_v37, %s4370_s17 }
 0x590   : > { %v2279_v20 = vpop.f32.mrf.mxu1 }
 0x592   : > { %v3768_v11 = vpop.f32.mrf.mxu1 }
 0x593   : > { %4050 = vrot.lane.b32.xlu0 %v4049_v48, %s4371_s11 }
 0x598   : > { %v2284_v6 = vpop.f32.mrf.mxu1 }
 0x59a   : > { %v3771_v58 = vpop.f32.mrf.mxu1 }
 0x59c   : > { %v2289_v35 = vpop.f32.mrf.mxu1 }
 0x59e   : > { %v3774_v40 = vpop.f32.mrf.mxu1 }
 0x5a0   : > { %v2294_v10 = vpop.f32.mrf.mxu1 }
 0x5a1   : > { %v4054_v26 = vpack.i.bf16 %v2279_v20, %v2294_v10 }
 0x5a2   : > { %v3777_v62 = vpop.f32.mrf.mxu1 }
 0x5a3   : > { %4055 = vrot.lane.b32.xlu1 %v4054_v26, %s4370_s17 }
 0x5a4   : > { %v2299_v61 = vpop.f32.mrf.mxu1 }
 0x5a5   : > { %v4059_v27 = vpack.i.bf16 %v2284_v6, %v2299_v61 }
 0x5a6   : > { %v3780_v49 = vpop.f32.mrf.mxu1 }
 0x5a7   : > { %4060 = vrot.lane.b32.xlu0 %v4059_v27, %s4370_s17 }
 0x5a8   : > { %v2304_v25 = vpop.f32.mrf.mxu1  ;;  %v4031_v37 = vpop.permute.xlu1 %4030 }
 0x5a9   : > { %v4064_v9 = vpack.i.bf16 %v2289_v35, %v2304_v25  ;;  %v4032_v25 = vunpack.i.l.bf16 %v4031_v37 }
 0x5aa   : > { %v3783_v24 = vpop.f32.mrf.mxu1 }
 0x5ab   : > { %4065 = vrot.lane.b32.xlu1 %v4064_v9, %s4370_s17  ;;  %v2867_v8 = vsel %vm1006_vm3, %v6096_v45, %v4032_v25 }
 0x5ac   : > { %v6162_v7 = vpop.f32.mrf.mxu1 }
 0x5ae   : > { %v3786_v36 = vpop.f32.mrf.mxu1 }
 0x5e5   : > { %v4036_v4 = vpop.permute.xlu1 %4035 }
 0x5e6   : > { %v4038_v45 = vunpack.i.h.bf16 %v4036_v4  ;;  %v4037_v32 = vunpack.i.l.bf16 %v4036_v4 }
 0x5e7   : > { %v2715_v17 = vpop.f32.mrf.mxu1 }
 0x5e8   : > { %v2872_v47 = vsel %vm1006_vm3, %v6106_v30, %v4037_v32 }
 0x5e9   : > { %v3852_v34 = vpop.f32.mrf.mxu1  ;;  %v6199_v48 = vpop.permute.xlu1 %4040 }
 0x5ea   : > { %v4043_v23 = vunpack.i.h.bf16 %v6199_v48  ;;  %v4042_v29 = vunpack.i.l.bf16 %v6199_v48 }
 0x5eb   : > { %v2720_v46 = vpop.f32.mrf.mxu1 }
 0x5ec   : > { %v4069_v18 = vpack.i.bf16 %v2720_v46, %v2715_v17 }
 0x5ed   : > { %v3855_v59 = vpop.f32.mrf.mxu1 }
 0x5ee   : > { %4070 = vrot.lane.b32.xlu1 %v4069_v18, %s4369_s20 }
 0x5ef   : > { %v2725_v21 = vpop.f32.mrf.mxu1 }
 0x5f1   : > { %v3858_v39 = vpop.f32.mrf.mxu1 }
 0x5f3   : > { %v2730_v60 = vpop.f32.mrf.mxu1 }
 0x5f5   : > { %v3861_v13 = vpop.f32.mrf.mxu1 }
 0x5f6   : > { %v2870_v13 = vsel %vm1006_vm3, %v6102_v50, %v4043_v23 }
 0x5f7   : > { %v2735_v43 = vpop.f32.mrf.mxu1 }
 0x5f9   : > { %v3864_v44 = vpop.f32.mrf.mxu1 }
 0x5fb   : > { %v2740_v28 = vpop.f32.mrf.mxu1 }
 0x5fc   : > { %v4074_v38 = vpack.i.bf16 %v2725_v21, %v2740_v28 }
 0x5fd   : > { %v3867_v53 = vpop.f32.mrf.mxu1 }
 0x5fe   : > { %4075 = vrot.lane.b32.xlu1 %v4074_v38, %s4369_s20 }
 0x5ff   : > { %v2745_v41 = vpop.f32.mrf.mxu1 }
 0x600   : > { %v4079_v2 = vpack.i.bf16 %v2730_v60, %v2745_v41 }
 0x601   : > { %v3870_v1 = vpop.f32.mrf.mxu1  ;;  %v4046_v20 = vpop.permute.xlu0 %4045 }
 0x602   : > { %4080 = vrot.lane.b32.xlu1 %v4079_v2, %s4369_s20  ;;  %v4047_v9 = vunpack.i.l.bf16 %v4046_v20  ;;  %v4048_v36 = vunpack.i.h.bf16 %v4046_v20 }
 0x604   : > { %v2877_v33 = vsel %vm2876_vm7, %v2867_v8, %v4047_v9 }
 0x605   : > { %v6201_v11 = vpop.permute.xlu0 %4050 }
 0x606   : > { %2784 = vrot.lane.b32.xlu1 %v6155_v19, %s4371_s11  ;;  %v4053_v58 = vunpack.i.h.bf16 %v6201_v11  ;;  %v4052_v50 = vunpack.i.l.bf16 %v6201_v11 }
 0x608   : > { %v2871_v10 = vsel %vm1006_vm3, %v6104_v57, %v4053_v58  ;;  %v4033_v57 = vunpack.i.h.bf16 %v4031_v37  ;;  %v2874_v41 = vsel %vm1006_vm3, %v6110_v14, %v4052_v50 }
 0x615   : > { %v4056_v6 = vpop.permute.xlu1 %4055 }
 0x616   : > { %v4058_v12 = vunpack.i.h.bf16 %v4056_v6  ;;  %v4057_v16 = vunpack.i.l.bf16 %v4056_v6 }
 0x618   : > { %v2882_v34 = vsel %vm2876_vm7, %v2872_v47, %v4057_v16 }
 0x619   : > { %v4061_v52 = vpop.permute.xlu0 %4060 }
 0x61a   : > { %v4063_v46 = vunpack.i.h.bf16 %v4061_v52  ;;  %v4062_v18 = vunpack.i.l.bf16 %v4061_v52 }
 0x61c   : > { %v2880_v44 = vsel %vm2876_vm7, %v2870_v13, %v4063_v46 }
 0x61d   : > { %v6204_v35 = vpop.permute.xlu1 %4065 }
 0x61e   : > { %v4068_v40 = vunpack.i.h.bf16 %v6204_v35 }
 0x620   : > { %v6210_v19 = vsel %vm2876_vm7, %v2871_v10, %v4068_v40 }
 0x627   : > { %v2750_v26 = vpop.f32.mrf.mxu1 }
 0x628   : > { %2854 = vrot.lane.b32.xlu0 %v2750_v26, %s4369_s20 }
 0x629   : > { %v3873_v62 = vpop.f32.mrf.mxu1 }
 0x62b   : > { %v2755_v61 = vpop.f32.mrf.mxu1 }
 0x62c   : > { %v4084_v27 = vpack.i.bf16 %v2755_v61, %v2735_v43  ;;  %2820 = vrot.lane.b32.xlu0 %v6162_v7, %s4370_s17  ;;  %v2868_v7 = vsel %vm1006_vm3, %v6098_v0, %v4033_v57  ;;  %v2869_v0 = vsel %vm1006_vm3, %v6100_v55, %v4038_v45  ;;  %v2873_v43 = vsel %vm1006_vm3, %v6108_v54, %v4042_v29 }
 0x62d   : > { %v3876_v49 = vpop.f32.mrf.mxu1  ;;  %v2878_v31 = vsel %vm2876_vm7, %v2868_v7, %v4048_v36  ;;  %v2879_v59 = vsel %vm2876_vm7, %v2869_v0, %v4058_v12  ;;  %v2883_v28 = vsel %vm2876_vm7, %v2873_v43, %v4062_v18  ;;  %v4067_v54 = vunpack.i.l.bf16 %v6204_v35 }
 0x62e   : > { %4085 = vrot.lane.b32.xlu1 %v4084_v27, %s4369_s20 }
 0x62f   : > { %v2884_v1 = vsel %vm2876_vm7, %v2874_v41, %v4067_v54 }
 0x660   : > { %v4071_v24 = vpop.permute.xlu1 %4070 }
 0x661   : > { %v4072_v5 = vunpack.i.l.bf16 %v4071_v24  ;;  %v4073_v3 = vunpack.i.h.bf16 %v4071_v24 }
 0x663   : > { %v2887_v15 = vsel %vm2886_vm8, %v2877_v33, %v4072_v5  ;;  %v2888_v56 = vsel %vm2886_vm8, %v2878_v31, %v4073_v3 }
 0x664   : > { %3910 = vmatmul.mubr.f32.vlgmr.msra.gmra.mxu0 %v2887_v15 }
 0x665   : > { %3912 = vmatprep.mubr.msk.f32.mxu0 %vm4366_vm0, %v6337_v22 }
 0x668   : > { %3913 = vmatmul.mubr.f32.gmra.mxu0 %v2888_v56 }
 0x669   : > { %3915 = vmatprep.mubr.msk.f32.mxu0 %vm4366_vm0, %v6337_v22 }
 0x670   : > { %v4076_v51 = vpop.permute.xlu1 %4075 }
 0x671   : > { %v4078_v63 = vunpack.i.h.bf16 %v4076_v51  ;;  %v4077_v17 = vunpack.i.l.bf16 %v4076_v51 }
 0x673   : > { %v2889_v21 = vsel %vm2886_vm8, %v2879_v59, %v4078_v63  ;;  %v2892_v30 = vsel %vm2886_vm8, %v2882_v34, %v4077_v17 }
 0x674   : > { %v4081_v39 = vpop.permute.xlu1 %4080  ;;  %3916 = vmatmul.mubr.f32.gmra.mxu0 %v2889_v21  ;;  %3925 = vmatmul.mubr.f32.vlgmr.msra.gmra.mxu1 %v2892_v30 }
 0x675   : > { %v4083_v55 = vunpack.i.h.bf16 %v4081_v39  ;;  %v4082_v60 = vunpack.i.l.bf16 %v4081_v39  ;;  %3918 = vmatprep.mubr.msk.f32.mxu0 %vm4366_vm0, %v6337_v22  ;;  %3927 = vmatprep.mubr.msk.f32.mxu1 %vm4366_vm0, %v6337_v22 }
 0x677   : > { %v2890_v38 = vsel %vm2886_vm8, %v2880_v44, %v4083_v55  ;;  %v2893_v53 = vsel %vm2886_vm8, %v2883_v28, %v4082_v60 }
 0x678   : > { %3919 = vmatmul.mubr.f32.gmra.mxu0 %v2890_v38  ;;  %3928 = vmatmul.mubr.f32.gmra.mxu1 %v2893_v53  ;;  %v2785_v4 = vpop.permute.xlu1 %2784 }
 0x679   : > { %3930 = vmatprep.mubr.msk.f32.mxu1 %vm4366_vm0, %v6337_v22  ;;  %3921 = vmatprep.mubr.msk.f32.mxu0 %vm4366_vm0, %v6337_v22  ;;  %v2875_v11 = vsel %vm1006_vm3, %v6112_v42, %v2785_v4 }
 0x69a   : > { %v2855_v2 = vpop.permute.xlu0 %2854 }
 0x69b   : > { %v2894_v37 = vsel %vm2886_vm8, %v2884_v1, %v2855_v2 }
 0x69c   : > { %3931 = vmatmul.mubr.f32.gmra.mxu1 %v2894_v37 }
 0x69d   : > { %3933 = vmatprep.mubr.msk.f32.mxu1 %vm4366_vm0, %v6337_v22  ;;  %v3261_v22 = vld [vmem:[%s6293_s3] ss:$0 sm:$0xff] }
 0x69e   : > { %v2821_v20 = vpop.permute.xlu0 %2820 }
 0x69f   : > { %v2885_v14 = vsel %vm2876_vm7, %v2875_v11, %v2821_v20 }
 0x6a0   : > { %v4086_v48 = vpop.permute.xlu1 %4085 }
 0x6a1   : > { %v4088_v6 = vunpack.i.h.bf16 %v4086_v48  ;;  %v4087_v58 = vunpack.i.l.bf16 %v4086_v48 }
 0x6a3   : > { %v2891_v35 = vsel %vm2886_vm8, %v6210_v19, %v4087_v58  ;;  %v2895_v40 = vsel %vm2886_vm8, %v2885_v14, %v4088_v6 }
 0x6a4   : > { %3922 = vmatmul.mubr.f32.gmra.mxu0 %v2891_v35  ;;  %3934 = vmatmul.mubr.f32.gmra.mxu1 %v2895_v40 }
 0x724   : > { %v2985_v42 = vpop.f32.mrf.mxu0 }
 0x725   : > { %v2986_v10 = vadd.f32 %v3261_v22, %v2985_v42 }
 0x726   : > { %v3911_v19 = vpop.f32.mrf.mxu0 }
 0x727   : > { %3029 = vst [vmem:[%s6276_s16] sm:$0xff] %v2986_v10 }
 0x728   : > { %v2990_v26 = vpop.f32.mrf.mxu0 }
 0x729   : > { %v2991_v62 = vadd.f32 %v3261_v22, %v2990_v26 }
 0x72a   : > { %v3914_v61 = vpop.f32.mrf.mxu0 }
 0x72b   : > { %3030 = vst [vmem:[%s6276_s16 + $0x8] sm:$0xff] %v2991_v62 }
 0x734   : > { %v2995_v27 = vpop.f32.mrf.mxu0  ;;  %v3010_v49 = vpop.f32.mrf.mxu1 }
 0x735   : > { %v2996_v25 = vadd.f32 %v3261_v22, %v2995_v27  ;;  %v3011_v9 = vadd.f32 %v3261_v22, %v3010_v49 }
 0x736   : > { %v3917_v24 = vpop.f32.mrf.mxu0  ;;  %v3926_v57 = vpop.f32.mrf.mxu1 }
 0x737   : > { %3031 = vst [vmem:[%s6276_s16 + $0x10] sm:$0xff] %v2996_v25  ;;  %3034 = vst [vmem:[%s6276_s16 + $0x28] sm:$0xff] %v3011_v9 }
 0x738   : > { %v3000_v8 = vpop.f32.mrf.mxu0  ;;  %v3015_v5 = vpop.f32.mrf.mxu1 }
 0x739   : > { %v3001_v36 = vadd.f32 %v3261_v22, %v3000_v8  ;;  %v3016_v33 = vadd.f32 %v3261_v22, %v3015_v5 }
 0x73a   : > { %v3920_v3 = vpop.f32.mrf.mxu0  ;;  %v3929_v15 = vpop.f32.mrf.mxu1 }
 0x73b   : > { %3032 = vst [vmem:[%s6276_s16 + $0x18] sm:$0xff] %v3001_v36  ;;  %3035 = vst [vmem:[%s6276_s16 + $0x30] sm:$0xff] %v3016_v33 }
 0x75c   : > { %v3020_v7 = vpop.f32.mrf.mxu1 }
 0x75d   : > { %v3021_v31 = vadd.f32 %v3261_v22, %v3020_v7 }
 0x75e   : > { %v3932_v56 = vpop.f32.mrf.mxu1 }
 0x75f   : > { %3036 = vst [vmem:[%s6276_s16 + $0x38] sm:$0xff] %v3021_v31 }
 0x764   : > { %v3005_v45 = vpop.f32.mrf.mxu0  ;;  %v3025_v32 = vpop.f32.mrf.mxu1 }
 0x765   : > { %v3006_v12 = vadd.f32 %v3261_v22, %v3005_v45  ;;  %v3026_v16 = vadd.f32 %v3261_v22, %v3025_v32 }
 0x766   : > { %v3923_v52 = vpop.f32.mrf.mxu0  ;;  %v3935_v47 = vpop.f32.mrf.mxu1 }
 0x767   : > { %3033 = vst [vmem:[%s6276_s16 + $0x20] sm:$0xff] %v3006_v12  ;;  %3037 = vst [vmem:[%s6276_s16 + $0x40] sm:$0x1] %v3026_v16 }
 0x768 PF: > { %s20_s24 = sadd.s32 1, %s4355_s24  }
 0x769   : > { %p17_p7 = scmp.ge.s32.totalorder %s20_s24, 4  }
 0x76b   :  { %19 = sbr.rel (!%p17_p7) target bundleno = 3 (0x3), region = 95 }
 0x770   :  { %3059 = vsyncpa [#allocation3], 1 }
 0x771   :  { %3061 = vsyncpa [#allocation3 + $0x1], 1 }
 0x772   :  { %3062 = vsyncpa [#allocation5], 1 }
 0x773   :  { %3063 = vsyncpa [#allocation8], 1 }

</bundles_post_ra>
